<compile_context>
chip_gen: v7x
topology: tpu7x:2x2x1
jax: 0.10.0
libtpu: 0.0.40
codegen_flags: <defaults>
</compile_context>

<pallas_src>
import jax
import jax.numpy as jnp
from jax.experimental import pallas as pl
from jax.experimental.pallas import tpu as pltpu

# ---- small, module-consistent sizes ----
N_NODES = 16          # number of graph nodes == LSTM sequence length
N_FEAT = 8            # num_node_features
GAT_HIDDEN = 8        # hidden_size (per head)
N_HEADS = 4           # num_heads (concat=True -> GAT output dim = 32)
LSTM_HIDDEN = 32      # lstm_hidden_size
N_LAYERS = 2          # num_layers (the wavefront packing below is specialized to 2)
NEG_SLOPE = 0.2       # GATConv LeakyReLU negative slope
D_GAT = N_HEADS * GAT_HIDDEN


def gat_lstm_kernel(
    x_ref, adj4_ref, wg_ref, cd_ref, cs_ref, diag_ref, tileeye_ref, blkmask_ref,
    wih1p_ref, wbig_ref, misc_ref,
    out_ref, hn_ref, cn_ref,
    adyn_ref, seq2_ref,
):
    N = N_NODES
    H = LSTM_HIDDEN
    H2 = 2 * H                       # fused (layer-1 | layer-2) state width = 64
    f32 = jnp.float32
    NEG = jnp.float32(-1e30)

    # ---------------- GAT: all heads fused, lane-concatenated [N, 4N] ----------------
    x = x_ref[...]                                                        # [N, F]
    h = jnp.dot(x, wg_ref[...], preferred_element_type=f32)              # [N, D_GAT]

    # dst logits (const-folded): D[i, hd*N + j] = <h_i^hd, a_dst^hd>
    Dm = jnp.dot(h, cd_ref[...], preferred_element_type=f32)             # [N, 4N]
    # src logits: diag-scatter then sublane reduce -> one row; broadcast via add
    B = jnp.dot(h, cs_ref[...], preferred_element_type=f32) * diag_ref[...]
    s_row = jnp.sum(B, axis=0, keepdims=True)                            # [1, 4N]

    e = Dm + s_row
    e = jnp.where(e >= 0.0, e, NEG_SLOPE * e)                            # LeakyReLU(0.2)
    mask = adj4_ref[...] > 0.0
    e = jnp.where(mask, e, NEG)                                          # mask non-edges

    # per-head-block softmax (stabilized with the PER-BLOCK max; self loops guarantee
    # at least one real entry per block, so denom >= 1 and no 0/0 can occur)
    lane = jax.lax.broadcasted_iota(jnp.int32, (N, N_HEADS * N), 1)
    blk_masks = [(lane >= hd * N) & (lane < (hd + 1) * N) for hd in range(N_HEADS)]

    m_full = jnp.zeros_like(e)
    for hd in range(N_HEADS):
        m_hd = jnp.max(jnp.where(blk_masks[hd], e, NEG), axis=1, keepdims=True)   # [N, 1]
        m_full = jnp.where(blk_masks[hd], m_hd, m_full)

    p = jnp.where(mask, jnp.exp(e - m_full), 0.0)                        # [N, 4N]

    denom = jnp.zeros_like(p)
    for hd in range(N_HEADS):
        s_hd = jnp.sum(jnp.where(blk_masks[hd], p, 0.0), axis=1, keepdims=True)   # [N, 1]
        denom = jnp.where(blk_masks[hd], s_hd, denom)
    attn = p / denom                                                      # [N, 4N]

    # packed tiny constants: row0 = brow (b_ih+b_hh, both layers), row1 = b_gat,
    # row2 = w_fc, row3 = b_fc
    misc = misc_ref[...]                                                  # [4, 8H]
    brow = misc[0:1, :]                                                   # [1, 8H]
    bg = misc[1:2, 0:D_GAT]                                               # [1, D_GAT]
    wfc = misc[2:3, 0:H]                                                  # [1, H]
    bfc = misc[3:4, 0:1]                                                  # [1, 1]

    # block-diagonal arrangement of per-head features, then one aggregation matmul
    hblk = (jnp.dot(tileeye_ref[...], h, preferred_element_type=f32)
            * blkmask_ref[...])                                           # [4N, D_GAT]
    gat = jnp.dot(attn, hblk, preferred_element_type=f32) + bg            # [N, D_GAT]
    seq = jnp.maximum(gat, 0.0)                                           # ReLU

    # ---------------- stacked LSTM: 2 layers, wavefront-interleaved ----------------
    # fused gate layout (256 lanes): [i1 i2 | f1 f2 | o1 o2 | g1 g2], 32 lanes each
    # -> one sigmoid over the first 3*H2 lanes, one tanh over the trailing H2 lanes.
    # layer-1 input contribution for the whole sequence (staged to VMEM, read per step)
    adyn_ref[...] = jnp.dot(seq, wih1p_ref[...], preferred_element_type=f32) + brow  # [N, 8H]

    wbig = wbig_ref[...]                                                  # [2H, 8H]
    lane2 = jax.lax.broadcasted_iota(jnp.int32, (1, H2), 1)
    mask_l1 = (lane2 < H).astype(f32)                                     # keep layer-1 half only

    h_cat = jnp.zeros((1, H2), f32)                                       # [h1 | h2]
    c_cat = jnp.zeros((1, H2), f32)                                       # [c1 | c2]

    # super-step s: layer-1 computes timestep s, layer-2 computes timestep s-1.
    # (At s == N the layer-1 half computes a nonexistent timestep N with bias-only
    #  input; its result is never read.)
    for s in range(N + 1):
        add_s = adyn_ref[s:s + 1, :] if s < N else brow
        g = jnp.dot(h_cat, wbig, preferred_element_type=f32) + add_s      # [1, 8H]
        sg = jax.nn.sigmoid(g[:, 0:3 * H2])                               # i|f|o, [1, 3*H2]
        tg = jnp.tanh(g[:, 3 * H2:4 * H2])                                # fused "g" gates, [1, 2H]
        c_new = sg[:, H2:2 * H2] * c_cat + sg[:, 0:H2] * tg               # f*c + i*g
        h_new = sg[:, 2 * H2:3 * H2] * jnp.tanh(c_new)                    # o*tanh(c)
        if s == 0:
            # layer-2 half of super-step 0 is timestep "-1": keep its state at zero
            c_new = c_new * mask_l1
            h_new = h_new * mask_l1
        if s == N - 1:                                                    # layer-1 final state
            hn_ref[0:1, :] = h_new[:, 0:H]
            cn_ref[0:1, :] = c_new[:, 0:H]
        if s >= 1:                                                        # layer-2 output at time s-1
            seq2_ref[s - 1:s, :] = h_new[:, H:H2]
        h_cat = h_new
        c_cat = c_new

    hn_ref[1:2, :] = h_cat[:, H:H2]                                       # layer-2 final state
    cn_ref[1:2, :] = c_cat[:, H:H2]

    # ---------------- final Linear(lstm_hidden, 1), lane-dense [1, N] output ----------------
    y = jax.lax.dot_general(wfc, seq2_ref[...],
                            dimension_numbers=(((1,), (1,)), ((), ())),
                            preferred_element_type=f32)                   # [1, N]
    out_ref[...] = y + bfc


def _const_spec(a):
    nd = a.ndim
    return pl.BlockSpec(a.shape, lambda g, nd=nd: (0,) * nd)


def _graph_spec(a):
    tail = tuple(a.shape[1:])
    nd = len(tail)
    return pl.BlockSpec((None,) + tail, lambda g, nd=nd: (g,) + (0,) * nd)


def _scatter_gates(wT, layer):
    """wT: [in, 4H] in PyTorch gate order (i,f,g,o).  Returns [in, 8H] with each gate
    block placed at the wavefront-interleaved lane position for `layer` (0 or 1),
    using the fused layout [i1 i2 | f1 f2 | o1 o2 | g1 g2]."""
    H = LSTM_HIDDEN
    pos = (0, 1, 3, 2)                           # i -> 0, f -> 1, g -> 3, o -> 2
    out = jnp.zeros((wT.shape[0], 2 * 4 * H), jnp.float32)
    for gi in range(4):
        col = pos[gi] * 2 * H + layer * H
        out = out.at[:, col:col + H].set(wT[:, gi * H:(gi + 1) * H])
    return out


def gat_lstm_forward(x, adj, params):
    """x: [G, N, F] node features for G graphs; adj: [G, N, N] dense adjacency with
    adj[g, i, j] = 1 iff edge j -> i (self loops included, matching add_self_loops=True)."""
    assert N_LAYERS == 2, "wavefront LSTM packing is specialized to 2 layers"
    N, H, NH, HG = N_NODES, LSTM_HIDDEN, N_HEADS, GAT_HIDDEN
    f32 = jnp.float32
    G = x.shape[0]

    # ---- GAT structural constants + const-folded attention weights (host-side glue) ----
    eye_n = jnp.eye(N, dtype=f32)
    expander4 = jnp.kron(jnp.eye(NH, dtype=f32), jnp.ones((1, N), f32))       # [4, 4N]
    head_ind = jnp.kron(jnp.eye(NH, dtype=f32), jnp.ones((HG, 1), f32))       # [D_GAT, 4]
    a_dst_sc = params["a_dst"].reshape(D_GAT, 1) * head_ind                   # [D_GAT, 4]
    a_src_sc = params["a_src"].reshape(D_GAT, 1) * head_ind                   # [D_GAT, 4]
    cd = a_dst_sc @ expander4                                                 # [D_GAT, 4N]
    cs = a_src_sc @ expander4                                                 # [D_GAT, 4N]
    diagmask = jnp.tile(eye_n, (1, NH))                                       # [N, 4N]
    tile_eye = jnp.tile(eye_n, (NH, 1))                                       # [4N, N]
    blockmask = jnp.kron(jnp.eye(NH, dtype=f32), jnp.ones((N, HG), f32))      # [4N, D_GAT]
    adj4 = jnp.tile(adj, (1, 1, NH))                                          # [G, N, 4N]

    # ---- wavefront-packed LSTM weights ----
    (w_ih1, w_hh1, b_ih1, b_hh1), (w_ih2, w_hh2, b_ih2, b_hh2) = params["lstm"]
    wih1p = _scatter_gates(w_ih1.T, 0)                                        # [D_GAT, 8H]
    w_big = jnp.concatenate(
        [_scatter_gates(w_hh1.T, 0) + _scatter_gates(w_ih2.T, 1),             # rows for h1
         _scatter_gates(w_hh2.T, 1)],                                         # rows for h2
        axis=0)                                                               # [2H, 8H]
    bias_row = (_scatter_gates((b_ih1 + b_hh1).reshape(1, 4 * H), 0)
                + _scatter_gates((b_ih2 + b_hh2).reshape(1, 4 * H), 1))       # [1, 8H]

    # ---- pack tiny bias/linear rows into one buffer ----
    misc = jnp.zeros((4, 8 * H), f32)
    misc = misc.at[0, :].set(bias_row[0])
    misc = misc.at[1, :D_GAT].set(params["b_gat"][0])
    misc = misc.at[2, :H].set(params["w_fc"][0])
    misc = misc.at[3, 0].set(params["b_fc"][0, 0])

    graph_inputs = [x, adj4]
    const_inputs = [params["w_gat"], cd, cs, diagmask, tile_eye, blockmask,
                    wih1p, w_big, misc]
    inputs = graph_inputs + const_inputs

    in_specs = [_graph_spec(a) for a in graph_inputs] + [_const_spec(a) for a in const_inputs]

    out_shape = (
        jax.ShapeDtypeStruct((G, 1, N), f32),
        jax.ShapeDtypeStruct((G, N_LAYERS, H), f32),
        jax.ShapeDtypeStruct((G, N_LAYERS, H), f32),
    )
    out_specs = (
        pl.BlockSpec((None, 1, N), lambda g: (g, 0, 0)),
        pl.BlockSpec((None, N_LAYERS, H), lambda g: (g, 0, 0)),
        pl.BlockSpec((None, N_LAYERS, H), lambda g: (g, 0, 0)),
    )

    y, hn, cn = pl.pallas_call(
        gat_lstm_kernel,
        grid=(G,),
        in_specs=in_specs,
        out_specs=out_specs,
        out_shape=out_shape,
        scratch_shapes=[
            pltpu.VMEM((N, 8 * H), f32),          # staged a_dyn (input gate contributions)
            pltpu.VMEM((N, H), f32),              # layer-2 output sequence
        ],
        compiler_params=pltpu.CompilerParams(dimension_semantics=("parallel",)),
    )(*inputs)

    out = y                                                        # [G, 1, N] == torch fc(out).squeeze(2) per graph
    hidden = (hn.reshape(G, N_LAYERS, 1, H), cn.reshape(G, N_LAYERS, 1, H))
    return out, hidden


def init_params(key):
    ks = jax.random.split(key, 6 + 4 * N_LAYERS)
    params = {
        "w_gat": 0.3 * jax.random.normal(ks[0], (N_FEAT, D_GAT), jnp.float32),
        "a_src": 0.3 * jax.random.normal(ks[1], (N_HEADS, GAT_HIDDEN), jnp.float32),
        "a_dst": 0.3 * jax.random.normal(ks[2], (N_HEADS, GAT_HIDDEN), jnp.float32),
        "b_gat": 0.1 * jax.random.normal(ks[3], (1, D_GAT), jnp.float32),
        "w_fc": 0.3 * jax.random.normal(ks[4], (1, LSTM_HIDDEN), jnp.float32),   # nn.Linear(H, 1).weight
        "b_fc": 0.1 * jax.random.normal(ks[5], (1, 1), jnp.float32),
    }
    lstm = []
    k = 6
    for layer in range(N_LAYERS):
        in_l = D_GAT if layer == 0 else LSTM_HIDDEN
        w_ih = 0.3 * jax.random.normal(ks[k + 0], (4 * LSTM_HIDDEN, in_l), jnp.float32)
        w_hh = 0.3 * jax.random.normal(ks[k + 1], (4 * LSTM_HIDDEN, LSTM_HIDDEN), jnp.float32)
        b_ih = 0.1 * jax.random.normal(ks[k + 2], (4 * LSTM_HIDDEN,), jnp.float32)
        b_hh = 0.1 * jax.random.normal(ks[k + 3], (4 * LSTM_HIDDEN,), jnp.float32)
        k += 4
        lstm.append((w_ih, w_hh, b_ih, b_hh))                      # raw PyTorch orientation
    params["lstm"] = lstm
    return params


if __name__ == "__main__":
    key = jax.random.PRNGKey(0)
    kx, kp = jax.random.split(key)

    G = 8                                                          # graphs batched per pallas_call
    x = jax.random.normal(kx, (G, N_NODES, N_FEAT), jnp.float32)

    # deterministic bidirectional ring graph; dense adjacency adj[i, j]=1 <=> edge j -> i,
    # plus self loops (GATConv default add_self_loops=True), shared across the batch.
    src = jnp.arange(N_NODES)
    dst = (src + 1) % N_NODES
    adj1 = jnp.zeros((N_NODES, N_NODES), jnp.float32)
    adj1 = adj1.at[dst, src].set(1.0)
    adj1 = adj1.at[src, dst].set(1.0)
    adj1 = jnp.maximum(adj1, jnp.eye(N_NODES, dtype=jnp.float32))
    adj = jnp.broadcast_to(adj1, (G, N_NODES, N_NODES))

    params = init_params(kp)

    out, (hn, cn) = gat_lstm_forward(x, adj, params)
    jax.block_until_ready((out, hn, cn))

    assert out.shape == (G, 1, N_NODES)
    assert hn.shape == (G, N_LAYERS, 1, LSTM_HIDDEN)
    assert cn.shape == (G, N_LAYERS, 1, LSTM_HIDDEN)
    print("KERNEL_OK")
</pallas_src>

<mosaic_0001>
module attributes {stable_mosaic.version = 11 : i64} {
  func.func @gat_lstm_kernel(%arg0: i32, %arg1: memref<1x16x8xf32, #tpu.memory_space<vmem>>, %arg2: memref<1x16x64xf32, #tpu.memory_space<vmem>>, %arg3: memref<8x32xf32, #tpu.memory_space<vmem>>, %arg4: memref<32x64xf32, #tpu.memory_space<vmem>>, %arg5: memref<32x64xf32, #tpu.memory_space<vmem>>, %arg6: memref<16x64xf32, #tpu.memory_space<vmem>>, %arg7: memref<64x16xf32, #tpu.memory_space<vmem>>, %arg8: memref<64x32xf32, #tpu.memory_space<vmem>>, %arg9: memref<32x256xf32, #tpu.memory_space<vmem>>, %arg10: memref<64x256xf32, #tpu.memory_space<vmem>>, %arg11: memref<4x256xf32, #tpu.memory_space<vmem>>, %arg12: memref<1x1x16xf32, #tpu.memory_space<vmem>>, %arg13: memref<1x2x32xf32, #tpu.memory_space<vmem>>, %arg14: memref<1x2x32xf32, #tpu.memory_space<vmem>>, %arg15: memref<16x256xf32, #tpu.memory_space<vmem>>, %arg16: memref<16x32xf32, #tpu.memory_space<vmem>>) attributes {dimension_semantics = [#tpu.dimension_semantics<parallel>], iteration_bounds = array<i64: 8>, scalar_prefetch = 0 : i64, scratch_operands = 2 : i64, tpu.core_type = #tpu.core_type<tc>, window_params = [{transform_indices = @transform_0, window_bounds = array<i64: 1, 16, 8>}, {transform_indices = @transform_1, window_bounds = array<i64: 1, 16, 64>}, {pipeline_mode = #tpu.pipeline_mode<synchronous>, transform_indices = @transform_2, window_bounds = array<i64: 8, 32>}, {pipeline_mode = #tpu.pipeline_mode<synchronous>, transform_indices = @transform_3, window_bounds = array<i64: 32, 64>}, {pipeline_mode = #tpu.pipeline_mode<synchronous>, transform_indices = @transform_4, window_bounds = array<i64: 32, 64>}, {pipeline_mode = #tpu.pipeline_mode<synchronous>, transform_indices = @transform_5, window_bounds = array<i64: 16, 64>}, {pipeline_mode = #tpu.pipeline_mode<synchronous>, transform_indices = @transform_6, window_bounds = array<i64: 64, 16>}, {pipeline_mode = #tpu.pipeline_mode<synchronous>, transform_indices = @transform_7, window_bounds = array<i64: 64, 32>}, {pipeline_mode = #tpu.pipeline_mode<synchronous>, transform_indices = @transform_8, window_bounds = array<i64: 32, 256>}, {pipeline_mode = #tpu.pipeline_mode<synchronous>, transform_indices = @transform_9, window_bounds = array<i64: 64, 256>}, {pipeline_mode = #tpu.pipeline_mode<synchronous>, transform_indices = @transform_10, window_bounds = array<i64: 4, 256>}, {transform_indices = @transform_11, window_bounds = array<i64: 1, 1, 16>}, {transform_indices = @transform_12, window_bounds = array<i64: 1, 2, 32>}, {transform_indices = @transform_13, window_bounds = array<i64: 1, 2, 32>}]} {
    %c0 = arith.constant 0 : index
    %c0_0 = arith.constant 0 : index
    %c0_1 = arith.constant 0 : index
    %0 = vector.load %arg1[%c0, %c0_0, %c0_1] : memref<1x16x8xf32, #tpu.memory_space<vmem>>, vector<1x16x8xf32>
    %1 = vector.shape_cast %0 : vector<1x16x8xf32> to vector<16x8xf32>
    %c0_2 = arith.constant 0 : index
    %c0_3 = arith.constant 0 : index
    %2 = vector.load %arg3[%c0_2, %c0_3] : memref<8x32xf32, #tpu.memory_space<vmem>>, vector<8x32xf32>
    %cst = arith.constant dense<0.000000e+00> : vector<16x32xf32>
    %3 = tpu.matmul %1, %2, %cst {dimension_numbers = #tpu.dot_dimension_numbers<[1], [0], [0], [1], [0, 0, 1, 1], [], []>} : vector<16x8xf32>, vector<8x32xf32>, vector<16x32xf32> -> vector<16x32xf32>
    %c0_4 = arith.constant 0 : index
    %c0_5 = arith.constant 0 : index
    %4 = vector.load %arg4[%c0_4, %c0_5] : memref<32x64xf32, #tpu.memory_space<vmem>>, vector<32x64xf32>
    %cst_6 = arith.constant dense<0.000000e+00> : vector<16x64xf32>
    %5 = tpu.matmul %3, %4, %cst_6 {dimension_numbers = #tpu.dot_dimension_numbers<[1], [0], [0], [1], [0, 0, 1, 1], [], []>} : vector<16x32xf32>, vector<32x64xf32>, vector<16x64xf32> -> vector<16x64xf32>
    %c0_7 = arith.constant 0 : index
    %c0_8 = arith.constant 0 : index
    %6 = vector.load %arg5[%c0_7, %c0_8] : memref<32x64xf32, #tpu.memory_space<vmem>>, vector<32x64xf32>
    %cst_9 = arith.constant dense<0.000000e+00> : vector<16x64xf32>
    %7 = tpu.matmul %3, %6, %cst_9 {dimension_numbers = #tpu.dot_dimension_numbers<[1], [0], [0], [1], [0, 0, 1, 1], [], []>} : vector<16x32xf32>, vector<32x64xf32>, vector<16x64xf32> -> vector<16x64xf32>
    %c0_10 = arith.constant 0 : index
    %c0_11 = arith.constant 0 : index
    %8 = vector.load %arg6[%c0_10, %c0_11] : memref<16x64xf32, #tpu.memory_space<vmem>>, vector<16x64xf32>
    %9 = arith.mulf %7, %8 : vector<16x64xf32>
    %cst_12 = arith.constant dense<0.000000e+00> : vector<64xf32>
    %10 = vector.multi_reduction <add>, %9, %cst_12 [0] : vector<16x64xf32> to vector<64xf32>
    %11 = vector.shape_cast %10 : vector<64xf32> to vector<1x64xf32>
    %12 = vector.broadcast %11 : vector<1x64xf32> to vector<16x64xf32>
    %13 = arith.addf %5, %12 : vector<16x64xf32>
    %cst_13 = arith.constant 0.000000e+00 : f32
    %14 = vector.broadcast %cst_13 : f32 to vector<16x64xf32>
    %15 = arith.cmpf oge, %13, %14 : vector<16x64xf32>
    %cst_14 = arith.constant 2.000000e-01 : f32
    %16 = vector.broadcast %cst_14 : f32 to vector<16x64xf32>
    %17 = arith.mulf %16, %13 : vector<16x64xf32>
    %18 = arith.select %15, %13, %17 : vector<16x64xi1>, vector<16x64xf32>
    %c0_15 = arith.constant 0 : index
    %c0_16 = arith.constant 0 : index
    %c0_17 = arith.constant 0 : index
    %19 = vector.load %arg2[%c0_15, %c0_16, %c0_17] : memref<1x16x64xf32, #tpu.memory_space<vmem>>, vector<1x16x64xf32>
    %20 = vector.shape_cast %19 : vector<1x16x64xf32> to vector<16x64xf32>
    %cst_18 = arith.constant 0.000000e+00 : f32
    %21 = vector.broadcast %cst_18 : f32 to vector<16x64xf32>
    %22 = arith.cmpf ogt, %20, %21 : vector<16x64xf32>
    %cst_19 = arith.constant -1.000000e+30 : f32
    %23 = vector.broadcast %cst_19 : f32 to vector<16x64xf32>
    %24 = arith.select %22, %18, %23 : vector<16x64xi1>, vector<16x64xf32>
    %25 = tpu.iota {dimensions = array<i32: 1>} : vector<16x64xi32>
    %c0_i32 = arith.constant 0 : i32
    %26 = vector.broadcast %c0_i32 : i32 to vector<16x64xi32>
    %27 = arith.cmpi sge, %25, %26 : vector<16x64xi32>
    %c16_i32 = arith.constant 16 : i32
    %28 = vector.broadcast %c16_i32 : i32 to vector<16x64xi32>
    %29 = arith.cmpi slt, %25, %28 : vector<16x64xi32>
    %30 = arith.andi %27, %29 : vector<16x64xi1>
    %c16_i32_20 = arith.constant 16 : i32
    %31 = vector.broadcast %c16_i32_20 : i32 to vector<16x64xi32>
    %32 = arith.cmpi sge, %25, %31 : vector<16x64xi32>
    %c32_i32 = arith.constant 32 : i32
    %33 = vector.broadcast %c32_i32 : i32 to vector<16x64xi32>
    %34 = arith.cmpi slt, %25, %33 : vector<16x64xi32>
    %35 = arith.andi %32, %34 : vector<16x64xi1>
    %c32_i32_21 = arith.constant 32 : i32
    %36 = vector.broadcast %c32_i32_21 : i32 to vector<16x64xi32>
    %37 = arith.cmpi sge, %25, %36 : vector<16x64xi32>
    %c48_i32 = arith.constant 48 : i32
    %38 = vector.broadcast %c48_i32 : i32 to vector<16x64xi32>
    %39 = arith.cmpi slt, %25, %38 : vector<16x64xi32>
    %40 = arith.andi %37, %39 : vector<16x64xi1>
    %c48_i32_22 = arith.constant 48 : i32
    %41 = vector.broadcast %c48_i32_22 : i32 to vector<16x64xi32>
    %42 = arith.cmpi sge, %25, %41 : vector<16x64xi32>
    %c64_i32 = arith.constant 64 : i32
    %43 = vector.broadcast %c64_i32 : i32 to vector<16x64xi32>
    %44 = arith.cmpi slt, %25, %43 : vector<16x64xi32>
    %45 = arith.andi %42, %44 : vector<16x64xi1>
    %cst_23 = arith.constant 0.000000e+00 : f32
    %46 = vector.broadcast %cst_23 : f32 to vector<16x64xf32>
    %cst_24 = arith.constant -1.000000e+30 : f32
    %47 = vector.broadcast %cst_24 : f32 to vector<16x64xf32>
    %48 = arith.select %30, %24, %47 : vector<16x64xi1>, vector<16x64xf32>
    %cst_25 = arith.constant dense<0xFF800000> : vector<16xf32>
    %49 = vector.multi_reduction <maximumf>, %48, %cst_25 [1] : vector<16x64xf32> to vector<16xf32>
    %50 = vector.shape_cast %49 : vector<16xf32> to vector<16x1xf32>
    %51 = vector.shape_cast %50 : vector<16x1xf32> to vector<16x1xf32>
    %52 = vector.broadcast %51 : vector<16x1xf32> to vector<16x64xf32>
    %53 = arith.select %30, %52, %46 : vector<16x64xi1>, vector<16x64xf32>
    %cst_26 = arith.constant -1.000000e+30 : f32
    %54 = vector.broadcast %cst_26 : f32 to vector<16x64xf32>
    %55 = arith.select %35, %24, %54 : vector<16x64xi1>, vector<16x64xf32>
    %cst_27 = arith.constant dense<0xFF800000> : vector<16xf32>
    %56 = vector.multi_reduction <maximumf>, %55, %cst_27 [1] : vector<16x64xf32> to vector<16xf32>
    %57 = vector.shape_cast %56 : vector<16xf32> to vector<16x1xf32>
    %58 = vector.shape_cast %57 : vector<16x1xf32> to vector<16x1xf32>
    %59 = vector.broadcast %58 : vector<16x1xf32> to vector<16x64xf32>
    %60 = arith.select %35, %59, %53 : vector<16x64xi1>, vector<16x64xf32>
    %cst_28 = arith.constant -1.000000e+30 : f32
    %61 = vector.broadcast %cst_28 : f32 to vector<16x64xf32>
    %62 = arith.select %40, %24, %61 : vector<16x64xi1>, vector<16x64xf32>
    %cst_29 = arith.constant dense<0xFF800000> : vector<16xf32>
    %63 = vector.multi_reduction <maximumf>, %62, %cst_29 [1] : vector<16x64xf32> to vector<16xf32>
    %64 = vector.shape_cast %63 : vector<16xf32> to vector<16x1xf32>
    %65 = vector.shape_cast %64 : vector<16x1xf32> to vector<16x1xf32>
    %66 = vector.broadcast %65 : vector<16x1xf32> to vector<16x64xf32>
    %67 = arith.select %40, %66, %60 : vector<16x64xi1>, vector<16x64xf32>
    %cst_30 = arith.constant -1.000000e+30 : f32
    %68 = vector.broadcast %cst_30 : f32 to vector<16x64xf32>
    %69 = arith.select %45, %24, %68 : vector<16x64xi1>, vector<16x64xf32>
    %cst_31 = arith.constant dense<0xFF800000> : vector<16xf32>
    %70 = vector.multi_reduction <maximumf>, %69, %cst_31 [1] : vector<16x64xf32> to vector<16xf32>
    %71 = vector.shape_cast %70 : vector<16xf32> to vector<16x1xf32>
    %72 = vector.shape_cast %71 : vector<16x1xf32> to vector<16x1xf32>
    %73 = vector.broadcast %72 : vector<16x1xf32> to vector<16x64xf32>
    %74 = arith.select %45, %73, %67 : vector<16x64xi1>, vector<16x64xf32>
    %75 = arith.subf %24, %74 : vector<16x64xf32>
    %76 = math.exp %75 : vector<16x64xf32>
    %cst_32 = arith.constant 0.000000e+00 : f32
    %77 = vector.broadcast %cst_32 : f32 to vector<16x64xf32>
    %78 = arith.select %22, %76, %77 : vector<16x64xi1>, vector<16x64xf32>
    %cst_33 = arith.constant 0.000000e+00 : f32
    %79 = vector.broadcast %cst_33 : f32 to vector<16x64xf32>
    %cst_34 = arith.constant 0.000000e+00 : f32
    %80 = vector.broadcast %cst_34 : f32 to vector<16x64xf32>
    %81 = arith.select %30, %78, %80 : vector<16x64xi1>, vector<16x64xf32>
    %cst_35 = arith.constant dense<0.000000e+00> : vector<16xf32>
    %82 = vector.multi_reduction <add>, %81, %cst_35 [1] : vector<16x64xf32> to vector<16xf32>
    %83 = vector.shape_cast %82 : vector<16xf32> to vector<16x1xf32>
    %84 = vector.shape_cast %83 : vector<16x1xf32> to vector<16x1xf32>
    %85 = vector.broadcast %84 : vector<16x1xf32> to vector<16x64xf32>
    %86 = arith.select %30, %85, %79 : vector<16x64xi1>, vector<16x64xf32>
    %cst_36 = arith.constant 0.000000e+00 : f32
    %87 = vector.broadcast %cst_36 : f32 to vector<16x64xf32>
    %88 = arith.select %35, %78, %87 : vector<16x64xi1>, vector<16x64xf32>
    %cst_37 = arith.constant dense<0.000000e+00> : vector<16xf32>
    %89 = vector.multi_reduction <add>, %88, %cst_37 [1] : vector<16x64xf32> to vector<16xf32>
    %90 = vector.shape_cast %89 : vector<16xf32> to vector<16x1xf32>
    %91 = vector.shape_cast %90 : vector<16x1xf32> to vector<16x1xf32>
    %92 = vector.broadcast %91 : vector<16x1xf32> to vector<16x64xf32>
    %93 = arith.select %35, %92, %86 : vector<16x64xi1>, vector<16x64xf32>
    %cst_38 = arith.constant 0.000000e+00 : f32
    %94 = vector.broadcast %cst_38 : f32 to vector<16x64xf32>
    %95 = arith.select %40, %78, %94 : vector<16x64xi1>, vector<16x64xf32>
    %cst_39 = arith.constant dense<0.000000e+00> : vector<16xf32>
    %96 = vector.multi_reduction <add>, %95, %cst_39 [1] : vector<16x64xf32> to vector<16xf32>
    %97 = vector.shape_cast %96 : vector<16xf32> to vector<16x1xf32>
    %98 = vector.shape_cast %97 : vector<16x1xf32> to vector<16x1xf32>
    %99 = vector.broadcast %98 : vector<16x1xf32> to vector<16x64xf32>
    %100 = arith.select %40, %99, %93 : vector<16x64xi1>, vector<16x64xf32>
    %cst_40 = arith.constant 0.000000e+00 : f32
    %101 = vector.broadcast %cst_40 : f32 to vector<16x64xf32>
    %102 = arith.select %45, %78, %101 : vector<16x64xi1>, vector<16x64xf32>
    %cst_41 = arith.constant dense<0.000000e+00> : vector<16xf32>
    %103 = vector.multi_reduction <add>, %102, %cst_41 [1] : vector<16x64xf32> to vector<16xf32>
    %104 = vector.shape_cast %103 : vector<16xf32> to vector<16x1xf32>
    %105 = vector.shape_cast %104 : vector<16x1xf32> to vector<16x1xf32>
    %106 = vector.broadcast %105 : vector<16x1xf32> to vector<16x64xf32>
    %107 = arith.select %45, %106, %100 : vector<16x64xi1>, vector<16x64xf32>
    %108 = arith.divf %78, %107 : vector<16x64xf32>
    %c0_42 = arith.constant 0 : index
    %c0_43 = arith.constant 0 : index
    %109 = vector.load %arg11[%c0_42, %c0_43] : memref<4x256xf32, #tpu.memory_space<vmem>>, vector<4x256xf32>
    %110 = vector.extract_strided_slice %109 {offsets = [0, 0], sizes = [1, 256], strides = [1, 1]} : vector<4x256xf32> to vector<1x256xf32>
    %111 = vector.extract_strided_slice %109 {offsets = [1, 0], sizes = [1, 32], strides = [1, 1]} : vector<4x256xf32> to vector<1x32xf32>
    %112 = vector.extract_strided_slice %109 {offsets = [2, 0], sizes = [1, 32], strides = [1, 1]} : vector<4x256xf32> to vector<1x32xf32>
    %113 = vector.extract_strided_slice %109 {offsets = [3, 0], sizes = [1, 1], strides = [1, 1]} : vector<4x256xf32> to vector<1x1xf32>
    %c0_44 = arith.constant 0 : index
    %c0_45 = arith.constant 0 : index
    %114 = vector.load %arg7[%c0_44, %c0_45] : memref<64x16xf32, #tpu.memory_space<vmem>>, vector<64x16xf32>
    %cst_46 = arith.constant dense<0.000000e+00> : vector<64x32xf32>
    %115 = tpu.matmul %114, %3, %cst_46 {dimension_numbers = #tpu.dot_dimension_numbers<[1], [0], [0], [1], [0, 0, 1, 1], [], []>} : vector<64x16xf32>, vector<16x32xf32>, vector<64x32xf32> -> vector<64x32xf32>
    %c0_47 = arith.constant 0 : index
    %c0_48 = arith.constant 0 : index
    %116 = vector.load %arg8[%c0_47, %c0_48] : memref<64x32xf32, #tpu.memory_space<vmem>>, vector<64x32xf32>
    %117 = arith.mulf %115, %116 : vector<64x32xf32>
    %cst_49 = arith.constant dense<0.000000e+00> : vector<16x32xf32>
    %118 = tpu.matmul %108, %117, %cst_49 {dimension_numbers = #tpu.dot_dimension_numbers<[1], [0], [0], [1], [0, 0, 1, 1], [], []>} : vector<16x64xf32>, vector<64x32xf32>, vector<16x32xf32> -> vector<16x32xf32>
    %119 = vector.broadcast %111 : vector<1x32xf32> to vector<16x32xf32>
    %120 = arith.addf %118, %119 : vector<16x32xf32>
    %cst_50 = arith.constant 0.000000e+00 : f32
    %121 = vector.broadcast %cst_50 : f32 to vector<16x32xf32>
    %122 = arith.maximumf %120, %121 : vector<16x32xf32>
    %c0_51 = arith.constant 0 : index
    %c0_52 = arith.constant 0 : index
    %123 = vector.load %arg9[%c0_51, %c0_52] : memref<32x256xf32, #tpu.memory_space<vmem>>, vector<32x256xf32>
    %cst_53 = arith.constant dense<0.000000e+00> : vector<16x256xf32>
    %124 = tpu.matmul %122, %123, %cst_53 {dimension_numbers = #tpu.dot_dimension_numbers<[1], [0], [0], [1], [0, 0, 1, 1], [], []>} : vector<16x32xf32>, vector<32x256xf32>, vector<16x256xf32> -> vector<16x256xf32>
    %125 = vector.broadcast %110 : vector<1x256xf32> to vector<16x256xf32>
    %126 = arith.addf %124, %125 : vector<16x256xf32>
    %c0_54 = arith.constant 0 : index
    %c0_55 = arith.constant 0 : index
    %127 = vector.load %arg15[%c0_54, %c0_55] : memref<16x256xf32, #tpu.memory_space<vmem>>, vector<16x256xf32>
    tpu.vector_store %arg15[%c0_54, %c0_55], %126 {strides = array<i32>} : memref<16x256xf32, #tpu.memory_space<vmem>>, vector<16x256xf32>,
    %c0_56 = arith.constant 0 : index
    %c0_57 = arith.constant 0 : index
    %128 = vector.load %arg10[%c0_56, %c0_57] : memref<64x256xf32, #tpu.memory_space<vmem>>, vector<64x256xf32>
    %129 = tpu.iota {dimensions = array<i32: 1>} : vector<1x64xi32>
    %c32_i32_58 = arith.constant 32 : i32
    %130 = vector.broadcast %c32_i32_58 : i32 to vector<1x64xi32>
    %131 = arith.cmpi slt, %129, %130 : vector<1x64xi32>
    %132 = arith.extui %131 : vector<1x64xi1> to vector<1x64xi32>
    %133 = arith.sitofp %132 : vector<1x64xi32> to vector<1x64xf32>
    %cst_59 = arith.constant 0.000000e+00 : f32
    %134 = vector.broadcast %cst_59 : f32 to vector<1x64xf32>
    %cst_60 = arith.constant 0.000000e+00 : f32
    %135 = vector.broadcast %cst_60 : f32 to vector<1x64xf32>
    %c0_61 = arith.constant 0 : index
    %c0_62 = arith.constant 0 : index
    %136 = vector.load %arg15[%c0_61, %c0_62] : memref<16x256xf32, #tpu.memory_space<vmem>>, vector<1x256xf32>
    %cst_63 = arith.constant dense<0.000000e+00> : vector<1x256xf32>
    %137 = tpu.matmul %134, %128, %cst_63 {dimension_numbers = #tpu.dot_dimension_numbers<[1], [0], [0], [1], [0, 0, 1, 1], [], []>} : vector<1x64xf32>, vector<64x256xf32>, vector<1x256xf32> -> vector<1x256xf32>
    %138 = arith.addf %137, %136 : vector<1x256xf32>
    %139 = vector.extract_strided_slice %138 {offsets = [0, 0], sizes = [1, 192], strides = [1, 1]} : vector<1x256xf32> to vector<1x192xf32>
    %140 = arith.negf %139 : vector<1x192xf32>
    %141 = math.exp %140 : vector<1x192xf32>
    %cst_64 = arith.constant 1.000000e+00 : f32
    %142 = vector.broadcast %cst_64 : f32 to vector<1x192xf32>
    %143 = arith.addf %142, %141 : vector<1x192xf32>
    %144 = arith.divf %142, %143 : vector<1x192xf32>
    %145 = vector.extract_strided_slice %138 {offsets = [0, 192], sizes = [1, 64], strides = [1, 1]} : vector<1x256xf32> to vector<1x64xf32>
    %146 = math.tanh %145 : vector<1x64xf32>
    %147 = vector.extract_strided_slice %144 {offsets = [0, 64], sizes = [1, 64], strides = [1, 1]} : vector<1x192xf32> to vector<1x64xf32>
    %148 = arith.mulf %147, %135 : vector<1x64xf32>
    %149 = vector.extract_strided_slice %144 {offsets = [0, 0], sizes = [1, 64], strides = [1, 1]} : vector<1x192xf32> to vector<1x64xf32>
    %150 = arith.mulf %149, %146 : vector<1x64xf32>
    %151 = arith.addf %148, %150 : vector<1x64xf32>
    %152 = vector.extract_strided_slice %144 {offsets = [0, 128], sizes = [1, 64], strides = [1, 1]} : vector<1x192xf32> to vector<1x64xf32>
    %153 = math.tanh %151 : vector<1x64xf32>
    %154 = arith.mulf %152, %153 : vector<1x64xf32>
    %155 = arith.mulf %151, %133 : vector<1x64xf32>
    %156 = arith.mulf %154, %133 : vector<1x64xf32>
    %c1 = arith.constant 1 : index
    %c0_65 = arith.constant 0 : index
    %157 = vector.load %arg15[%c1, %c0_65] : memref<16x256xf32, #tpu.memory_space<vmem>>, vector<1x256xf32>
    %cst_66 = arith.constant dense<0.000000e+00> : vector<1x256xf32>
    %158 = tpu.matmul %156, %128, %cst_66 {dimension_numbers = #tpu.dot_dimension_numbers<[1], [0], [0], [1], [0, 0, 1, 1], [], []>} : vector<1x64xf32>, vector<64x256xf32>, vector<1x256xf32> -> vector<1x256xf32>
    %159 = arith.addf %158, %157 : vector<1x256xf32>
    %160 = vector.extract_strided_slice %159 {offsets = [0, 0], sizes = [1, 192], strides = [1, 1]} : vector<1x256xf32> to vector<1x192xf32>
    %161 = arith.negf %160 : vector<1x192xf32>
    %162 = math.exp %161 : vector<1x192xf32>
    %cst_67 = arith.constant 1.000000e+00 : f32
    %163 = vector.broadcast %cst_67 : f32 to vector<1x192xf32>
    %164 = arith.addf %163, %162 : vector<1x192xf32>
    %165 = arith.divf %163, %164 : vector<1x192xf32>
    %166 = vector.extract_strided_slice %159 {offsets = [0, 192], sizes = [1, 64], strides = [1, 1]} : vector<1x256xf32> to vector<1x64xf32>
    %167 = math.tanh %166 : vector<1x64xf32>
    %168 = vector.extract_strided_slice %165 {offsets = [0, 64], sizes = [1, 64], strides = [1, 1]} : vector<1x192xf32> to vector<1x64xf32>
    %169 = arith.mulf %168, %155 : vector<1x64xf32>
    %170 = vector.extract_strided_slice %165 {offsets = [0, 0], sizes = [1, 64], strides = [1, 1]} : vector<1x192xf32> to vector<1x64xf32>
    %171 = arith.mulf %170, %167 : vector<1x64xf32>
    %172 = arith.addf %169, %171 : vector<1x64xf32>
    %173 = vector.extract_strided_slice %165 {offsets = [0, 128], sizes = [1, 64], strides = [1, 1]} : vector<1x192xf32> to vector<1x64xf32>
    %174 = math.tanh %172 : vector<1x64xf32>
    %175 = arith.mulf %173, %174 : vector<1x64xf32>
    %176 = vector.extract_strided_slice %175 {offsets = [0, 32], sizes = [1, 32], strides = [1, 1]} : vector<1x64xf32> to vector<1x32xf32>
    %c0_68 = arith.constant 0 : index
    %c0_69 = arith.constant 0 : index
    %177 = vector.load %arg16[%c0_68, %c0_69] : memref<16x32xf32, #tpu.memory_space<vmem>>, vector<1x32xf32>
    tpu.vector_store %arg16[%c0_68, %c0_69], %176 {strides = array<i32>} : memref<16x32xf32, #tpu.memory_space<vmem>>, vector<1x32xf32>,
    %c2 = arith.constant 2 : index
    %c0_70 = arith.constant 0 : index
    %178 = vector.load %arg15[%c2, %c0_70] : memref<16x256xf32, #tpu.memory_space<vmem>>, vector<1x256xf32>
    %cst_71 = arith.constant dense<0.000000e+00> : vector<1x256xf32>
    %179 = tpu.matmul %175, %128, %cst_71 {dimension_numbers = #tpu.dot_dimension_numbers<[1], [0], [0], [1], [0, 0, 1, 1], [], []>} : vector<1x64xf32>, vector<64x256xf32>, vector<1x256xf32> -> vector<1x256xf32>
    %180 = arith.addf %179, %178 : vector<1x256xf32>
    %181 = vector.extract_strided_slice %180 {offsets = [0, 0], sizes = [1, 192], strides = [1, 1]} : vector<1x256xf32> to vector<1x192xf32>
    %182 = arith.negf %181 : vector<1x192xf32>
    %183 = math.exp %182 : vector<1x192xf32>
    %cst_72 = arith.constant 1.000000e+00 : f32
    %184 = vector.broadcast %cst_72 : f32 to vector<1x192xf32>
    %185 = arith.addf %184, %183 : vector<1x192xf32>
    %186 = arith.divf %184, %185 : vector<1x192xf32>
    %187 = vector.extract_strided_slice %180 {offsets = [0, 192], sizes = [1, 64], strides = [1, 1]} : vector<1x256xf32> to vector<1x64xf32>
    %188 = math.tanh %187 : vector<1x64xf32>
    %189 = vector.extract_strided_slice %186 {offsets = [0, 64], sizes = [1, 64], strides = [1, 1]} : vector<1x192xf32> to vector<1x64xf32>
    %190 = arith.mulf %189, %172 : vector<1x64xf32>
    %191 = vector.extract_strided_slice %186 {offsets = [0, 0], sizes = [1, 64], strides = [1, 1]} : vector<1x192xf32> to vector<1x64xf32>
    %192 = arith.mulf %191, %188 : vector<1x64xf32>
    %193 = arith.addf %190, %192 : vector<1x64xf32>
    %194 = vector.extract_strided_slice %186 {offsets = [0, 128], sizes = [1, 64], strides = [1, 1]} : vector<1x192xf32> to vector<1x64xf32>
    %195 = math.tanh %193 : vector<1x64xf32>
    %196 = arith.mulf %194, %195 : vector<1x64xf32>
    %197 = vector.extract_strided_slice %196 {offsets = [0, 32], sizes = [1, 32], strides = [1, 1]} : vector<1x64xf32> to vector<1x32xf32>
    %c1_73 = arith.constant 1 : index
    %c0_74 = arith.constant 0 : index
    %198 = vector.load %arg16[%c1_73, %c0_74] : memref<16x32xf32, #tpu.memory_space<vmem>>, vector<1x32xf32>
    tpu.vector_store %arg16[%c1_73, %c0_74], %197 {strides = array<i32>} : memref<16x32xf32, #tpu.memory_space<vmem>>, vector<1x32xf32>,
    %c3 = arith.constant 3 : index
    %c0_75 = arith.constant 0 : index
    %199 = vector.load %arg15[%c3, %c0_75] : memref<16x256xf32, #tpu.memory_space<vmem>>, vector<1x256xf32>
    %cst_76 = arith.constant dense<0.000000e+00> : vector<1x256xf32>
    %200 = tpu.matmul %196, %128, %cst_76 {dimension_numbers = #tpu.dot_dimension_numbers<[1], [0], [0], [1], [0, 0, 1, 1], [], []>} : vector<1x64xf32>, vector<64x256xf32>, vector<1x256xf32> -> vector<1x256xf32>
    %201 = arith.addf %200, %199 : vector<1x256xf32>
    %202 = vector.extract_strided_slice %201 {offsets = [0, 0], sizes = [1, 192], strides = [1, 1]} : vector<1x256xf32> to vector<1x192xf32>
    %203 = arith.negf %202 : vector<1x192xf32>
    %204 = math.exp %203 : vector<1x192xf32>
    %cst_77 = arith.constant 1.000000e+00 : f32
    %205 = vector.broadcast %cst_77 : f32 to vector<1x192xf32>
    %206 = arith.addf %205, %204 : vector<1x192xf32>
    %207 = arith.divf %205, %206 : vector<1x192xf32>
    %208 = vector.extract_strided_slice %201 {offsets = [0, 192], sizes = [1, 64], strides = [1, 1]} : vector<1x256xf32> to vector<1x64xf32>
    %209 = math.tanh %208 : vector<1x64xf32>
    %210 = vector.extract_strided_slice %207 {offsets = [0, 64], sizes = [1, 64], strides = [1, 1]} : vector<1x192xf32> to vector<1x64xf32>
    %211 = arith.mulf %210, %193 : vector<1x64xf32>
    %212 = vector.extract_strided_slice %207 {offsets = [0, 0], sizes = [1, 64], strides = [1, 1]} : vector<1x192xf32> to vector<1x64xf32>
    %213 = arith.mulf %212, %209 : vector<1x64xf32>
    %214 = arith.addf %211, %213 : vector<1x64xf32>
    %215 = vector.extract_strided_slice %207 {offsets = [0, 128], sizes = [1, 64], strides = [1, 1]} : vector<1x192xf32> to vector<1x64xf32>
    %216 = math.tanh %214 : vector<1x64xf32>
    %217 = arith.mulf %215, %216 : vector<1x64xf32>
    %218 = vector.extract_strided_slice %217 {offsets = [0, 32], sizes = [1, 32], strides = [1, 1]} : vector<1x64xf32> to vector<1x32xf32>
    %c2_78 = arith.constant 2 : index
    %c0_79 = arith.constant 0 : index
    %219 = vector.load %arg16[%c2_78, %c0_79] : memref<16x32xf32, #tpu.memory_space<vmem>>, vector<1x32xf32>
    tpu.vector_store %arg16[%c2_78, %c0_79], %218 {strides = array<i32>} : memref<16x32xf32, #tpu.memory_space<vmem>>, vector<1x32xf32>,
    %c4 = arith.constant 4 : index
    %c0_80 = arith.constant 0 : index
    %220 = vector.load %arg15[%c4, %c0_80] : memref<16x256xf32, #tpu.memory_space<vmem>>, vector<1x256xf32>
    %cst_81 = arith.constant dense<0.000000e+00> : vector<1x256xf32>
    %221 = tpu.matmul %217, %128, %cst_81 {dimension_numbers = #tpu.dot_dimension_numbers<[1], [0], [0], [1], [0, 0, 1, 1], [], []>} : vector<1x64xf32>, vector<64x256xf32>, vector<1x256xf32> -> vector<1x256xf32>
    %222 = arith.addf %221, %220 : vector<1x256xf32>
    %223 = vector.extract_strided_slice %222 {offsets = [0, 0], sizes = [1, 192], strides = [1, 1]} : vector<1x256xf32> to vector<1x192xf32>
    %224 = arith.negf %223 : vector<1x192xf32>
    %225 = math.exp %224 : vector<1x192xf32>
    %cst_82 = arith.constant 1.000000e+00 : f32
    %226 = vector.broadcast %cst_82 : f32 to vector<1x192xf32>
    %227 = arith.addf %226, %225 : vector<1x192xf32>
    %228 = arith.divf %226, %227 : vector<1x192xf32>
    %229 = vector.extract_strided_slice %222 {offsets = [0, 192], sizes = [1, 64], strides = [1, 1]} : vector<1x256xf32> to vector<1x64xf32>
    %230 = math.tanh %229 : vector<1x64xf32>
    %231 = vector.extract_strided_slice %228 {offsets = [0, 64], sizes = [1, 64], strides = [1, 1]} : vector<1x192xf32> to vector<1x64xf32>
    %232 = arith.mulf %231, %214 : vector<1x64xf32>
    %233 = vector.extract_strided_slice %228 {offsets = [0, 0], sizes = [1, 64], strides = [1, 1]} : vector<1x192xf32> to vector<1x64xf32>
    %234 = arith.mulf %233, %230 : vector<1x64xf32>
    %235 = arith.addf %232, %234 : vector<1x64xf32>
    %236 = vector.extract_strided_slice %228 {offsets = [0, 128], sizes = [1, 64], strides = [1, 1]} : vector<1x192xf32> to vector<1x64xf32>
    %237 = math.tanh %235 : vector<1x64xf32>
    %238 = arith.mulf %236, %237 : vector<1x64xf32>
    %239 = vector.extract_strided_slice %238 {offsets = [0, 32], sizes = [1, 32], strides = [1, 1]} : vector<1x64xf32> to vector<1x32xf32>
    %c3_83 = arith.constant 3 : index
    %c0_84 = arith.constant 0 : index
    %240 = vector.load %arg16[%c3_83, %c0_84] : memref<16x32xf32, #tpu.memory_space<vmem>>, vector<1x32xf32>
    tpu.vector_store %arg16[%c3_83, %c0_84], %239 {strides = array<i32>} : memref<16x32xf32, #tpu.memory_space<vmem>>, vector<1x32xf32>,
    %c5 = arith.constant 5 : index
    %c0_85 = arith.constant 0 : index
    %241 = vector.load %arg15[%c5, %c0_85] : memref<16x256xf32, #tpu.memory_space<vmem>>, vector<1x256xf32>
    %cst_86 = arith.constant dense<0.000000e+00> : vector<1x256xf32>
    %242 = tpu.matmul %238, %128, %cst_86 {dimension_numbers = #tpu.dot_dimension_numbers<[1], [0], [0], [1], [0, 0, 1, 1], [], []>} : vector<1x64xf32>, vector<64x256xf32>, vector<1x256xf32> -> vector<1x256xf32>
    %243 = arith.addf %242, %241 : vector<1x256xf32>
    %244 = vector.extract_strided_slice %243 {offsets = [0, 0], sizes = [1, 192], strides = [1, 1]} : vector<1x256xf32> to vector<1x192xf32>
    %245 = arith.negf %244 : vector<1x192xf32>
    %246 = math.exp %245 : vector<1x192xf32>
    %cst_87 = arith.constant 1.000000e+00 : f32
    %247 = vector.broadcast %cst_87 : f32 to vector<1x192xf32>
    %248 = arith.addf %247, %246 : vector<1x192xf32>
    %249 = arith.divf %247, %248 : vector<1x192xf32>
    %250 = vector.extract_strided_slice %243 {offsets = [0, 192], sizes = [1, 64], strides = [1, 1]} : vector<1x256xf32> to vector<1x64xf32>
    %251 = math.tanh %250 : vector<1x64xf32>
    %252 = vector.extract_strided_slice %249 {offsets = [0, 64], sizes = [1, 64], strides = [1, 1]} : vector<1x192xf32> to vector<1x64xf32>
    %253 = arith.mulf %252, %235 : vector<1x64xf32>
    %254 = vector.extract_strided_slice %249 {offsets = [0, 0], sizes = [1, 64], strides = [1, 1]} : vector<1x192xf32> to vector<1x64xf32>
    %255 = arith.mulf %254, %251 : vector<1x64xf32>
    %256 = arith.addf %253, %255 : vector<1x64xf32>
    %257 = vector.extract_strided_slice %249 {offsets = [0, 128], sizes = [1, 64], strides = [1, 1]} : vector<1x192xf32> to vector<1x64xf32>
    %258 = math.tanh %256 : vector<1x64xf32>
    %259 = arith.mulf %257, %258 : vector<1x64xf32>
    %260 = vector.extract_strided_slice %259 {offsets = [0, 32], sizes = [1, 32], strides = [1, 1]} : vector<1x64xf32> to vector<1x32xf32>
    %c4_88 = arith.constant 4 : index
    %c0_89 = arith.constant 0 : index
    %261 = vector.load %arg16[%c4_88, %c0_89] : memref<16x32xf32, #tpu.memory_space<vmem>>, vector<1x32xf32>
    tpu.vector_store %arg16[%c4_88, %c0_89], %260 {strides = array<i32>} : memref<16x32xf32, #tpu.memory_space<vmem>>, vector<1x32xf32>,
    %c6 = arith.constant 6 : index
    %c0_90 = arith.constant 0 : index
    %262 = vector.load %arg15[%c6, %c0_90] : memref<16x256xf32, #tpu.memory_space<vmem>>, vector<1x256xf32>
    %cst_91 = arith.constant dense<0.000000e+00> : vector<1x256xf32>
    %263 = tpu.matmul %259, %128, %cst_91 {dimension_numbers = #tpu.dot_dimension_numbers<[1], [0], [0], [1], [0, 0, 1, 1], [], []>} : vector<1x64xf32>, vector<64x256xf32>, vector<1x256xf32> -> vector<1x256xf32>
    %264 = arith.addf %263, %262 : vector<1x256xf32>
    %265 = vector.extract_strided_slice %264 {offsets = [0, 0], sizes = [1, 192], strides = [1, 1]} : vector<1x256xf32> to vector<1x192xf32>
    %266 = arith.negf %265 : vector<1x192xf32>
    %267 = math.exp %266 : vector<1x192xf32>
    %cst_92 = arith.constant 1.000000e+00 : f32
    %268 = vector.broadcast %cst_92 : f32 to vector<1x192xf32>
    %269 = arith.addf %268, %267 : vector<1x192xf32>
    %270 = arith.divf %268, %269 : vector<1x192xf32>
    %271 = vector.extract_strided_slice %264 {offsets = [0, 192], sizes = [1, 64], strides = [1, 1]} : vector<1x256xf32> to vector<1x64xf32>
    %272 = math.tanh %271 : vector<1x64xf32>
    %273 = vector.extract_strided_slice %270 {offsets = [0, 64], sizes = [1, 64], strides = [1, 1]} : vector<1x192xf32> to vector<1x64xf32>
    %274 = arith.mulf %273, %256 : vector<1x64xf32>
    %275 = vector.extract_strided_slice %270 {offsets = [0, 0], sizes = [1, 64], strides = [1, 1]} : vector<1x192xf32> to vector<1x64xf32>
    %276 = arith.mulf %275, %272 : vector<1x64xf32>
    %277 = arith.addf %274, %276 : vector<1x64xf32>
    %278 = vector.extract_strided_slice %270 {offsets = [0, 128], sizes = [1, 64], strides = [1, 1]} : vector<1x192xf32> to vector<1x64xf32>
    %279 = math.tanh %277 : vector<1x64xf32>
    %280 = arith.mulf %278, %279 : vector<1x64xf32>
    %281 = vector.extract_strided_slice %280 {offsets = [0, 32], sizes = [1, 32], strides = [1, 1]} : vector<1x64xf32> to vector<1x32xf32>
    %c5_93 = arith.constant 5 : index
    %c0_94 = arith.constant 0 : index
    %282 = vector.load %arg16[%c5_93, %c0_94] : memref<16x32xf32, #tpu.memory_space<vmem>>, vector<1x32xf32>
    tpu.vector_store %arg16[%c5_93, %c0_94], %281 {strides = array<i32>} : memref<16x32xf32, #tpu.memory_space<vmem>>, vector<1x32xf32>,
    %c7 = arith.constant 7 : index
    %c0_95 = arith.constant 0 : index
    %283 = vector.load %arg15[%c7, %c0_95] : memref<16x256xf32, #tpu.memory_space<vmem>>, vector<1x256xf32>
    %cst_96 = arith.constant dense<0.000000e+00> : vector<1x256xf32>
    %284 = tpu.matmul %280, %128, %cst_96 {dimension_numbers = #tpu.dot_dimension_numbers<[1], [0], [0], [1], [0, 0, 1, 1], [], []>} : vector<1x64xf32>, vector<64x256xf32>, vector<1x256xf32> -> vector<1x256xf32>
    %285 = arith.addf %284, %283 : vector<1x256xf32>
    %286 = vector.extract_strided_slice %285 {offsets = [0, 0], sizes = [1, 192], strides = [1, 1]} : vector<1x256xf32> to vector<1x192xf32>
    %287 = arith.negf %286 : vector<1x192xf32>
    %288 = math.exp %287 : vector<1x192xf32>
    %cst_97 = arith.constant 1.000000e+00 : f32
    %289 = vector.broadcast %cst_97 : f32 to vector<1x192xf32>
    %290 = arith.addf %289, %288 : vector<1x192xf32>
    %291 = arith.divf %289, %290 : vector<1x192xf32>
    %292 = vector.extract_strided_slice %285 {offsets = [0, 192], sizes = [1, 64], strides = [1, 1]} : vector<1x256xf32> to vector<1x64xf32>
    %293 = math.tanh %292 : vector<1x64xf32>
    %294 = vector.extract_strided_slice %291 {offsets = [0, 64], sizes = [1, 64], strides = [1, 1]} : vector<1x192xf32> to vector<1x64xf32>
    %295 = arith.mulf %294, %277 : vector<1x64xf32>
    %296 = vector.extract_strided_slice %291 {offsets = [0, 0], sizes = [1, 64], strides = [1, 1]} : vector<1x192xf32> to vector<1x64xf32>
    %297 = arith.mulf %296, %293 : vector<1x64xf32>
    %298 = arith.addf %295, %297 : vector<1x64xf32>
    %299 = vector.extract_strided_slice %291 {offsets = [0, 128], sizes = [1, 64], strides = [1, 1]} : vector<1x192xf32> to vector<1x64xf32>
    %300 = math.tanh %298 : vector<1x64xf32>
    %301 = arith.mulf %299, %300 : vector<1x64xf32>
    %302 = vector.extract_strided_slice %301 {offsets = [0, 32], sizes = [1, 32], strides = [1, 1]} : vector<1x64xf32> to vector<1x32xf32>
    %c6_98 = arith.constant 6 : index
    %c0_99 = arith.constant 0 : index
    %303 = vector.load %arg16[%c6_98, %c0_99] : memref<16x32xf32, #tpu.memory_space<vmem>>, vector<1x32xf32>
    tpu.vector_store %arg16[%c6_98, %c0_99], %302 {strides = array<i32>} : memref<16x32xf32, #tpu.memory_space<vmem>>, vector<1x32xf32>,
    %c8 = arith.constant 8 : index
    %c0_100 = arith.constant 0 : index
    %304 = vector.load %arg15[%c8, %c0_100] : memref<16x256xf32, #tpu.memory_space<vmem>>, vector<1x256xf32>
    %cst_101 = arith.constant dense<0.000000e+00> : vector<1x256xf32>
    %305 = tpu.matmul %301, %128, %cst_101 {dimension_numbers = #tpu.dot_dimension_numbers<[1], [0], [0], [1], [0, 0, 1, 1], [], []>} : vector<1x64xf32>, vector<64x256xf32>, vector<1x256xf32> -> vector<1x256xf32>
    %306 = arith.addf %305, %304 : vector<1x256xf32>
    %307 = vector.extract_strided_slice %306 {offsets = [0, 0], sizes = [1, 192], strides = [1, 1]} : vector<1x256xf32> to vector<1x192xf32>
    %308 = arith.negf %307 : vector<1x192xf32>
    %309 = math.exp %308 : vector<1x192xf32>
    %cst_102 = arith.constant 1.000000e+00 : f32
    %310 = vector.broadcast %cst_102 : f32 to vector<1x192xf32>
    %311 = arith.addf %310, %309 : vector<1x192xf32>
    %312 = arith.divf %310, %311 : vector<1x192xf32>
    %313 = vector.extract_strided_slice %306 {offsets = [0, 192], sizes = [1, 64], strides = [1, 1]} : vector<1x256xf32> to vector<1x64xf32>
    %314 = math.tanh %313 : vector<1x64xf32>
    %315 = vector.extract_strided_slice %312 {offsets = [0, 64], sizes = [1, 64], strides = [1, 1]} : vector<1x192xf32> to vector<1x64xf32>
    %316 = arith.mulf %315, %298 : vector<1x64xf32>
    %317 = vector.extract_strided_slice %312 {offsets = [0, 0], sizes = [1, 64], strides = [1, 1]} : vector<1x192xf32> to vector<1x64xf32>
    %318 = arith.mulf %317, %314 : vector<1x64xf32>
    %319 = arith.addf %316, %318 : vector<1x64xf32>
    %320 = vector.extract_strided_slice %312 {offsets = [0, 128], sizes = [1, 64], strides = [1, 1]} : vector<1x192xf32> to vector<1x64xf32>
    %321 = math.tanh %319 : vector<1x64xf32>
    %322 = arith.mulf %320, %321 : vector<1x64xf32>
    %323 = vector.extract_strided_slice %322 {offsets = [0, 32], sizes = [1, 32], strides = [1, 1]} : vector<1x64xf32> to vector<1x32xf32>
    %c7_103 = arith.constant 7 : index
    %c0_104 = arith.constant 0 : index
    %324 = vector.load %arg16[%c7_103, %c0_104] : memref<16x32xf32, #tpu.memory_space<vmem>>, vector<1x32xf32>
    tpu.vector_store %arg16[%c7_103, %c0_104], %323 {strides = array<i32>} : memref<16x32xf32, #tpu.memory_space<vmem>>, vector<1x32xf32>,
    %c9 = arith.constant 9 : index
    %c0_105 = arith.constant 0 : index
    %325 = vector.load %arg15[%c9, %c0_105] : memref<16x256xf32, #tpu.memory_space<vmem>>, vector<1x256xf32>
    %cst_106 = arith.constant dense<0.000000e+00> : vector<1x256xf32>
    %326 = tpu.matmul %322, %128, %cst_106 {dimension_numbers = #tpu.dot_dimension_numbers<[1], [0], [0], [1], [0, 0, 1, 1], [], []>} : vector<1x64xf32>, vector<64x256xf32>, vector<1x256xf32> -> vector<1x256xf32>
    %327 = arith.addf %326, %325 : vector<1x256xf32>
    %328 = vector.extract_strided_slice %327 {offsets = [0, 0], sizes = [1, 192], strides = [1, 1]} : vector<1x256xf32> to vector<1x192xf32>
    %329 = arith.negf %328 : vector<1x192xf32>
    %330 = math.exp %329 : vector<1x192xf32>
    %cst_107 = arith.constant 1.000000e+00 : f32
    %331 = vector.broadcast %cst_107 : f32 to vector<1x192xf32>
    %332 = arith.addf %331, %330 : vector<1x192xf32>
    %333 = arith.divf %331, %332 : vector<1x192xf32>
    %334 = vector.extract_strided_slice %327 {offsets = [0, 192], sizes = [1, 64], strides = [1, 1]} : vector<1x256xf32> to vector<1x64xf32>
    %335 = math.tanh %334 : vector<1x64xf32>
    %336 = vector.extract_strided_slice %333 {offsets = [0, 64], sizes = [1, 64], strides = [1, 1]} : vector<1x192xf32> to vector<1x64xf32>
    %337 = arith.mulf %336, %319 : vector<1x64xf32>
    %338 = vector.extract_strided_slice %333 {offsets = [0, 0], sizes = [1, 64], strides = [1, 1]} : vector<1x192xf32> to vector<1x64xf32>
    %339 = arith.mulf %338, %335 : vector<1x64xf32>
    %340 = arith.addf %337, %339 : vector<1x64xf32>
    %341 = vector.extract_strided_slice %333 {offsets = [0, 128], sizes = [1, 64], strides = [1, 1]} : vector<1x192xf32> to vector<1x64xf32>
    %342 = math.tanh %340 : vector<1x64xf32>
    %343 = arith.mulf %341, %342 : vector<1x64xf32>
    %344 = vector.extract_strided_slice %343 {offsets = [0, 32], sizes = [1, 32], strides = [1, 1]} : vector<1x64xf32> to vector<1x32xf32>
    %c8_108 = arith.constant 8 : index
    %c0_109 = arith.constant 0 : index
    %345 = vector.load %arg16[%c8_108, %c0_109] : memref<16x32xf32, #tpu.memory_space<vmem>>, vector<1x32xf32>
    tpu.vector_store %arg16[%c8_108, %c0_109], %344 {strides = array<i32>} : memref<16x32xf32, #tpu.memory_space<vmem>>, vector<1x32xf32>,
    %c10 = arith.constant 10 : index
    %c0_110 = arith.constant 0 : index
    %346 = vector.load %arg15[%c10, %c0_110] : memref<16x256xf32, #tpu.memory_space<vmem>>, vector<1x256xf32>
    %cst_111 = arith.constant dense<0.000000e+00> : vector<1x256xf32>
    %347 = tpu.matmul %343, %128, %cst_111 {dimension_numbers = #tpu.dot_dimension_numbers<[1], [0], [0], [1], [0, 0, 1, 1], [], []>} : vector<1x64xf32>, vector<64x256xf32>, vector<1x256xf32> -> vector<1x256xf32>
    %348 = arith.addf %347, %346 : vector<1x256xf32>
    %349 = vector.extract_strided_slice %348 {offsets = [0, 0], sizes = [1, 192], strides = [1, 1]} : vector<1x256xf32> to vector<1x192xf32>
    %350 = arith.negf %349 : vector<1x192xf32>
    %351 = math.exp %350 : vector<1x192xf32>
    %cst_112 = arith.constant 1.000000e+00 : f32
    %352 = vector.broadcast %cst_112 : f32 to vector<1x192xf32>
    %353 = arith.addf %352, %351 : vector<1x192xf32>
    %354 = arith.divf %352, %353 : vector<1x192xf32>
    %355 = vector.extract_strided_slice %348 {offsets = [0, 192], sizes = [1, 64], strides = [1, 1]} : vector<1x256xf32> to vector<1x64xf32>
    %356 = math.tanh %355 : vector<1x64xf32>
    %357 = vector.extract_strided_slice %354 {offsets = [0, 64], sizes = [1, 64], strides = [1, 1]} : vector<1x192xf32> to vector<1x64xf32>
    %358 = arith.mulf %357, %340 : vector<1x64xf32>
    %359 = vector.extract_strided_slice %354 {offsets = [0, 0], sizes = [1, 64], strides = [1, 1]} : vector<1x192xf32> to vector<1x64xf32>
    %360 = arith.mulf %359, %356 : vector<1x64xf32>
    %361 = arith.addf %358, %360 : vector<1x64xf32>
    %362 = vector.extract_strided_slice %354 {offsets = [0, 128], sizes = [1, 64], strides = [1, 1]} : vector<1x192xf32> to vector<1x64xf32>
    %363 = math.tanh %361 : vector<1x64xf32>
    %364 = arith.mulf %362, %363 : vector<1x64xf32>
    %365 = vector.extract_strided_slice %364 {offsets = [0, 32], sizes = [1, 32], strides = [1, 1]} : vector<1x64xf32> to vector<1x32xf32>
    %c9_113 = arith.constant 9 : index
    %c0_114 = arith.constant 0 : index
    %366 = vector.load %arg16[%c9_113, %c0_114] : memref<16x32xf32, #tpu.memory_space<vmem>>, vector<1x32xf32>
    tpu.vector_store %arg16[%c9_113, %c0_114], %365 {strides = array<i32>} : memref<16x32xf32, #tpu.memory_space<vmem>>, vector<1x32xf32>,
    %c11 = arith.constant 11 : index
    %c0_115 = arith.constant 0 : index
    %367 = vector.load %arg15[%c11, %c0_115] : memref<16x256xf32, #tpu.memory_space<vmem>>, vector<1x256xf32>
    %cst_116 = arith.constant dense<0.000000e+00> : vector<1x256xf32>
    %368 = tpu.matmul %364, %128, %cst_116 {dimension_numbers = #tpu.dot_dimension_numbers<[1], [0], [0], [1], [0, 0, 1, 1], [], []>} : vector<1x64xf32>, vector<64x256xf32>, vector<1x256xf32> -> vector<1x256xf32>
    %369 = arith.addf %368, %367 : vector<1x256xf32>
    %370 = vector.extract_strided_slice %369 {offsets = [0, 0], sizes = [1, 192], strides = [1, 1]} : vector<1x256xf32> to vector<1x192xf32>
    %371 = arith.negf %370 : vector<1x192xf32>
    %372 = math.exp %371 : vector<1x192xf32>
    %cst_117 = arith.constant 1.000000e+00 : f32
    %373 = vector.broadcast %cst_117 : f32 to vector<1x192xf32>
    %374 = arith.addf %373, %372 : vector<1x192xf32>
    %375 = arith.divf %373, %374 : vector<1x192xf32>
    %376 = vector.extract_strided_slice %369 {offsets = [0, 192], sizes = [1, 64], strides = [1, 1]} : vector<1x256xf32> to vector<1x64xf32>
    %377 = math.tanh %376 : vector<1x64xf32>
    %378 = vector.extract_strided_slice %375 {offsets = [0, 64], sizes = [1, 64], strides = [1, 1]} : vector<1x192xf32> to vector<1x64xf32>
    %379 = arith.mulf %378, %361 : vector<1x64xf32>
    %380 = vector.extract_strided_slice %375 {offsets = [0, 0], sizes = [1, 64], strides = [1, 1]} : vector<1x192xf32> to vector<1x64xf32>
    %381 = arith.mulf %380, %377 : vector<1x64xf32>
    %382 = arith.addf %379, %381 : vector<1x64xf32>
    %383 = vector.extract_strided_slice %375 {offsets = [0, 128], sizes = [1, 64], strides = [1, 1]} : vector<1x192xf32> to vector<1x64xf32>
    %384 = math.tanh %382 : vector<1x64xf32>
    %385 = arith.mulf %383, %384 : vector<1x64xf32>
    %386 = vector.extract_strided_slice %385 {offsets = [0, 32], sizes = [1, 32], strides = [1, 1]} : vector<1x64xf32> to vector<1x32xf32>
    %c10_118 = arith.constant 10 : index
    %c0_119 = arith.constant 0 : index
    %387 = vector.load %arg16[%c10_118, %c0_119] : memref<16x32xf32, #tpu.memory_space<vmem>>, vector<1x32xf32>
    tpu.vector_store %arg16[%c10_118, %c0_119], %386 {strides = array<i32>} : memref<16x32xf32, #tpu.memory_space<vmem>>, vector<1x32xf32>,
    %c12 = arith.constant 12 : index
    %c0_120 = arith.constant 0 : index
    %388 = vector.load %arg15[%c12, %c0_120] : memref<16x256xf32, #tpu.memory_space<vmem>>, vector<1x256xf32>
    %cst_121 = arith.constant dense<0.000000e+00> : vector<1x256xf32>
    %389 = tpu.matmul %385, %128, %cst_121 {dimension_numbers = #tpu.dot_dimension_numbers<[1], [0], [0], [1], [0, 0, 1, 1], [], []>} : vector<1x64xf32>, vector<64x256xf32>, vector<1x256xf32> -> vector<1x256xf32>
    %390 = arith.addf %389, %388 : vector<1x256xf32>
    %391 = vector.extract_strided_slice %390 {offsets = [0, 0], sizes = [1, 192], strides = [1, 1]} : vector<1x256xf32> to vector<1x192xf32>
    %392 = arith.negf %391 : vector<1x192xf32>
    %393 = math.exp %392 : vector<1x192xf32>
    %cst_122 = arith.constant 1.000000e+00 : f32
    %394 = vector.broadcast %cst_122 : f32 to vector<1x192xf32>
    %395 = arith.addf %394, %393 : vector<1x192xf32>
    %396 = arith.divf %394, %395 : vector<1x192xf32>
    %397 = vector.extract_strided_slice %390 {offsets = [0, 192], sizes = [1, 64], strides = [1, 1]} : vector<1x256xf32> to vector<1x64xf32>
    %398 = math.tanh %397 : vector<1x64xf32>
    %399 = vector.extract_strided_slice %396 {offsets = [0, 64], sizes = [1, 64], strides = [1, 1]} : vector<1x192xf32> to vector<1x64xf32>
    %400 = arith.mulf %399, %382 : vector<1x64xf32>
    %401 = vector.extract_strided_slice %396 {offsets = [0, 0], sizes = [1, 64], strides = [1, 1]} : vector<1x192xf32> to vector<1x64xf32>
    %402 = arith.mulf %401, %398 : vector<1x64xf32>
    %403 = arith.addf %400, %402 : vector<1x64xf32>
    %404 = vector.extract_strided_slice %396 {offsets = [0, 128], sizes = [1, 64], strides = [1, 1]} : vector<1x192xf32> to vector<1x64xf32>
    %405 = math.tanh %403 : vector<1x64xf32>
    %406 = arith.mulf %404, %405 : vector<1x64xf32>
    %407 = vector.extract_strided_slice %406 {offsets = [0, 32], sizes = [1, 32], strides = [1, 1]} : vector<1x64xf32> to vector<1x32xf32>
    %c11_123 = arith.constant 11 : index
    %c0_124 = arith.constant 0 : index
    %408 = vector.load %arg16[%c11_123, %c0_124] : memref<16x32xf32, #tpu.memory_space<vmem>>, vector<1x32xf32>
    tpu.vector_store %arg16[%c11_123, %c0_124], %407 {strides = array<i32>} : memref<16x32xf32, #tpu.memory_space<vmem>>, vector<1x32xf32>,
    %c13 = arith.constant 13 : index
    %c0_125 = arith.constant 0 : index
    %409 = vector.load %arg15[%c13, %c0_125] : memref<16x256xf32, #tpu.memory_space<vmem>>, vector<1x256xf32>
    %cst_126 = arith.constant dense<0.000000e+00> : vector<1x256xf32>
    %410 = tpu.matmul %406, %128, %cst_126 {dimension_numbers = #tpu.dot_dimension_numbers<[1], [0], [0], [1], [0, 0, 1, 1], [], []>} : vector<1x64xf32>, vector<64x256xf32>, vector<1x256xf32> -> vector<1x256xf32>
    %411 = arith.addf %410, %409 : vector<1x256xf32>
    %412 = vector.extract_strided_slice %411 {offsets = [0, 0], sizes = [1, 192], strides = [1, 1]} : vector<1x256xf32> to vector<1x192xf32>
    %413 = arith.negf %412 : vector<1x192xf32>
    %414 = math.exp %413 : vector<1x192xf32>
    %cst_127 = arith.constant 1.000000e+00 : f32
    %415 = vector.broadcast %cst_127 : f32 to vector<1x192xf32>
    %416 = arith.addf %415, %414 : vector<1x192xf32>
    %417 = arith.divf %415, %416 : vector<1x192xf32>
    %418 = vector.extract_strided_slice %411 {offsets = [0, 192], sizes = [1, 64], strides = [1, 1]} : vector<1x256xf32> to vector<1x64xf32>
    %419 = math.tanh %418 : vector<1x64xf32>
    %420 = vector.extract_strided_slice %417 {offsets = [0, 64], sizes = [1, 64], strides = [1, 1]} : vector<1x192xf32> to vector<1x64xf32>
    %421 = arith.mulf %420, %403 : vector<1x64xf32>
    %422 = vector.extract_strided_slice %417 {offsets = [0, 0], sizes = [1, 64], strides = [1, 1]} : vector<1x192xf32> to vector<1x64xf32>
    %423 = arith.mulf %422, %419 : vector<1x64xf32>
    %424 = arith.addf %421, %423 : vector<1x64xf32>
    %425 = vector.extract_strided_slice %417 {offsets = [0, 128], sizes = [1, 64], strides = [1, 1]} : vector<1x192xf32> to vector<1x64xf32>
    %426 = math.tanh %424 : vector<1x64xf32>
    %427 = arith.mulf %425, %426 : vector<1x64xf32>
    %428 = vector.extract_strided_slice %427 {offsets = [0, 32], sizes = [1, 32], strides = [1, 1]} : vector<1x64xf32> to vector<1x32xf32>
    %c12_128 = arith.constant 12 : index
    %c0_129 = arith.constant 0 : index
    %429 = vector.load %arg16[%c12_128, %c0_129] : memref<16x32xf32, #tpu.memory_space<vmem>>, vector<1x32xf32>
    tpu.vector_store %arg16[%c12_128, %c0_129], %428 {strides = array<i32>} : memref<16x32xf32, #tpu.memory_space<vmem>>, vector<1x32xf32>,
    %c14 = arith.constant 14 : index
    %c0_130 = arith.constant 0 : index
    %430 = vector.load %arg15[%c14, %c0_130] : memref<16x256xf32, #tpu.memory_space<vmem>>, vector<1x256xf32>
    %cst_131 = arith.constant dense<0.000000e+00> : vector<1x256xf32>
    %431 = tpu.matmul %427, %128, %cst_131 {dimension_numbers = #tpu.dot_dimension_numbers<[1], [0], [0], [1], [0, 0, 1, 1], [], []>} : vector<1x64xf32>, vector<64x256xf32>, vector<1x256xf32> -> vector<1x256xf32>
    %432 = arith.addf %431, %430 : vector<1x256xf32>
    %433 = vector.extract_strided_slice %432 {offsets = [0, 0], sizes = [1, 192], strides = [1, 1]} : vector<1x256xf32> to vector<1x192xf32>
    %434 = arith.negf %433 : vector<1x192xf32>
    %435 = math.exp %434 : vector<1x192xf32>
    %cst_132 = arith.constant 1.000000e+00 : f32
    %436 = vector.broadcast %cst_132 : f32 to vector<1x192xf32>
    %437 = arith.addf %436, %435 : vector<1x192xf32>
    %438 = arith.divf %436, %437 : vector<1x192xf32>
    %439 = vector.extract_strided_slice %432 {offsets = [0, 192], sizes = [1, 64], strides = [1, 1]} : vector<1x256xf32> to vector<1x64xf32>
    %440 = math.tanh %439 : vector<1x64xf32>
    %441 = vector.extract_strided_slice %438 {offsets = [0, 64], sizes = [1, 64], strides = [1, 1]} : vector<1x192xf32> to vector<1x64xf32>
    %442 = arith.mulf %441, %424 : vector<1x64xf32>
    %443 = vector.extract_strided_slice %438 {offsets = [0, 0], sizes = [1, 64], strides = [1, 1]} : vector<1x192xf32> to vector<1x64xf32>
    %444 = arith.mulf %443, %440 : vector<1x64xf32>
    %445 = arith.addf %442, %444 : vector<1x64xf32>
    %446 = vector.extract_strided_slice %438 {offsets = [0, 128], sizes = [1, 64], strides = [1, 1]} : vector<1x192xf32> to vector<1x64xf32>
    %447 = math.tanh %445 : vector<1x64xf32>
    %448 = arith.mulf %446, %447 : vector<1x64xf32>
    %449 = vector.extract_strided_slice %448 {offsets = [0, 32], sizes = [1, 32], strides = [1, 1]} : vector<1x64xf32> to vector<1x32xf32>
    %c13_133 = arith.constant 13 : index
    %c0_134 = arith.constant 0 : index
    %450 = vector.load %arg16[%c13_133, %c0_134] : memref<16x32xf32, #tpu.memory_space<vmem>>, vector<1x32xf32>
    tpu.vector_store %arg16[%c13_133, %c0_134], %449 {strides = array<i32>} : memref<16x32xf32, #tpu.memory_space<vmem>>, vector<1x32xf32>,
    %c15 = arith.constant 15 : index
    %c0_135 = arith.constant 0 : index
    %451 = vector.load %arg15[%c15, %c0_135] : memref<16x256xf32, #tpu.memory_space<vmem>>, vector<1x256xf32>
    %cst_136 = arith.constant dense<0.000000e+00> : vector<1x256xf32>
    %452 = tpu.matmul %448, %128, %cst_136 {dimension_numbers = #tpu.dot_dimension_numbers<[1], [0], [0], [1], [0, 0, 1, 1], [], []>} : vector<1x64xf32>, vector<64x256xf32>, vector<1x256xf32> -> vector<1x256xf32>
    %453 = arith.addf %452, %451 : vector<1x256xf32>
    %454 = vector.extract_strided_slice %453 {offsets = [0, 0], sizes = [1, 192], strides = [1, 1]} : vector<1x256xf32> to vector<1x192xf32>
    %455 = arith.negf %454 : vector<1x192xf32>
    %456 = math.exp %455 : vector<1x192xf32>
    %cst_137 = arith.constant 1.000000e+00 : f32
    %457 = vector.broadcast %cst_137 : f32 to vector<1x192xf32>
    %458 = arith.addf %457, %456 : vector<1x192xf32>
    %459 = arith.divf %457, %458 : vector<1x192xf32>
    %460 = vector.extract_strided_slice %453 {offsets = [0, 192], sizes = [1, 64], strides = [1, 1]} : vector<1x256xf32> to vector<1x64xf32>
    %461 = math.tanh %460 : vector<1x64xf32>
    %462 = vector.extract_strided_slice %459 {offsets = [0, 64], sizes = [1, 64], strides = [1, 1]} : vector<1x192xf32> to vector<1x64xf32>
    %463 = arith.mulf %462, %445 : vector<1x64xf32>
    %464 = vector.extract_strided_slice %459 {offsets = [0, 0], sizes = [1, 64], strides = [1, 1]} : vector<1x192xf32> to vector<1x64xf32>
    %465 = arith.mulf %464, %461 : vector<1x64xf32>
    %466 = arith.addf %463, %465 : vector<1x64xf32>
    %467 = vector.extract_strided_slice %459 {offsets = [0, 128], sizes = [1, 64], strides = [1, 1]} : vector<1x192xf32> to vector<1x64xf32>
    %468 = math.tanh %466 : vector<1x64xf32>
    %469 = arith.mulf %467, %468 : vector<1x64xf32>
    %470 = vector.extract_strided_slice %469 {offsets = [0, 0], sizes = [1, 32], strides = [1, 1]} : vector<1x64xf32> to vector<1x32xf32>
    %c0_138 = arith.constant 0 : index
    %c0_139 = arith.constant 0 : index
    %c0_140 = arith.constant 0 : index
    %471 = vector.load %arg13[%c0_138, %c0_139, %c0_140] : memref<1x2x32xf32, #tpu.memory_space<vmem>>, vector<1x1x32xf32>
    %472 = vector.shape_cast %471 : vector<1x1x32xf32> to vector<1x32xf32>
    %473 = vector.shape_cast %470 : vector<1x32xf32> to vector<1x1x32xf32>
    tpu.vector_store %arg13[%c0_138, %c0_139, %c0_140], %473 {strides = array<i32>} : memref<1x2x32xf32, #tpu.memory_space<vmem>>, vector<1x1x32xf32>,
    %474 = vector.extract_strided_slice %466 {offsets = [0, 0], sizes = [1, 32], strides = [1, 1]} : vector<1x64xf32> to vector<1x32xf32>
    %c0_141 = arith.constant 0 : index
    %c0_142 = arith.constant 0 : index
    %c0_143 = arith.constant 0 : index
    %475 = vector.load %arg14[%c0_141, %c0_142, %c0_143] : memref<1x2x32xf32, #tpu.memory_space<vmem>>, vector<1x1x32xf32>
    %476 = vector.shape_cast %475 : vector<1x1x32xf32> to vector<1x32xf32>
    %477 = vector.shape_cast %474 : vector<1x32xf32> to vector<1x1x32xf32>
    tpu.vector_store %arg14[%c0_141, %c0_142, %c0_143], %477 {strides = array<i32>} : memref<1x2x32xf32, #tpu.memory_space<vmem>>, vector<1x1x32xf32>,
    %478 = vector.extract_strided_slice %469 {offsets = [0, 32], sizes = [1, 32], strides = [1, 1]} : vector<1x64xf32> to vector<1x32xf32>
    %c14_144 = arith.constant 14 : index
    %c0_145 = arith.constant 0 : index
    %479 = vector.load %arg16[%c14_144, %c0_145] : memref<16x32xf32, #tpu.memory_space<vmem>>, vector<1x32xf32>
    tpu.vector_store %arg16[%c14_144, %c0_145], %478 {strides = array<i32>} : memref<16x32xf32, #tpu.memory_space<vmem>>, vector<1x32xf32>,
    %cst_146 = arith.constant dense<0.000000e+00> : vector<1x256xf32>
    %480 = tpu.matmul %469, %128, %cst_146 {dimension_numbers = #tpu.dot_dimension_numbers<[1], [0], [0], [1], [0, 0, 1, 1], [], []>} : vector<1x64xf32>, vector<64x256xf32>, vector<1x256xf32> -> vector<1x256xf32>
    %481 = arith.addf %480, %110 : vector<1x256xf32>
    %482 = vector.extract_strided_slice %481 {offsets = [0, 0], sizes = [1, 192], strides = [1, 1]} : vector<1x256xf32> to vector<1x192xf32>
    %483 = arith.negf %482 : vector<1x192xf32>
    %484 = math.exp %483 : vector<1x192xf32>
    %cst_147 = arith.constant 1.000000e+00 : f32
    %485 = vector.broadcast %cst_147 : f32 to vector<1x192xf32>
    %486 = arith.addf %485, %484 : vector<1x192xf32>
    %487 = arith.divf %485, %486 : vector<1x192xf32>
    %488 = vector.extract_strided_slice %481 {offsets = [0, 192], sizes = [1, 64], strides = [1, 1]} : vector<1x256xf32> to vector<1x64xf32>
    %489 = math.tanh %488 : vector<1x64xf32>
    %490 = vector.extract_strided_slice %487 {offsets = [0, 64], sizes = [1, 64], strides = [1, 1]} : vector<1x192xf32> to vector<1x64xf32>
    %491 = arith.mulf %490, %466 : vector<1x64xf32>
    %492 = vector.extract_strided_slice %487 {offsets = [0, 0], sizes = [1, 64], strides = [1, 1]} : vector<1x192xf32> to vector<1x64xf32>
    %493 = arith.mulf %492, %489 : vector<1x64xf32>
    %494 = arith.addf %491, %493 : vector<1x64xf32>
    %495 = vector.extract_strided_slice %487 {offsets = [0, 128], sizes = [1, 64], strides = [1, 1]} : vector<1x192xf32> to vector<1x64xf32>
    %496 = math.tanh %494 : vector<1x64xf32>
    %497 = arith.mulf %495, %496 : vector<1x64xf32>
    %498 = vector.extract_strided_slice %497 {offsets = [0, 32], sizes = [1, 32], strides = [1, 1]} : vector<1x64xf32> to vector<1x32xf32>
    %c15_148 = arith.constant 15 : index
    %c0_149 = arith.constant 0 : index
    %499 = vector.load %arg16[%c15_148, %c0_149] : memref<16x32xf32, #tpu.memory_space<vmem>>, vector<1x32xf32>
    tpu.vector_store %arg16[%c15_148, %c0_149], %498 {strides = array<i32>} : memref<16x32xf32, #tpu.memory_space<vmem>>, vector<1x32xf32>,
    %500 = vector.extract_strided_slice %497 {offsets = [0, 32], sizes = [1, 32], strides = [1, 1]} : vector<1x64xf32> to vector<1x32xf32>
    %c0_150 = arith.constant 0 : index
    %c1_151 = arith.constant 1 : index
    %c0_152 = arith.constant 0 : index
    %501 = vector.load %arg13[%c0_150, %c1_151, %c0_152] : memref<1x2x32xf32, #tpu.memory_space<vmem>>, vector<1x1x32xf32>
    %502 = vector.shape_cast %501 : vector<1x1x32xf32> to vector<1x32xf32>
    %503 = vector.shape_cast %500 : vector<1x32xf32> to vector<1x1x32xf32>
    tpu.vector_store %arg13[%c0_150, %c1_151, %c0_152], %503 {strides = array<i32>} : memref<1x2x32xf32, #tpu.memory_space<vmem>>, vector<1x1x32xf32>,
    %504 = vector.extract_strided_slice %494 {offsets = [0, 32], sizes = [1, 32], strides = [1, 1]} : vector<1x64xf32> to vector<1x32xf32>
    %c0_153 = arith.constant 0 : index
    %c1_154 = arith.constant 1 : index
    %c0_155 = arith.constant 0 : index
    %505 = vector.load %arg14[%c0_153, %c1_154, %c0_155] : memref<1x2x32xf32, #tpu.memory_space<vmem>>, vector<1x1x32xf32>
    %506 = vector.shape_cast %505 : vector<1x1x32xf32> to vector<1x32xf32>
    %507 = vector.shape_cast %504 : vector<1x32xf32> to vector<1x1x32xf32>
    tpu.vector_store %arg14[%c0_153, %c1_154, %c0_155], %507 {strides = array<i32>} : memref<1x2x32xf32, #tpu.memory_space<vmem>>, vector<1x1x32xf32>,
    %c0_156 = arith.constant 0 : index
    %c0_157 = arith.constant 0 : index
    %508 = vector.load %arg16[%c0_156, %c0_157] : memref<16x32xf32, #tpu.memory_space<vmem>>, vector<16x32xf32>
    %cst_158 = arith.constant dense<0.000000e+00> : vector<1x16xf32>
    %509 = tpu.matmul %112, %508, %cst_158 {dimension_numbers = #tpu.dot_dimension_numbers<[1], [1], [0], [0], [0, 0, 1, 0], [], []>} : vector<1x32xf32>, vector<16x32xf32>, vector<1x16xf32> -> vector<1x16xf32>
    %510 = vector.broadcast %113 : vector<1x1xf32> to vector<1x16xf32>
    %511 = arith.addf %509, %510 : vector<1x16xf32>
    %c0_159 = arith.constant 0 : index
    %c0_160 = arith.constant 0 : index
    %c0_161 = arith.constant 0 : index
    %512 = vector.load %arg12[%c0_159, %c0_160, %c0_161] : memref<1x1x16xf32, #tpu.memory_space<vmem>>, vector<1x1x16xf32>
    %513 = vector.shape_cast %512 : vector<1x1x16xf32> to vector<1x16xf32>
    %514 = vector.shape_cast %511 : vector<1x16xf32> to vector<1x1x16xf32>
    tpu.vector_store %arg12[%c0_159, %c0_160, %c0_161], %514 {strides = array<i32>} : memref<1x1x16xf32, #tpu.memory_space<vmem>>, vector<1x1x16xf32>,
    return
  }
  func.func @transform_0(%arg0: i32) -> (i32, i32, i32) {
    %c0_i32 = arith.constant 0 : i32
    %c0_i32_0 = arith.constant 0 : i32
    %c0_i32_1 = arith.constant 0 : i32
    return %arg0, %c0_i32, %c0_i32_0 : i32, i32, i32
  }
  func.func @transform_1(%arg0: i32) -> (i32, i32, i32) {
    %c0_i32 = arith.constant 0 : i32
    %c0_i32_0 = arith.constant 0 : i32
    %c0_i32_1 = arith.constant 0 : i32
    return %arg0, %c0_i32, %c0_i32_0 : i32, i32, i32
  }
  func.func @transform_2(%arg0: i32) -> (i32, i32) {
    %c0_i32 = arith.constant 0 : i32
    %c0_i32_0 = arith.constant 0 : i32
    %c0_i32_1 = arith.constant 0 : i32
    return %c0_i32, %c0_i32_0 : i32, i32
  }
  func.func @transform_3(%arg0: i32) -> (i32, i32) {
    %c0_i32 = arith.constant 0 : i32
    %c0_i32_0 = arith.constant 0 : i32
    %c0_i32_1 = arith.constant 0 : i32
    return %c0_i32, %c0_i32_0 : i32, i32
  }
  func.func @transform_4(%arg0: i32) -> (i32, i32) {
    %c0_i32 = arith.constant 0 : i32
    %c0_i32_0 = arith.constant 0 : i32
    %c0_i32_1 = arith.constant 0 : i32
    return %c0_i32, %c0_i32_0 : i32, i32
  }
  func.func @transform_5(%arg0: i32) -> (i32, i32) {
    %c0_i32 = arith.constant 0 : i32
    %c0_i32_0 = arith.constant 0 : i32
    %c0_i32_1 = arith.constant 0 : i32
    return %c0_i32, %c0_i32_0 : i32, i32
  }
  func.func @transform_6(%arg0: i32) -> (i32, i32) {
    %c0_i32 = arith.constant 0 : i32
    %c0_i32_0 = arith.constant 0 : i32
    %c0_i32_1 = arith.constant 0 : i32
    return %c0_i32, %c0_i32_0 : i32, i32
  }
  func.func @transform_7(%arg0: i32) -> (i32, i32) {
    %c0_i32 = arith.constant 0 : i32
    %c0_i32_0 = arith.constant 0 : i32
    %c0_i32_1 = arith.constant 0 : i32
    return %c0_i32, %c0_i32_0 : i32, i32
  }
  func.func @transform_8(%arg0: i32) -> (i32, i32) {
    %c0_i32 = arith.constant 0 : i32
    %c0_i32_0 = arith.constant 0 : i32
    %c0_i32_1 = arith.constant 0 : i32
    return %c0_i32, %c0_i32_0 : i32, i32
  }
  func.func @transform_9(%arg0: i32) -> (i32, i32) {
    %c0_i32 = arith.constant 0 : i32
    %c0_i32_0 = arith.constant 0 : i32
    %c0_i32_1 = arith.constant 0 : i32
    return %c0_i32, %c0_i32_0 : i32, i32
  }
  func.func @transform_10(%arg0: i32) -> (i32, i32) {
    %c0_i32 = arith.constant 0 : i32
    %c0_i32_0 = arith.constant 0 : i32
    %c0_i32_1 = arith.constant 0 : i32
    return %c0_i32, %c0_i32_0 : i32, i32
  }
  func.func @transform_11(%arg0: i32) -> (i32, i32, i32) {
    %c0_i32 = arith.constant 0 : i32
    %c0_i32_0 = arith.constant 0 : i32
    %c0_i32_1 = arith.constant 0 : i32
    return %arg0, %c0_i32, %c0_i32_0 : i32, i32, i32
  }
  func.func @transform_12(%arg0: i32) -> (i32, i32, i32) {
    %c0_i32 = arith.constant 0 : i32
    %c0_i32_0 = arith.constant 0 : i32
    %c0_i32_1 = arith.constant 0 : i32
    return %arg0, %c0_i32, %c0_i32_0 : i32, i32, i32
  }
  func.func @transform_13(%arg0: i32) -> (i32, i32, i32) {
    %c0_i32 = arith.constant 0 : i32
    %c0_i32_0 = arith.constant 0 : i32
    %c0_i32_1 = arith.constant 0 : i32
    return %arg0, %c0_i32, %c0_i32_0 : i32, i32, i32
  }
}

</mosaic_0001>

<bundles_post_ra>
// kernel: tpu_custom_call.1
= control target key start
LH: loop header
LB: loop body
LE: loop exit
PB: predicated region body
PF: predicated region fallthrough
CT: control target
= control target key end

     0   :  { %s5827_s0 = inlined_call_operand.vmem [shape: f32[8,16,8], index: 0, kind: input, shape index: {}]   ;;  %s5828_s1 = inlined_call_operand.vmem [shape: f32[8,16,64], index: 1, kind: input, shape index: {}]   ;;  %s5829_s2 = inlined_call_operand.hbm [shape: f32[8,32], index: 2, kind: input, shape index: {}]   ;;  %s5830_s3 = inlined_call_operand.hbm [shape: f32[32,64], index: 3, kind: input, shape index: {}]   ;;  %s5831_s4 = inlined_call_operand.hbm [shape: f32[32,64], index: 4, kind: input, shape index: {}]   ;;  %s5832_s5 = inlined_call_operand.hbm [shape: f32[16,64], index: 5, kind: input, shape index: {}]   ;;  %s5833_s6 = inlined_call_operand.vmem [shape: f32[64,16], index: 6, kind: input, shape index: {}]   ;;  %s5834_s7 = inlined_call_operand.vmem [shape: f32[64,32], index: 7, kind: input, shape index: {}]   ;;  %s5835_s8 = inlined_call_operand.vmem [shape: f32[32,256], index: 8, kind: input, shape index: {}]   ;;  %s5836_s9 = inlined_call_operand.vmem [shape: f32[64,256], index: 9, kind: input, shape index: {}]   ;;  %s5837_s10 = inlined_call_operand.vmem [shape: f32[4,256], index: 10, kind: input, shape index: {}]   ;;  %s5838_s11 = inlined_call_operand.hbm [shape: f32[8,1,16], index: 11, kind: output, shape index: {0}]   ;;  %s5839_s12 = inlined_call_operand.hbm [shape: f32[8,2,32], index: 12, kind: output, shape index: {1}]   ;;  %s5840_s13 = inlined_call_operand.hbm [shape: f32[8,2,32], index: 13, kind: output, shape index: {2}]  }
   0x1   :  { %5855 = sst [smem:[#allocation27_spill]] %s5838_s11 }
   0x2   :  { %5856 = sst [smem:[#allocation28_spill]] %s5839_s12 }
   0x3   :  { %5857 = sst [smem:[#allocation29_spill]] %s5840_s13 }
   0x4   :  { %19 = vsyncpa [#allocation5], 0 }
   0x5   :  { %20 = vsyncpa [#allocation8], 0 }
   0x6   :  { %21 = vsyncpa [#allocation11], 0 }
   0x7   :  { %22 = vsyncpa [#allocation6], 0 }
   0x8   :  { %24 = vsyncpa [#allocation6 + $0x1], 0 }
   0x9   :  { %25 = vsyncpa [#allocation14], 0 }
   0xa   :  { %27 = vsyncpa [#allocation14 + $0x1], 0  ;;  %s4844_s25 = smov 0   ;;  %s4846_s26 = smov 0  }
   0xb   :  { %s4848_s27 = smov 0   ;;  %s4850_s28 = smov 0  }
   0xc LB: > { %5858 = sst [smem:[#allocation21_spill]] %s4743_s25  ;;  %s4865_s29 = sadd.s32 4294967295, %s4755_s28   ;;  %s4755_s28 = sphi %s4850_s28, %s5892_s28   ;;  %s4751_s27 = sphi %s4848_s27, %s5894_s27   ;;  %s4747_s26 = sphi %s4846_s26, %s5896_s26   ;;  %s4743_s25 = sphi %s4844_s25, %s5895_s25  }
   0xd   : > { %5859 = sst [smem:[#allocation22_spill]] %s4751_s27  ;;  %s5841_s30 = sadd.s32 4294967294, %s4755_s28  }
   0xe   : > { %5860 = sst [smem:[#allocation23_spill]] %s4755_s28  ;;  %s4869_s14 = sadd.s32 1, %s4755_s28  }
   0xf   : > { %5861 = sst [smem:[#allocation24_spill]] %s4869_s14  ;;  %s281_s15 = sadd.s32 1, %s4751_s27 }
  0x10   : > { %s278_s16 = ssub.s32 %s4755_s28, %s4869_s14  ;;  %p291_p0 = scmp.ne.s32.totalorder %s4751_s27, %s4747_s26 }
  0x11   : > { %p279_p1 = scmp.eq.s32.totalorder %s278_s16, 0  ;;  %p292_p2 = scmp.eq.s32.totalorder %s4865_s29, 7 }
  0x12   : > { %p297_p3 = scmp.ne.s32.totalorder %s4747_s26, %s4743_s25  ;;  %p298_p4 = scmp.eq.s32.totalorder %s5841_s30, 7 }
  0x13   : > { %s4882_s17 = scalar_select %p279_p1, %s4751_s27, %s281_s15  }
  0x14   : > { %p4884_p5 = por %p292_p2, %p291_p0  ;;  %p4888_p6 = por %p298_p4, %p297_p3 }
  0x15   : > { %5862 = sst [smem:[#allocation25_spill]] %s4882_s17  ;;  %p3670_p7 = scmp.ge.s32.totalorder %s4755_s28, 1 }
  0x16   : > { %s5863_s18 = scalar_select %p4884_p5, 1, 0 }
  0x17   : > { %s5864_s19 = scalar_select %p4888_p6, 1, 0 }
  0x18   : > { %p357_p8 = scmp.lt.s32.totalorder %s4755_s28, 9  ;;  %p5847_p9 = scmp.eq.s32.totalorder %s4865_s29, 0 }
  0x19   : > { %5865 = sst [smem:[#allocation26_spill]] %s5864_s19  ;;  %s4757_s21 = smov [#allocation7]  }
  0x1a   : > { %p4895_p10 = pnand %p3670_p7, %p357_p8  ;;  %s380_s22 = sshll.u32 %s4757_s21, 4  ;;  %s4901_s22 = int_to_ptr.vmem [resolvable:$true] %s380_s22 }
  0x1b   : > { %s4758_s24 = smov [#allocation4]   ;;  %s4759_s16 = smov [#allocation9]  }
  0x1c   : > { %s5866_s20 = scalar_select %p4895_p10, 1, 0 }
  0x1d   : > { %p4217_p11 = pneg %p4895_p10  ;;  %s370_s15 = sshll.u32 %s4758_s24, 4  ;;  %s4909_s15 = int_to_ptr.vmem [resolvable:$true] %s370_s15 }
  0x1e   : > { %s4911_s30 = sshll.u32 %s4759_s16, 4  ;;  %s4509_s21 = scalar_lea.hbm %s5830_s3, 512  ;;  %s394_s30 = int_to_ptr.vmem [resolvable:$true] %s4911_s30 }
  0x1f   : > { %p4905_p12 = pnand %p5847_p9, %p4217_p11  ;;  %p4510_p13 = scmp.ne.s32.totalorder %s5830_s3, %s4509_s21 }
  0x20   : > { %p4516_p3 = scmp.lt.u32.totalorder %s4509_s21, %s5830_s3 }
  0x21   : > { %p4921_p0 = pneg %p4905_p12 }
  0x23   : > { %p4512_p1 = pnand %p4921_p0, %p4510_p13 }
  0x25   : > { %p4513_p2 = pneg %p4512_p1 }
  0x27   : > { %p4518_p4 = pnand %p4516_p3, %p4513_p2 }
  0x29   : > { %4521 = shalt.err (!%p4518_p4)
}
  0x2a   : > { %s4522_s27 = scalar_lea.vmem %s4901_s22, 512  ;;  %p4530_p9 = scmp.lt.s32.totalorder %s4901_s22, %s4901_s22 }
  0x2b   : > { %p4523_p7 = scmp.ne.s32.totalorder %s4901_s22, %s4522_s27  ;;  %p4531_p6 = scmp.lt.s32.totalorder %s4522_s27, %s4522_s27 }
  0x2d   : > { %p4525_p8 = pnand %p4523_p7, %p4921_p0  ;;  %p4532_p13 = por %p4531_p6, %p4530_p9 }
  0x2f   : > { %p4526_p11 = pneg %p4525_p8 }
  0x31   : > { %p4533_p1 = pnand %p4532_p13, %p4526_p11 }
  0x33   : > { %4536 = shalt.err (!%p4533_p1)
}
  0x34   : > { %s4760_s14 = smov 128   ;;  %s4761_s17 = smov 8  }
  0x35   : > { %4223 = dma.hbm_to_vmem [thread:$0]  (!%p4905_p12), %s5830_s3, 512, %s4901_s22, [#allocation8], %s4760_s14, %s4760_s14, %s4761_s17  }
  0x36   : > { %s4537_s27 = scalar_lea.hbm %s5829_s2, 128 }
  0x37   : > { %p4538_p6 = scmp.ne.s32.totalorder %s5829_s2, %s4537_s27  ;;  %p4544_p3 = scmp.lt.u32.totalorder %s4537_s27, %s5829_s2 }
  0x39   : > { %p4540_p9 = pnand %p4538_p6, %p4921_p0 }
  0x3b   : > { %p4541_p2 = pneg %p4540_p9 }
  0x3d   : > { %p4546_p4 = pnand %p4544_p3, %p4541_p2 }
  0x3f   : > { %4549 = shalt.err (!%p4546_p4)
}
  0x40   : > { %s4550_s22 = scalar_lea.vmem %s4909_s15, 128  ;;  %p4558_p13 = scmp.lt.s32.totalorder %s4909_s15, %s4909_s15 }
  0x41   : > { %p4551_p7 = scmp.ne.s32.totalorder %s4909_s15, %s4550_s22  ;;  %p4559_p1 = scmp.lt.s32.totalorder %s4550_s22, %s4550_s22 }
  0x43   : > { %p4553_p8 = pnand %p4551_p7, %p4921_p0  ;;  %p4560_p6 = por %p4559_p1, %p4558_p13 }
  0x45   : > { %p4554_p11 = pneg %p4553_p8 }
  0x47   : > { %p4561_p9 = pnand %p4560_p6, %p4554_p11 }
  0x49   : > { %4564 = shalt.err (!%p4561_p9)
}
  0x4a   : > { %4220 = dma.hbm_to_vmem [thread:$0]  (!%p4905_p12), %s5829_s2, 128, %s4909_s15, [#allocation5]  }
  0x4b   : > { %s4565_s19 = scalar_lea.hbm %s5831_s4, 512 }
  0x4c   : > { %p4566_p2 = scmp.ne.s32.totalorder %s5831_s4, %s4565_s19  ;;  %p4572_p7 = scmp.lt.u32.totalorder %s4565_s19, %s5831_s4 }
  0x4e   : > { %p4568_p3 = pnand %p4566_p2, %p4921_p0 }
  0x50   : > { %p4569_p4 = pneg %p4568_p3 }
  0x52   : > { %p4574_p8 = pnand %p4572_p7, %p4569_p4 }
  0x54   : > { %4577 = shalt.err (!%p4574_p8)
}
  0x55   : > { %s4578_s22 = scalar_lea.vmem %s394_s30, 512  ;;  %p4586_p6 = scmp.lt.s32.totalorder %s394_s30, %s394_s30 }
  0x56   : > { %p4579_p11 = scmp.ne.s32.totalorder %s394_s30, %s4578_s22  ;;  %p4587_p9 = scmp.lt.s32.totalorder %s4578_s22, %s4578_s22 }
  0x58   : > { %p4581_p13 = pnand %p4579_p11, %p4921_p0  ;;  %p4588_p5 = por %p4587_p9, %p4586_p6 }
  0x5a   : > { %p4582_p1 = pneg %p4581_p13 }
  0x5c   : > { %p4589_p10 = pnand %p4588_p5, %p4582_p1 }
  0x5e   : > { %4592 = shalt.err (!%p4589_p10)
}
  0x5f   : > { %4226 = dma.hbm_to_vmem [thread:$0]  (!%p4905_p12), %s5831_s4, 512, %s394_s30, [#allocation8], %s4760_s14, %s4760_s14, %s4761_s17  }
  0x60   : > { %s4762_s12 = smov [#allocation10]   ;;  %s4593_s21 = scalar_lea.hbm %s5832_s5, 256 }
  0x61   : > { %s406_s13 = sshll.u32 %s4762_s12, 4  ;;  %p4594_p5 = scmp.ne.s32.totalorder %s5832_s5, %s4593_s21  ;;  %s407_s13 = int_to_ptr.vmem [resolvable:$true] %s406_s13 }
  0x62   : > { %p4600_p3 = scmp.lt.u32.totalorder %s4593_s21, %s5832_s5 }
  0x63   : > { %p4596_p10 = pnand %p4594_p5, %p4921_p0 }
  0x65   : > { %p4597_p2 = pneg %p4596_p10 }
  0x67   : > { %p4602_p4 = pnand %p4600_p3, %p4597_p2 }
  0x69   : > { %4605 = shalt.err (!%p4602_p4)
}
  0x6a   : > { %s4606_s30 = scalar_lea.vmem %s407_s13, 256  ;;  %p4614_p13 = scmp.lt.s32.totalorder %s407_s13, %s407_s13 }
  0x6b   : > { %p4607_p7 = scmp.ne.s32.totalorder %s407_s13, %s4606_s30  ;;  %p4615_p1 = scmp.lt.s32.totalorder %s4606_s30, %s4606_s30 }
  0x6d   : > { %p4609_p8 = pnand %p4607_p7, %p4921_p0  ;;  %p4616_p6 = por %p4615_p1, %p4614_p13 }
  0x6f   : > { %p4610_p11 = pneg %p4609_p8 }
  0x71   : > { %p4617_p9 = pnand %p4616_p6, %p4610_p11 }
  0x73   : > { %4620 = shalt.err (!%p4617_p9)
}
  0x74   : > { %4229 = dma.hbm_to_vmem [thread:$0]  (!%p4905_p12), %s5832_s5, 256, %s407_s13, [#allocation11], %s4760_s14, %s4760_s14, %s4761_s17  }
  0x75   : > { %p5869_p5 = scmp.ne.s32.totalorder %s5866_s20, 0 }
  0x76   : > { %p5870_p0 = scmp.eq.s32.totalorder (!%p5869_p5), %s4865_s29, 0 }
  0x77   : > { %453 = sbr.rel (%p5869_p5) target bundleno = 11523 (0x2d03), region = 64 }
  0x7e   : > { %4722 = dma.done.wait (%p5870_p0), [#allocation5], 128   ;;  %p5871_p10 = pmov %p5870_p0 }
  0x7f   : > { %p5872_p2 = pmov %p5870_p0 }
  0x80   : > { %4724 = vsyncadd (%p5871_p10), [#allocation5], 4294967168 }
  0x81   : > { %4726 = dma.done.wait (%p5872_p2), [#allocation8], 1024   ;;  %p5873_p3 = pmov %p5870_p0 }
  0x82   : > { %p5874_p4 = pmov %p5870_p0 }
  0x83   : > { %4728 = vsyncadd (%p5873_p3), [#allocation8], 4294966272 }
  0x84   : > { %4730 = dma.done.wait (%p5874_p4), [#allocation11], 256   ;;  %p5875_p12 = pmov %p5870_p0 }
  0x85   : > { %p523_p7 = scmp.lt.s32.totalorder %s4865_s29, 7  ;;  %vm536_vm0 = vcmask 64512   ;;  %v535_v0 = vld [vmem:[#allocation4] sm:$0xff]  ;;  %v622_v3 = vld [vmem:[#allocation9] sm:$0xff]  ;;  %v623_v4 = vld [vmem:[#allocation9 + $0x8] sm:$0xff]  ;;  %vm626_vm1 = vcmask 261120   ;;  %v809_v40 = vlaneseq }
  0x86   : > { %4732 = vsyncadd (%p5875_p12), [#allocation11], 4294967040  ;;  %3806 = vmatprep.subr.mxu1 %v535_v0  ;;  %v618_v5 = vld [vmem:[#allocation7] sm:$0xff]  ;;  %v619_v6 = vld [vmem:[#allocation7 + $0x8] sm:$0xff]  ;;  %v3875_v7 = vpack.c.bf16 %v623_v4, %v622_v3  ;;  %vm924_vm2 = vcmask 130048   ;;  %vm712_vm3 = vcmask 523264  }
  0x87   : > { %s5027_s25 = scalar_select %p523_p7, %s4865_s29, 7  ;;  %3807 = vmatpush3.msra.mxu1 %v535_v0  ;;  %v3883_v8 = vpack.c.bf16 %v619_v6, %v618_v5  ;;  %v624_v9 = vld [vmem:[#allocation9 + $0x10] sm:$0xff]  ;;  %v625_v10 = vld [vmem:[#allocation9 + $0x18] sm:$0xff]  ;;  %v916_v18 = vld [vmem:[%s5833_s6] sm:$0xff]  ;;  %v5071_v43 = vand.u32 127, %v809_v40 }
  0x88   : > { %v620_v11 = vld [vmem:[#allocation7 + $0x10] sm:$0xff]  ;;  %v3879_v12 = vpack.c.bf16 %v625_v10, %v624_v9  ;;  %v621_v13 = vld [vmem:[#allocation7 + $0x18] sm:$0xff]  ;;  %3876 = vmatprep.subr.bf16.mxu1 %v3875_v7  ;;  %v919_v21 = vld [vmem:[%s5833_s6 + $0x18] sm:$0xff]  ;;  %s4764_s28 = smov 64   ;;  %s4765_s21 = smov 96  }
  0x89   : > { %s3766_s20 = sshll.u32 %s5027_s25, 4  ;;  %3884 = vmatprep.subr.bf16.mxu0 %v3883_v8  ;;  %v3887_v14 = vpack.c.bf16 %v621_v13, %v620_v11  ;;  %v917_v19 = vld [vmem:[%s5833_s6 + $0x8] sm:$0xff]  ;;  %v918_v20 = vld [vmem:[%s5833_s6 + $0x10] sm:$0xff]  ;;  %v920_v22 = vld [vmem:[%s5833_s6 + $0x20] sm:$0xff]  ;;  %vm814_vm4 = vcmp.ge.s32.totalorder %v5071_v43, 16  ;;  %vm815_vm5 = vcmp.lt.s32.totalorder %v5071_v43, 32 }
  0x8a   : > { %s527_s17 = scalar_lea.vmem %s5827_s0, %s3766_s20  ;;  %3886 = vmatpush3.bf16.msra.mxu0 %v3883_v8  ;;  %v921_v23 = vld [vmem:[%s5833_s6 + $0x28] sm:$0xff]  ;;  %v922_v24 = vld [vmem:[%s5833_s6 + $0x30] sm:$0xff]  ;;  %v923_v25 = vld [vmem:[%s5833_s6 + $0x38] sm:$0xff]  ;;  %s532_s19 = scalar_lea.vmem %s5828_s1, %s3766_s20  ;;  %vm812_vm11 = vcmp.lt.s32.totalorder %v5071_v43, 16  ;;  %vm817_vm12 = vcmp.ge.s32.totalorder %v5071_v43, 32  ;;  %vm818_vm13 = vcmp.lt.s32.totalorder %v5071_v43, 48 }
  0x8b   : > { %v533_v1 = vld [vmem:[%s527_s17] sm:$0xff]  ;;  %v534_v2 = vld [vmem:[%s527_s17 + $0x8] sm:$0xff]  ;;  %3888 = vmatprep.subr.bf16.mxu0 %v3887_v14  ;;  %v708_v27 = vld [vmem:[#allocation10] sm:$0xff]  ;;  %vm820_vm15 = vcmp.ge.s32.totalorder %v5071_v43, 48  ;;  %s4769_s27 = smov 32   ;;  %s3455_s30 = sand.u32 1, %s4865_s29  }
  0x8c   : > { %3808 = vmatprep.mubr.msk.f32.mxu1 %vm536_vm0, %v533_v1  ;;  %v709_v26 = vld [vmem:[#allocation10 + $0x8] sm:$0xff]  ;;  %v5075_v45 = vld [vmem:[%s532_s19 + $0x8] sm:$0xff]  ;;  %vm5083_vm10 = vmand %vm814_vm4, %vm815_vm5  ;;  %vm1532_vm4 = vcmask 253952   ;;  %s3762_s15 = sshll.u32 %s4865_s29, 5  ;;  %s5882_s14 = sld [smem:[#allocation28_spill]] }
  0x8d   : > { %3809 = vmatmul.mubr.msk.f32.vlgmr.msra.gmra.mrb[0].mxu1 %vm536_vm0, %v534_v2  ;;  %v5073_v44 = vld [vmem:[%s532_s19] sm:$0xff]  ;;  %vm806_vm7 = vcmp.gt.f32.partialorder %v5075_v45, 0.0  ;;  %vm5104_vm14 = vmand %vm817_vm12, %vm818_vm13  ;;  %vm821_vm0 = vcmp.lt.s32.totalorder %v5071_v43, 64  ;;  %v1272_v62 = vld [vmem:[%s5836_s9 + $0x8] sm:$0xff]  ;;  %s5642_s19 = sand.u32 1, %s4747_s26   ;;  %p5883_p11 = scmp.ne.s32.totalorder %s5863_s18, 0 }
  0x8e   : > { %3878 = vmatpush3.bf16.msra.mxu1 %v3875_v7  ;;  %3890 = vmatpush3.bf16.msra.mxu0 %v3887_v14  ;;  %vm805_vm6 = vcmp.gt.f32.partialorder %v5073_v44, 0.0  ;;  %v1274_v3 = vld [vmem:[%s5836_s9 + $0x18] sm:$0xff]  ;;  %s3681_s25 = sshll.u32 %s5642_s19, 1 }
  0x8f   : > { %3880 = vmatprep.subr.bf16.mxu1 %v3879_v12  ;;  %s5648_s20 = scalar_lea.vmem [#allocation13], %s3681_s25  ;;  %s5714_s22 = scalar_lea.vmem [#allocation15], %s3681_s25 }
  0x90   : > { %s3500_s12 = sshll.u32 %s5714_s22, 4  ;;  %s3487_s13 = sshll.u32 %s5648_s20, 4  ;;  %s3488_s13 = int_to_ptr.vmem [resolvable:$true] %s3487_s13  ;;  %s3501_s12 = int_to_ptr.vmem [resolvable:$true] %s3500_s12 }
  0x91   : > { %s4621_s25 = scalar_lea.vmem %s3488_s13, 32 }
  0x92   : > { %3882 = vmatpush3.bf16.msra.mxu1 %v3879_v12  ;;  %s5731_s17 = scalar_lea.hbm %s5882_s14, %s3762_s15  ;;  %p4622_p8 = scmp.ne.s32.totalorder %s3488_s13, %s4621_s25 }
  0x94   : > { %p4623_p13 = pnand %p4622_p8, %p5883_p11 }
  0x96   : > { %p4624_p1 = pneg %p4623_p13 }
 0x160   : > { %v3810_v15 = vpop.f32.mrb[0].mxu1 }
 0x161   : > { %v609_v16 = vpop.f32.mrb[1].mxu1 }
 0x162   : > { %v3891_v17 = vpack.c.bf16 %v3810_v15, %v609_v16  ;;  %3819 = vmatprep.mubr.msk.f32.mxu1 %vm626_vm1, %v609_v16  ;;  %3830 = vmatprep.mubr.msk.f32.mxu0 %vm626_vm1, %v609_v16 }
 0x163   : > { %3820 = vmatmul.mubr.msk.f32.vlgmr.msra.gmra.mrb[2].mxu1 %vm626_vm1, %v3810_v15  ;;  %3831 = vmatmul.mubr.msk.f32.vlgmr.msra.gmra.mrb[0].mxu0 %vm626_vm1, %v3810_v15 }
 0x164   : > { %3892 = vmatprep.subr.bf16.mxu1 %v3891_v17  ;;  %3837 = vmatprep.mubr.msk.f32.mxu1 %vm924_vm2, %v916_v18 }
 0x165   : > { %3894 = vmatpush3.bf16.msra.mxu1 %v3891_v17 }
 0x168   : > { %3838 = vmatmul.mubr.msk.f32.vlgmr.msra.gmra.mrb[4].mxu1 %vm924_vm2, %v917_v19 }
 0x169   : > { %3840 = vmatprep.mubr.msk.f32.mxu1 %vm924_vm2, %v918_v20 }
 0x16c   : > { %3841 = vmatmul.mubr.msk.f32.gmra.mrb[6].mxu1 %vm924_vm2, %v919_v21 }
 0x16d   : > { %3843 = vmatprep.mubr.msk.f32.mxu1 %vm924_vm2, %v920_v22 }
 0x170   : > { %3844 = vmatmul.mubr.msk.f32.gmra.mrb[8].mxu1 %vm924_vm2, %v921_v23 }
 0x171   : > { %3846 = vmatprep.mubr.msk.f32.mxu1 %vm924_vm2, %v922_v24 }
 0x174   : > { %3847 = vmatmul.mubr.msk.f32.gmra.mrb[10].mxu1 %vm924_vm2, %v923_v25  ;;  %vm5116_vm2 = vmand %vm820_vm15, %vm821_vm0 }
 0x236   : > { %v3821_v28 = vpop.f32.mrb[2].mxu1  ;;  %v3832_v29 = vpop.f32.mrb[0].mxu0 }
 0x237   : > { %v711_v30 = vmul.f32 %v3821_v28, %v709_v26  ;;  %v699_v31 = vpop.f32.mrb[3].mxu1  ;;  %v788_v32 = vpop.f32.mrb[1].mxu0 }
 0x238   : > { %v710_v33 = vmul.f32 %v708_v27, %v699_v31 }
 0x239   : > { %v714_v34 = vsel %vm712_vm3, %v711_v30, 0.0 }
 0x23a   : > { %v713_v35 = vsel %vm712_vm3, %v710_v33, 0.0 }
 0x23b   : > { %v715_v36 = vadd.f32 %v714_v34, %v713_v35 }
 0x23d   : > { %v716_v37 = vrot.slane %v715_v36, 4 }
 0x23f   : > { %v717_v38 = vadd.f32 %v716_v37, %v715_v36 }
 0x241   : > { %v718_v39 = vrot.slane %v717_v38, 2 }
 0x243   : > { %v719_v41 = vadd.f32 %v718_v39, %v717_v38 }
 0x245   : > { %v720_v42 = vrot.slane %v719_v41, 1 }
 0x247   : > { %v721_v46 = vadd.f32 %v720_v42, %v719_v41 }
 0x249   : > { %v789_v47 = vadd.f32 %v788_v32, %v721_v46  ;;  %v794_v48 = vadd.f32 %v3832_v29, %v721_v46 }
 0x24b   : > { %vm797_vm8 = vcmp.ge.f32.partialorder %v789_v47, 0.0  ;;  %vm798_vm9 = vcmp.ge.f32.partialorder %v794_v48, 0.0  ;;  %v799_v49 = vmul.f32 0.2, %v789_v47  ;;  %v800_v50 = vmul.f32 0.2, %v794_v48 }
 0x24d   : > { %v801_v52 = vsel %vm797_vm8, %v789_v47, %v799_v49  ;;  %v802_v53 = vsel %vm798_vm9, %v794_v48, %v800_v50 }
 0x24e   : > { %v807_v54 = vsel %vm805_vm6, %v801_v52, -1e+30  ;;  %v808_v55 = vsel %vm806_vm7, %v802_v53, -1e+30  ;;  %v3839_v53 = vpop.f32.mrb[4].mxu1 }
 0x24f   : > { %v833_v56 = vsel %vm5083_vm10, %v807_v54, -1e+30  ;;  %v823_v57 = vsel %vm812_vm11, %v807_v54, -1e+30  ;;  %v834_v60 = vsel %vm5083_vm10, %v808_v55, -1e+30 }
 0x250   : > { %v835_v58 = vsel %vm712_vm3, %v833_v56, -inf  ;;  %v825_v59 = vsel %vm712_vm3, %v823_v57, -inf  ;;  %v824_v61 = vsel %vm812_vm11, %v808_v55, -1e+30  ;;  %v838_v63 = vsel %vm712_vm3, %v834_v60, -inf  ;;  %v1015_v56 = vpop.f32.mrb[5].mxu1 }
 0x251   : > { %836 = vmax.xlane.f32.xlu1 %v835_v58  ;;  %826 = vmax.xlane.f32.xlu0 %v825_v59  ;;  %v828_v0 = vsel %vm712_vm3, %v824_v61, -inf  ;;  %v844_v1 = vsel %vm5104_vm14, %v808_v55, -1e+30  ;;  %v843_v2 = vsel %vm5104_vm14, %v807_v54, -1e+30  ;;  %v1054_v57 = vld [vmem:[%s5834_s7] sm:$0xff] }
 0x252   : > { %v848_v4 = vsel %vm712_vm3, %v844_v1, -inf  ;;  %v845_v5 = vsel %vm712_vm3, %v843_v2, -inf  ;;  %v854_v6 = vsel %vm5116_vm2, %v808_v55, -1e+30  ;;  %v853_v7 = vsel %vm5116_vm2, %v807_v54, -1e+30 }
 0x253   : > { %v858_v8 = vsel %vm712_vm3, %v854_v6, -inf  ;;  %v855_v9 = vsel %vm712_vm3, %v853_v7, -inf  ;;  %v1057_v58 = vld [vmem:[%s5834_s7 + $0x18] sm:$0xff]  ;;  %v1062_v59 = vmul.f32 %v1054_v57, %v1015_v56  ;;  %v3842_v60 = vpop.f32.mrb[6].mxu1  ;;  %v1056_v1 = vld [vmem:[%s5834_s7 + $0x10] sm:$0xff]  ;;  %v1276_v57 = vld [vmem:[%s5836_s9 + $0x28] sm:$0xff] }
 0x255   : > { %839 = vmax.xlane.f32.xlu1 %v838_v63  ;;  %829 = vmax.xlane.f32.xlu0 %v828_v0  ;;  %v1065_v63 = vmul.f32 %v3842_v60, %v1057_v58  ;;  %v1025_v0 = vpop.f32.mrb[7].mxu1  ;;  %v1278_v58 = vld [vmem:[%s5836_s9 + $0x38] sm:$0xff] }
 0x256   : > { %v1064_v2 = vmul.f32 %v1056_v1, %v1025_v0  ;;  %v5278_v60 = vpack.c.bf16 %v1278_v58, %v1276_v57  ;;  %v1280_v1 = vld [vmem:[%s5836_s9 + $0x48] sm:$0xff] }
 0x258   : > { %v3899_v6 = vpack.c.bf16 %v1065_v63, %v1064_v2  ;;  %v1277_v63 = vld [vmem:[%s5836_s9 + $0x30] sm:$0xff]  ;;  %v1282_v2 = vld [vmem:[%s5836_s9 + $0x58] sm:$0xff] }
 0x259   : > { %849 = vmax.xlane.f32.xlu1 %v848_v4  ;;  %846 = vmax.xlane.f32.xlu0 %v845_v5  ;;  %v3845_v4 = vpop.f32.mrb[8].mxu1  ;;  %v1059_v5 = vld [vmem:[%s5834_s7 + $0x28] sm:$0xff] }
 0x25a   : > { %v1067_v7 = vmul.f32 %v3845_v4, %v1059_v5  ;;  %v5297_v4 = vpack.c.bf16 %v1282_v2, %v1280_v1  ;;  %v1279_v5 = vld [vmem:[%s5836_s9 + $0x40] sm:$0xff] }
 0x25d   : > { %859 = vmax.xlane.f32.xlu1 %v858_v8  ;;  %856 = vmax.xlane.f32.xlu0 %v855_v9  ;;  %v1035_v8 = vpop.f32.mrb[9].mxu1  ;;  %v1058_v9 = vld [vmem:[%s5834_s7 + $0x20] sm:$0xff] }
 0x2de   : > { %v837_v10 = vpop.xlane.xlu1 %836  ;;  %v827_v11 = vpop.xlane.xlu0 %826 }
 0x2df   : > { %v831_v14 = vsel %vm812_vm11, %v827_v11, 0.0  ;;  %v1060_v11 = vld [vmem:[%s5834_s7 + $0x30] sm:$0xff] }
 0x2e0   : > { %v841_v18 = vsel %vm5083_vm10, %v837_v10, %v831_v14  ;;  %v1061_v10 = vld [vmem:[%s5834_s7 + $0x38] sm:$0xff] }
 0x2e2   : > { %v840_v12 = vpop.xlane.xlu1 %839  ;;  %v830_v13 = vpop.xlane.xlu0 %829 }
 0x2e3   : > { %v832_v15 = vsel %vm812_vm11, %v830_v13, 0.0  ;;  %v3848_v13 = vpop.f32.mrb[10].mxu1 }
 0x2e4   : > { %v842_v19 = vsel %vm5083_vm10, %v840_v12, %v832_v15  ;;  %v1066_v12 = vmul.f32 %v1058_v9, %v1035_v8  ;;  %v1069_v14 = vmul.f32 %v3848_v13, %v1061_v10  ;;  %v1045_v15 = vpop.f32.mrb[11].mxu1  ;;  %v1284_v8 = vld [vmem:[%s5836_s9 + $0x68] sm:$0xff]  ;;  %v1286_v9 = vld [vmem:[%s5836_s9 + $0x78] sm:$0xff]  ;;  %v1283_v10 = vld [vmem:[%s5836_s9 + $0x60] sm:$0xff] }
 0x2e6   : > { %v850_v16 = vpop.xlane.xlu1 %849  ;;  %v847_v17 = vpop.xlane.xlu0 %846 }
 0x2e7   : > { %v852_v20 = vsel %vm5104_vm14, %v850_v16, %v842_v19  ;;  %v851_v21 = vsel %vm5104_vm14, %v847_v17, %v841_v18  ;;  %v3903_v16 = vpack.c.bf16 %v1067_v7, %v1066_v12  ;;  %v1068_v17 = vmul.f32 %v1060_v11, %v1045_v15  ;;  %v1158_v19 = vld [vmem:[%s5835_s8 + $0x8] sm:$0xff]  ;;  %v1285_v12 = vld [vmem:[%s5836_s9 + $0x70] sm:$0xff] }
 0x2e8   : > { %v5317_v11 = vpack.c.bf16 %v1286_v9, %v1284_v8  ;;  %v5323_v13 = vpack.c.bf16 %v1285_v12, %v1283_v10 }
 0x2e9   : > { %v3907_v18 = vpack.c.bf16 %v1069_v14, %v1068_v17  ;;  %v5339_v14 = vshrl.u32 %v809_v40, 7 }
 0x2ea   : > { %v860_v22 = vpop.xlane.xlu1 %859  ;;  %v857_v23 = vpop.xlane.xlu0 %856 }
 0x2eb   : > { %v862_v24 = vsel %vm5116_vm2, %v860_v22, %v852_v20  ;;  %v861_v25 = vsel %vm5116_vm2, %v857_v23, %v851_v21  ;;  %v1160_v20 = vld [vmem:[%s5835_s8 + $0x18] sm:$0xff]  ;;  %v1157_v21 = vld [vmem:[%s5835_s8] sm:$0xff]  ;;  %v1159_v23 = vld [vmem:[%s5835_s8 + $0x10] sm:$0xff]  ;;  %v5342_v15 = vsub.s32 1, %v5339_v14 }
 0x2ec   : > { %v864_v26 = vsub.f32 %v808_v55, %v862_v24  ;;  %v863_v27 = vsub.f32 %v807_v54, %v861_v25  ;;  %v1055_v54 = vld [vmem:[%s5834_s7 + $0x8] sm:$0xff]  ;;  %v3911_v22 = vpack.c.bf16 %v1160_v20, %v1158_v19  ;;  %v1164_v25 = vld [vmem:[%s5835_s8 + $0x38] sm:$0xff] }
 0x2ed   : > { %v1063_v55 = vmul.f32 %v3839_v53, %v1055_v54  ;;  %v1162_v24 = vld [vmem:[%s5835_s8 + $0x28] sm:$0xff] }
 0x2ee   : > { %v867_v28 = vmul.f32 1.442695, %v864_v26  ;;  %v865_v29 = vmul.f32 1.442695, %v863_v27  ;;  %v3913_v26 = vpack.c.bf16 %v1159_v23, %v1157_v21  ;;  %v3915_v27 = vpack.c.bf16 %v1164_v25, %v1162_v24  ;;  %3912 = vmatprep.subr.bf16.mxu1 %v3911_v22 }
 0x2ef   : > { %v3895_v61 = vpack.c.bf16 %v1063_v55, %v1062_v59  ;;  %v5258_v55 = vpack.c.bf16 %v1274_v3, %v1272_v62  ;;  %v4763_v59 = vmov 0.0   ;;  %v5361_v25 = vsub.s32 0, %v5339_v14 }
 0x2f0   : > { %4296 = vpow2.f32 %v867_v28  ;;  %v1161_v28 = vld [vmem:[%s5835_s8 + $0x20] sm:$0xff]  ;;  %3914 = vmatpush1.bf16.msra.mxu1 %v3913_v26  ;;  %1254 = vmatprep.mubr.f32.mxu1 %v4763_v59  ;;  %v1172_v26 = vsub.s32 4, %v5339_v14 }
 0x2f1   : > { %4298 = vpow2.f32 %v865_v29  ;;  %3896 = vmatprep.subr.bf16.mxu0 %v3895_v61  ;;  %v1163_v29 = vld [vmem:[%s5835_s8 + $0x30] sm:$0xff]  ;;  %3916 = vmatprep.subr.bf16.mxu1 %v3915_v27 }
 0x2f2   : > { %3898 = vmatpush3.bf16.msra.mxu0 %v3895_v61  ;;  %v1275_v61 = vld [vmem:[%s5836_s9 + $0x20] sm:$0xff] }
 0x2f3   : > { %3900 = vmatprep.subr.bf16.mxu0 %v3899_v6  ;;  %v5287_v0 = vpack.c.bf16 %v1277_v63, %v1275_v61 }
 0x2f6   : > { %3902 = vmatpush3.bf16.msra.mxu0 %v3899_v6  ;;  %v1281_v6 = vld [vmem:[%s5836_s9 + $0x50] sm:$0xff] }
 0x2f7   : > { %3904 = vmatprep.subr.bf16.mxu0 %v3903_v16  ;;  %v5306_v7 = vpack.c.bf16 %v1281_v6, %v1279_v5 }
 0x2fa   : > { %v4297_v30 = vpop.eup %4296  ;;  %3906 = vmatpush3.bf16.msra.mxu0 %v3903_v16  ;;  %v915_v16 = vld [vmem:[%s5837_s10] sm:$0xff] }
 0x2fb   : > { %v4299_v31 = vpop.eup %4298  ;;  %v5146_v32 = vsel %vm806_vm7, %v4297_v30, 0.0  ;;  %3908 = vmatprep.subr.bf16.mxu0 %v3907_v18  ;;  %v3917_v30 = vpack.c.bf16 %v1163_v29, %v1161_v28  ;;  %v1073_v17 = vrot.slane %v915_v16, %v5342_v15  ;;  %v5365_v27 = vrot.slane %v915_v16, %v5361_v25 }
 0x2fc   : > { %v872_v33 = vsel %vm812_vm11, %v5146_v32, 0.0  ;;  %v5153_v34 = vsel %vm805_vm6, %v4299_v31, 0.0  ;;  %v882_v38 = vsel %vm5083_vm10, %v5146_v32, 0.0  ;;  %v892_v44 = vsel %vm5104_vm14, %v5146_v32, 0.0 }
 0x2fd   : > { %v876_v35 = vsel %vm712_vm3, %v872_v33, 0.0  ;;  %v871_v36 = vsel %vm812_vm11, %v5153_v34, 0.0  ;;  %v881_v39 = vsel %vm5083_vm10, %v5153_v34, 0.0  ;;  %v886_v41 = vsel %vm712_vm3, %v882_v38, 0.0  ;;  %3918 = vmatpush1.bf16.msra.mxu1 %v3917_v30 }
 0x2fe   : > { %877 = vadd.xlane.f32.xlu1 %v876_v35  ;;  %v873_v37 = vsel %vm712_vm3, %v871_v36, 0.0  ;;  %v883_v42 = vsel %vm712_vm3, %v881_v39, 0.0  ;;  %v891_v45 = vsel %vm5104_vm14, %v5153_v34, 0.0  ;;  %v896_v46 = vsel %vm712_vm3, %v892_v44, 0.0  ;;  %3910 = vmatpush3.bf16.msra.mxu0 %v3907_v18 }
 0x2ff   : > { %874 = vadd.xlane.f32.xlu0 %v873_v37  ;;  %v893_v47 = vsel %vm712_vm3, %v891_v45, 0.0  ;;  %v902_v48 = vsel %vm5116_vm2, %v5146_v32, 0.0  ;;  %v901_v49 = vsel %vm5116_vm2, %v5153_v34, 0.0  ;;  %3920 = vmatprep.subr.bf16.mxu0 %v5258_v55  ;;  %v5367_v28 = vrot.slane %v915_v16, %v1172_v26 }
 0x300   : > { %v906_v50 = vsel %vm712_vm3, %v902_v48, 0.0  ;;  %v903_v52 = vsel %vm712_vm3, %v901_v49, 0.0  ;;  %3936 = vmatprep.subr.bf16.mxu1 %v5258_v55  ;;  %v1179_v29 = vrot.slane %v5365_v27, %v5361_v25 }
 0x301   : > { %v1183_v30 = vrot.slane %v5367_v28, %v5361_v25 }
 0x302   : > { %887 = vadd.xlane.f32.xlu1 %v886_v41 }
 0x303   : > { %884 = vadd.xlane.f32.xlu0 %v883_v42 }
 0x306   : > { %897 = vadd.xlane.f32.xlu1 %v896_v46 }
 0x307   : > { %894 = vadd.xlane.f32.xlu0 %v893_v47 }
 0x30a   : > { %907 = vadd.xlane.f32.xlu1 %v906_v50 }
 0x30b   : > { %904 = vadd.xlane.f32.xlu0 %v903_v52 }
 0x38b   : > { %v878_v31 = vpop.xlane.xlu1 %877 }
 0x38c   : > { %v875_v33 = vpop.xlane.xlu0 %874  ;;  %v880_v39 = vsel %vm812_vm11, %v878_v31, 0.0 }
 0x38d   : > { %v879_v41 = vsel %vm812_vm11, %v875_v33, 0.0 }
 0x38f   : > { %v888_v35 = vpop.xlane.xlu1 %887 }
 0x390   : > { %v885_v36 = vpop.xlane.xlu0 %884  ;;  %v890_v42 = vsel %vm5083_vm10, %v888_v35, %v880_v39 }
 0x391   : > { %v889_v44 = vsel %vm5083_vm10, %v885_v36, %v879_v41 }
 0x393   : > { %v898_v37 = vpop.xlane.xlu1 %897 }
 0x394   : > { %v895_v38 = vpop.xlane.xlu0 %894  ;;  %v900_v45 = vsel %vm5104_vm14, %v898_v37, %v890_v42 }
 0x395   : > { %v899_v47 = vsel %vm5104_vm14, %v895_v38, %v889_v44 }
 0x397   : > { %v908_v46 = vpop.xlane.xlu1 %907 }
 0x398   : > { %v910_v48 = vsel %vm5116_vm2, %v908_v46, %v900_v45  ;;  %v905_v49 = vpop.xlane.xlu0 %904 }
 0x399   : > { %4300 = vrcp.f32 %v910_v48  ;;  %v909_v50 = vsel %vm5116_vm2, %v905_v49, %v899_v47  ;;  %v3705_v49 = vsel %vm815_vm5, 1.0, %v4763_v59  ;;  %vm4193_vm5 = vmpackc.low %vm626_vm1, %vm626_vm1 }
 0x39a   : > { %4302 = vrcp.f32 %v909_v50 }
 0x3a3   : > { %v4301_v52 = vpop.eup %4300 }
 0x3a4   : > { %v4303_v53 = vpop.eup %4302  ;;  %v914_v51 = vmul.f32 %v4301_v52, %v5146_v32  ;;  %v1271_v32 = vld [vmem:[%s5836_s9] sm:$0xff] }
 0x3a5   : > { %v912_v54 = vmul.f32 %v4303_v53, %v5153_v34  ;;  %v1273_v34 = vld [vmem:[%s5836_s9 + $0x10] sm:$0xff] }
 0x3a6   : > { %v5266_v56 = vpack.c.bf16 %v1273_v34, %v1271_v32 }
 0x3a7   : > { %3865 = vmatprep.mubr.msk.f32.mxu0 %vm712_vm3, %v912_v54 }
 0x3a8   : > { %3866 = vmatmul.mubr.msk.f32.vlgmr.msra.gmra.mrb[2].mxu0 %vm712_vm3, %v914_v51 }
 0x3a9   : > { %3922 = vmatpush1.bf16.msra.mxu0 %v5266_v56  ;;  %1368 = vmatprep.mubr.f32.mxu0 %v4763_v59 }
 0x3aa   : > { %3924 = vmatprep.subr.bf16.mxu0 %v5278_v60 }
 0x3ad   : > { %3926 = vmatpush1.bf16.msra.mxu0 %v5287_v0 }
 0x3ae   : > { %3928 = vmatprep.subr.bf16.mxu0 %v5297_v4 }
 0x3b1   : > { %3930 = vmatpush1.bf16.msra.mxu0 %v5306_v7 }
 0x3b2   : > { %3932 = vmatprep.subr.bf16.mxu0 %v5317_v11 }
 0x3b5   : > { %3934 = vmatpush1.bf16.msra.mxu0 %v5323_v13 }
 0x3b6   : > { %3952 = vmatprep.subr.bf16.mxu0 %v5258_v55 }
 0x3b8   : > { %1369 = vmatmul.mubr.f32.vlgmr.msra.gmra.mrb[4].mxu0 %v4763_v59 }
 0x3b9   : > { %3954 = vmatpush1.bf16.msra.mxu0 %v5266_v56  ;;  %1613 = vmatprep.mubr.f32.mxu0 %v4763_v59 }
 0x3ba   : > { %3956 = vmatprep.subr.bf16.mxu0 %v5278_v60 }
 0x3bd   : > { %3958 = vmatpush1.bf16.msra.mxu0 %v5287_v0 }
 0x3be   : > { %3960 = vmatprep.subr.bf16.mxu0 %v5297_v4 }
 0x3c1   : > { %3962 = vmatpush1.bf16.msra.mxu0 %v5306_v7 }
 0x3c2   : > { %3964 = vmatprep.subr.bf16.mxu0 %v5317_v11 }
 0x3c5   : > { %3966 = vmatpush1.bf16.msra.mxu0 %v5323_v13 }
 0x3c6   : > { %3984 = vmatprep.subr.bf16.mxu0 %v5258_v55 }
 0x47b   : > { %v3867_v18 = vpop.f32.mrb[2].mxu0 }
 0x47c   : > { %v1146_v19 = vpop.f32.mrb[3].mxu0  ;;  %v1152_v21 = vadd.f32 %v3867_v18, %v1073_v17 }
 0x47d   : > { %v1147_v20 = vadd.f32 %v1146_v19, %v1073_v17 }
 0x47e   : > { %v1156_v40 = vmax.f32 %v1152_v21, 0.0 }
 0x47f   : > { %v1155_v22 = vmax.f32 %v1147_v20, 0.0 }
 0x481   : > { %3703 = vmatmul.mubr.msk.f32.vlgmr.msra.gmra.mrb[12].mxu1 %vm626_vm1, %v1155_v22 }
 0x482   : > { %1260 = vmatprep.mubr.f32.mxu1 %v4763_v59  ;;  %3938 = vmatpush1.bf16.msra.mxu1 %v5266_v56 }
 0x483   : > { %3940 = vmatprep.subr.bf16.mxu1 %v5278_v60 }
 0x485   : > { %3704 = vmatmul.mubr.msk.f32.gmra.mrb[14].mxu1 %vm626_vm1, %v1156_v40 }
 0x486   : > { %3942 = vmatpush1.bf16.msra.mxu1 %v5287_v0  ;;  %1491 = vmatprep.mubr.f32.mxu1 %v4763_v59 }
 0x487   : > { %3944 = vmatprep.subr.bf16.mxu1 %v5297_v4 }
 0x48a   : > { %3946 = vmatpush1.bf16.msra.mxu1 %v5306_v7 }
 0x48b   : > { %3948 = vmatprep.subr.bf16.mxu1 %v5317_v11  ;;  %v1370_v23 = vpop.f32.mrb[4].mxu0 }
 0x48c   : > { %v1372_v24 = vpop.f32.mrb[5].mxu0 }
 0x48e   : > { %3950 = vmatpush1.bf16.msra.mxu1 %v5323_v13 }
 0x48f   : > { %3968 = vmatprep.subr.bf16.mxu1 %v5258_v55 }
 0x554   : > { %v1256_v31 = vpop.f32.mrb[12].mxu1 }
 0x555   : > { %v1257_v33 = vadd.f32 %v1256_v31, %v1179_v29  ;;  %v1258_v35 = vpop.f32.mrb[13].mxu1 }
 0x556   : > { %v1259_v36 = vadd.f32 %v1258_v35, %v1183_v30 }
 0x557   : > { %1267 = vst [vmem:[#allocation2] sm:$0xff] %v1257_v33 }
 0x558   : > { %1268 = vst [vmem:[#allocation2 + $0x8] sm:$0xff] %v1259_v36  ;;  %v1262_v37 = vpop.f32.mrb[14].mxu1 }
 0x559   : > { %v1263_v38 = vadd.f32 %v1262_v37, %v1179_v29  ;;  %v1264_v39 = vpop.f32.mrb[15].mxu1 }
 0x55a   : > { %v1265_v41 = vadd.f32 %v1264_v39, %v1183_v30 }
 0x55b   : > { %1269 = vst [vmem:[#allocation2 + $0x10] sm:$0xff] %v1263_v38 }
 0x55c   : > { %1270 = vst [vmem:[#allocation2 + $0x18] sm:$0xff] %v1265_v41 }
 0x55f   : > { %v1289_v42 = vld [vmem:[#allocation2] ss:$8 sm:$0x3]  ;;  %v1412_v6 = vld [vmem:[#allocation2 + $0x1] ss:$8 sm:$0x3] }
 0x560   : > { %v1294_v44 = vrot.slane %v1289_v42, %v5361_v25  ;;  %v1298_v45 = vrot.slane %v1289_v42, %v5342_v15  ;;  %v1417_v8 = vrot.slane %v1412_v6, %v5361_v25  ;;  %v1421_v10 = vrot.slane %v1412_v6, %v5342_v15  ;;  %v1535_v42 = vld [vmem:[#allocation2 + $0x2] ss:$8 sm:$0x3]  ;;  %v1656_v6 = vld [vmem:[#allocation2 + $0x3] ss:$8 sm:$0x3] }
 0x562   : > { %v1371_v46 = vadd.f32 %v1370_v23, %v1294_v44  ;;  %v1373_v47 = vadd.f32 %v1372_v24, %v1298_v45  ;;  %v1540_v44 = vrot.slane %v1535_v42, %v5361_v25 }
 0x564   : > { %4304 = vtanh.f32 %v1373_v47  ;;  %v3706_v50 = vmul.f32 -1.442695, %v1371_v46  ;;  %v3707_v43 = vmul.f32 -1.442695, %v1373_v47  ;;  %v1544_v46 = vrot.slane %v1535_v42, %v5342_v15 }
 0x566   : > { %4306 = vpow2.f32 %v3706_v50 }
 0x56e   : > { %v4305_v48 = vpop.eup %4304 }
 0x56f   : > { %1390 = vrot.lane.b32.xlu0 %v4305_v48, %s4764_s28 }
 0x570   : > { %v4307_v52 = vpop.eup %4306 }
 0x571   : > { %v1381_v53 = vadd.f32 1.0, %v4307_v52 }
 0x573   : > { %1406 = vrot.lane.b32.xlu0 %v3705_v49, %s4764_s28  ;;  %4308 = vrcp.f32 %v1381_v53 }
 0x57d   : > { %v4309_v51 = vpop.eup %4308 }
 0x57e   : > { %v1388_v3 = vmul.f32 0.0, %v4309_v51 }
 0x5e1   : > { %v1391_v54 = vpop.permute.xlu0 %1390 }
 0x5e2   : > { %v1393_v62 = vmul.f32 %v4309_v51, %v1391_v54 }
 0x5e4   : > { %1395 = vrot.lane.b32.xlu1 %v1393_v62, %s4764_s28 }
 0x5e5   : > { %v1407_v24 = vpop.permute.xlu0 %1406 }
 0x656   : > { %v1396_v32 = vpop.permute.xlu1 %1395 }
 0x657   : > { %v1398_v34 = vadd.f32 %v1396_v32, %v1388_v3 }
 0x659   : > { %4310 = vtanh.f32 %v1398_v34  ;;  %v1409_v26 = vmul.f32 %v1407_v24, %v1398_v34 }
 0x65a   : > { %4312 = vpow2.f32 %v3707_v43 }
 0x663   : > { %v4311_v57 = vpop.eup %4310 }
 0x664   : > { %1401 = vrot.lane.b32.xlu1 %v4311_v57, %s4764_s28  ;;  %v4313_v58 = vpop.eup %4312 }
 0x665   : > { %v1382_v61 = vadd.f32 1.0, %v4313_v58 }
 0x667   : > { %4314 = vrcp.f32 %v1382_v61 }
 0x671   : > { %v4315_v63 = vpop.eup %4314 }
 0x6d6   : > { %v1402_v1 = vpop.permute.xlu1 %1401 }
 0x6d7   : > { %v1404_v2 = vmul.f32 %v4315_v63, %v1402_v1 }
 0x6d9   : > { %v1410_v5 = vmul.f32 %v3705_v49, %v1404_v2 }
 0x6db   : > { %3708 = vmatmul.mubr.msk.f32.vlgmr.msra.gmra.mrb[16].mxu1 %vm712_vm3, %v1410_v5 }
 0x6dc   : > { %3970 = vmatpush1.bf16.msra.mxu1 %v5266_v56  ;;  %1734 = vmatprep.mubr.f32.mxu1 %v4763_v59 }
 0x6dd   : > { %3972 = vmatprep.subr.bf16.mxu1 %v5278_v60 }
 0x6e0   : > { %3974 = vmatpush1.bf16.msra.mxu1 %v5287_v0 }
 0x6e1   : > { %3976 = vmatprep.subr.bf16.mxu1 %v5297_v4 }
 0x6e4   : > { %3978 = vmatpush1.bf16.msra.mxu1 %v5306_v7 }
 0x6e5   : > { %3980 = vmatprep.subr.bf16.mxu1 %v5317_v11 }
 0x6e8   : > { %3982 = vmatpush1.bf16.msra.mxu1 %v5323_v13 }
 0x6e9   : > { %4000 = vmatprep.subr.bf16.mxu1 %v5258_v55 }
 0x7ae   : > { %v1493_v9 = vpop.f32.mrb[16].mxu1 }
 0x7af   : > { %v1494_v12 = vadd.f32 %v1493_v9, %v1417_v8  ;;  %v1495_v16 = vpop.f32.mrb[17].mxu1  ;;  %v1661_v8 = vrot.slane %v1656_v6, %v5361_v25 }
 0x7b0   : > { %v1496_v17 = vadd.f32 %v1495_v16, %v1421_v10  ;;  %v1665_v10 = vrot.slane %v1656_v6, %v5342_v15  ;;  %v1898_v6 = vld [vmem:[#allocation2 + $0x5] ss:$8 sm:$0x3] }
 0x7b1   : > { %v3709_v19 = vmul.f32 -1.442695, %v1494_v12 }
 0x7b2   : > { %4316 = vtanh.f32 %v1496_v17  ;;  %v3710_v35 = vmul.f32 -1.442695, %v1496_v17 }
 0x7b3   : > { %4318 = vpow2.f32 %v3709_v19 }
 0x7bc   : > { %v4317_v18 = vpop.eup %4316 }
 0x7bd   : > { %1513 = vrot.lane.b32.xlu1 %v4317_v18, %s4764_s28  ;;  %v4319_v20 = vpop.eup %4318 }
 0x7be   : > { %v1504_v21 = vadd.f32 1.0, %v4319_v20 }
 0x7c0   : > { %4320 = vrcp.f32 %v1504_v21 }
 0x7ca   : > { %v4321_v22 = vpop.eup %4320 }
 0x7cb   : > { %v1511_v29 = vmul.f32 %v4321_v22, %v1409_v26 }
 0x82f   : > { %v1514_v40 = vpop.permute.xlu1 %1513 }
 0x830   : > { %v1516_v23 = vmul.f32 %v4321_v22, %v1514_v40 }
 0x832   : > { %1518 = vrot.lane.b32.xlu1 %v1516_v23, %s4764_s28 }
 0x8a4   : > { %v1519_v30 = vpop.permute.xlu1 %1518 }
 0x8a5   : > { %v1521_v31 = vadd.f32 %v1519_v30, %v1511_v29 }
 0x8a7   : > { %4322 = vtanh.f32 %v1521_v31 }
 0x8a8   : > { %4324 = vpow2.f32 %v3710_v35 }
 0x8b1   : > { %v4323_v33 = vpop.eup %4322 }
 0x8b2   : > { %1524 = vrot.lane.b32.xlu0 %v4323_v33, %s4764_s28  ;;  %v4325_v36 = vpop.eup %4324 }
 0x8b3   : > { %v1505_v37 = vadd.f32 1.0, %v4325_v36 }
 0x8b5   : > { %4326 = vrcp.f32 %v1505_v37 }
 0x8bf   : > { %v4327_v38 = vpop.eup %4326 }
 0x924   : > { %v1525_v39 = vpop.permute.xlu0 %1524 }
 0x925   : > { %v5397_v41 = vmul.f32 %v4327_v38, %v1525_v39  ;;  %v1777_v39 = vld [vmem:[#allocation2 + $0x4] ss:$8 sm:$0x3] }
 0x926   : > { %v1782_v42 = vrot.slane %v1777_v39, %v5361_v25 }
 0x927   : > { %3711 = vmatmul.mubr.msk.f32.vlgmr.msra.gmra.mrb[6].mxu0 %vm712_vm3, %v5397_v41 }
 0x928   : > { %3986 = vmatpush1.bf16.msra.mxu0 %v5266_v56  ;;  %1855 = vmatprep.mubr.f32.mxu0 %v4763_v59 }
 0x929   : > { %3988 = vmatprep.subr.bf16.mxu0 %v5278_v60 }
 0x92c   : > { %3990 = vmatpush1.bf16.msra.mxu0 %v5287_v0 }
 0x92d   : > { %3992 = vmatprep.subr.bf16.mxu0 %v5297_v4 }
 0x930   : > { %3994 = vmatpush1.bf16.msra.mxu0 %v5306_v7 }
 0x931   : > { %3996 = vmatprep.subr.bf16.mxu0 %v5317_v11 }
 0x934   : > { %3998 = vmatpush1.bf16.msra.mxu0 %v5323_v13 }
 0x935   : > { %4016 = vmatprep.subr.bf16.mxu0 %v5258_v55 }
 0x9fa   : > { %v1615_v45 = vpop.f32.mrb[6].mxu0 }
 0x9fb   : > { %v1616_v47 = vadd.f32 %v1615_v45, %v1540_v44  ;;  %v1617_v48 = vpop.f32.mrb[7].mxu0  ;;  %v1786_v45 = vrot.slane %v1777_v39, %v5342_v15 }
 0x9fc   : > { %v1618_v49 = vadd.f32 %v1617_v48, %v1544_v46 }
 0x9fd   : > { %v3712_v52 = vmul.f32 -1.442695, %v1616_v47 }
 0x9fe   : > { %4328 = vtanh.f32 %v1618_v49  ;;  %v3713_v58 = vmul.f32 -1.442695, %v1618_v49 }
 0x9ff   : > { %4330 = vpow2.f32 %v3712_v52 }
 0xa08   : > { %v4329_v50 = vpop.eup %4328 }
 0xa09   : > { %1635 = vrot.lane.b32.xlu1 %v4329_v50, %s4764_s28  ;;  %v4331_v53 = vpop.eup %4330 }
 0xa0a   : > { %v1626_v51 = vadd.f32 1.0, %v4331_v53 }
 0xa0c   : > { %4332 = vrcp.f32 %v1626_v51 }
 0xa16   : > { %v4333_v54 = vpop.eup %4332 }
 0xa17   : > { %v1633_v32 = vmul.f32 %v4333_v54, %v1521_v31 }
 0xa7b   : > { %v1636_v62 = vpop.permute.xlu1 %1635 }
 0xa7c   : > { %v1638_v3 = vmul.f32 %v4333_v54, %v1636_v62 }
 0xa7e   : > { %1640 = vrot.lane.b32.xlu0 %v1638_v3, %s4764_s28 }
 0xaf0   : > { %v1641_v34 = vpop.permute.xlu0 %1640 }
 0xaf1   : > { %v1643_v57 = vadd.f32 %v1641_v34, %v1633_v32 }
 0xaf3   : > { %4334 = vtanh.f32 %v1643_v57 }
 0xaf4   : > { %4336 = vpow2.f32 %v3713_v58 }
 0xafd   : > { %v4335_v43 = vpop.eup %4334 }
 0xafe   : > { %1646 = vrot.lane.b32.xlu1 %v4335_v43, %s4764_s28  ;;  %v4337_v61 = vpop.eup %4336 }
 0xaff   : > { %v1627_v63 = vadd.f32 1.0, %v4337_v61 }
 0xb01   : > { %4338 = vrcp.f32 %v1627_v63 }
 0xb0b   : > { %v4339_v1 = vpop.eup %4338 }
 0xb70   : > { %v1647_v2 = vpop.permute.xlu1 %1646 }
 0xb71   : > { %v5415_v5 = vmul.f32 %v4339_v1, %v1647_v2 }
 0xb73   : > { %3714 = vmatmul.mubr.msk.f32.vlgmr.msra.gmra.mrb[18].mxu1 %vm712_vm3, %v5415_v5 }
 0xb74   : > { %4002 = vmatpush1.bf16.msra.mxu1 %v5266_v56  ;;  %1976 = vmatprep.mubr.f32.mxu1 %v4763_v59 }
 0xb75   : > { %4004 = vmatprep.subr.bf16.mxu1 %v5278_v60 }
 0xb78   : > { %4006 = vmatpush1.bf16.msra.mxu1 %v5287_v0 }
 0xb79   : > { %4008 = vmatprep.subr.bf16.mxu1 %v5297_v4 }
 0xb7c   : > { %4010 = vmatpush1.bf16.msra.mxu1 %v5306_v7 }
 0xb7d   : > { %4012 = vmatprep.subr.bf16.mxu1 %v5317_v11 }
 0xb80   : > { %4014 = vmatpush1.bf16.msra.mxu1 %v5323_v13 }
 0xb81   : > { %4032 = vmatprep.subr.bf16.mxu1 %v5258_v55 }
 0xc46   : > { %v1736_v9 = vpop.f32.mrb[18].mxu1 }
 0xc47   : > { %v1737_v12 = vadd.f32 %v1736_v9, %v1661_v8  ;;  %v1738_v16 = vpop.f32.mrb[19].mxu1  ;;  %v1903_v8 = vrot.slane %v1898_v6, %v5361_v25 }
 0xc48   : > { %v1739_v17 = vadd.f32 %v1738_v16, %v1665_v10  ;;  %v1907_v10 = vrot.slane %v1898_v6, %v5342_v15 }
 0xc49   : > { %v3715_v19 = vmul.f32 -1.442695, %v1737_v12 }
 0xc4a   : > { %4340 = vtanh.f32 %v1739_v17  ;;  %v3716_v31 = vmul.f32 -1.442695, %v1739_v17 }
 0xc4b   : > { %4342 = vpow2.f32 %v3715_v19 }
 0xc54   : > { %v4341_v18 = vpop.eup %4340 }
 0xc55   : > { %1756 = vrot.lane.b32.xlu0 %v4341_v18, %s4764_s28  ;;  %v4343_v20 = vpop.eup %4342 }
 0xc56   : > { %v1747_v21 = vadd.f32 1.0, %v4343_v20 }
 0xc58   : > { %4344 = vrcp.f32 %v1747_v21 }
 0xc62   : > { %v4345_v22 = vpop.eup %4344 }
 0xc63   : > { %v1754_v24 = vmul.f32 %v4345_v22, %v1643_v57 }
 0xcc7   : > { %v1757_v40 = vpop.permute.xlu0 %1756 }
 0xcc8   : > { %v1759_v23 = vmul.f32 %v4345_v22, %v1757_v40 }
 0xcca   : > { %1761 = vrot.lane.b32.xlu1 %v1759_v23, %s4764_s28 }
 0xd3c   : > { %v1762_v26 = vpop.permute.xlu1 %1761 }
 0xd3d   : > { %v1764_v29 = vadd.f32 %v1762_v26, %v1754_v24 }
 0xd3f   : > { %4346 = vtanh.f32 %v1764_v29 }
 0xd40   : > { %4348 = vpow2.f32 %v3716_v31 }
 0xd49   : > { %v4347_v30 = vpop.eup %4346 }
 0xd4a   : > { %1767 = vrot.lane.b32.xlu0 %v4347_v30, %s4764_s28  ;;  %v4349_v33 = vpop.eup %4348 }
 0xd4b   : > { %v1748_v35 = vadd.f32 1.0, %v4349_v33 }
 0xd4d   : > { %4350 = vrcp.f32 %v1748_v35 }
 0xd57   : > { %v4351_v36 = vpop.eup %4350 }
 0xdbc   : > { %v1768_v37 = vpop.permute.xlu0 %1767 }
 0xdbd   : > { %v5433_v38 = vmul.f32 %v4351_v36, %v1768_v37 }
 0xdbf   : > { %3717 = vmatmul.mubr.msk.f32.vlgmr.msra.gmra.mrb[8].mxu0 %vm712_vm3, %v5433_v38 }
 0xdc0   : > { %4018 = vmatpush1.bf16.msra.mxu0 %v5266_v56  ;;  %2097 = vmatprep.mubr.f32.mxu0 %v4763_v59 }
 0xdc1   : > { %4020 = vmatprep.subr.bf16.mxu0 %v5278_v60 }
 0xdc4   : > { %4022 = vmatpush1.bf16.msra.mxu0 %v5287_v0 }
 0xdc5   : > { %4024 = vmatprep.subr.bf16.mxu0 %v5297_v4 }
 0xdc8   : > { %4026 = vmatpush1.bf16.msra.mxu0 %v5306_v7 }
 0xdc9   : > { %4028 = vmatprep.subr.bf16.mxu0 %v5317_v11 }
 0xdcc   : > { %4030 = vmatpush1.bf16.msra.mxu0 %v5323_v13 }
 0xdcd   : > { %4048 = vmatprep.subr.bf16.mxu0 %v5258_v55 }
 0xe92   : > { %v1857_v44 = vpop.f32.mrb[8].mxu0 }
 0xe93   : > { %v1858_v46 = vadd.f32 %v1857_v44, %v1782_v42  ;;  %v1859_v47 = vpop.f32.mrb[9].mxu0  ;;  %v2019_v42 = vld [vmem:[#allocation2 + $0x6] ss:$8 sm:$0x3] }
 0xe94   : > { %v1860_v48 = vadd.f32 %v1859_v47, %v1786_v45  ;;  %v2024_v44 = vrot.slane %v2019_v42, %v5361_v25 }
 0xe95   : > { %v3718_v50 = vmul.f32 -1.442695, %v1858_v46  ;;  %v2028_v46 = vrot.slane %v2019_v42, %v5342_v15 }
 0xe96   : > { %4352 = vtanh.f32 %v1860_v48  ;;  %v3719_v43 = vmul.f32 -1.442695, %v1860_v48 }
 0xe97   : > { %4354 = vpow2.f32 %v3718_v50 }
 0xea0   : > { %v4353_v49 = vpop.eup %4352 }
 0xea1   : > { %1877 = vrot.lane.b32.xlu1 %v4353_v49, %s4764_s28  ;;  %v4355_v52 = vpop.eup %4354 }
 0xea2   : > { %v1868_v53 = vadd.f32 1.0, %v4355_v52 }
 0xea4   : > { %4356 = vrcp.f32 %v1868_v53 }
 0xeae   : > { %v4357_v51 = vpop.eup %4356 }
 0xeaf   : > { %v1875_v3 = vmul.f32 %v4357_v51, %v1764_v29 }
 0xf13   : > { %v1878_v54 = vpop.permute.xlu1 %1877 }
 0xf14   : > { %v1880_v62 = vmul.f32 %v4357_v51, %v1878_v54 }
 0xf16   : > { %1882 = vrot.lane.b32.xlu0 %v1880_v62, %s4764_s28 }
 0xf88   : > { %v1883_v32 = vpop.permute.xlu0 %1882 }
 0xf89   : > { %v1885_v34 = vadd.f32 %v1883_v32, %v1875_v3 }
 0xf8b   : > { %4358 = vtanh.f32 %v1885_v34 }
 0xf8c   : > { %4360 = vpow2.f32 %v3719_v43 }
 0xf95   : > { %v4359_v57 = vpop.eup %4358 }
 0xf96   : > { %1888 = vrot.lane.b32.xlu1 %v4359_v57, %s4764_s28  ;;  %v4361_v58 = vpop.eup %4360 }
 0xf97   : > { %v1869_v61 = vadd.f32 1.0, %v4361_v58 }
 0xf99   : > { %4362 = vrcp.f32 %v1869_v61 }
 0xfa3   : > { %v4363_v63 = vpop.eup %4362 }
0x1008   : > { %v1889_v1 = vpop.permute.xlu1 %1888 }
0x1009   : > { %v5451_v2 = vmul.f32 %v4363_v63, %v1889_v1 }
0x100b   : > { %3720 = vmatmul.mubr.msk.f32.vlgmr.msra.gmra.mrb[20].mxu1 %vm712_vm3, %v5451_v2 }
0x100c   : > { %4034 = vmatpush1.bf16.msra.mxu1 %v5266_v56  ;;  %2218 = vmatprep.mubr.f32.mxu1 %v4763_v59 }
0x100d   : > { %4036 = vmatprep.subr.bf16.mxu1 %v5278_v60 }
0x1010   : > { %4038 = vmatpush1.bf16.msra.mxu1 %v5287_v0 }
0x1011   : > { %4040 = vmatprep.subr.bf16.mxu1 %v5297_v4 }
0x1014   : > { %4042 = vmatpush1.bf16.msra.mxu1 %v5306_v7 }
0x1015   : > { %4044 = vmatprep.subr.bf16.mxu1 %v5317_v11 }
0x1018   : > { %4046 = vmatpush1.bf16.msra.mxu1 %v5323_v13 }
0x1019   : > { %4064 = vmatprep.subr.bf16.mxu1 %v5258_v55 }
0x10de   : > { %v1978_v9 = vpop.f32.mrb[20].mxu1 }
0x10df   : > { %v1979_v12 = vadd.f32 %v1978_v9, %v1903_v8  ;;  %v1980_v16 = vpop.f32.mrb[21].mxu1  ;;  %v2140_v9 = vld [vmem:[#allocation2 + $0x7] ss:$8 sm:$0x3] }
0x10e0   : > { %v1981_v17 = vadd.f32 %v1980_v16, %v1907_v10  ;;  %v2145_v10 = vrot.slane %v2140_v9, %v5361_v25  ;;  %v2149_v16 = vrot.slane %v2140_v9, %v5342_v15 }
0x10e1   : > { %v3721_v19 = vmul.f32 -1.442695, %v1979_v12 }
0x10e2   : > { %4364 = vtanh.f32 %v1981_v17  ;;  %v3722_v31 = vmul.f32 -1.442695, %v1981_v17 }
0x10e3   : > { %4366 = vpow2.f32 %v3721_v19 }
0x10ec   : > { %v4365_v18 = vpop.eup %4364 }
0x10ed   : > { %1998 = vrot.lane.b32.xlu0 %v4365_v18, %s4764_s28  ;;  %v4367_v20 = vpop.eup %4366 }
0x10ee   : > { %v1989_v21 = vadd.f32 1.0, %v4367_v20 }
0x10f0   : > { %4368 = vrcp.f32 %v1989_v21 }
0x10fa   : > { %v4369_v22 = vpop.eup %4368 }
0x10fb   : > { %v1996_v24 = vmul.f32 %v4369_v22, %v1885_v34 }
0x115f   : > { %v1999_v40 = vpop.permute.xlu0 %1998 }
0x1160   : > { %v2001_v23 = vmul.f32 %v4369_v22, %v1999_v40 }
0x1162   : > { %2003 = vrot.lane.b32.xlu1 %v2001_v23, %s4764_s28 }
0x11d4   : > { %v2004_v26 = vpop.permute.xlu1 %2003 }
0x11d5   : > { %v2006_v29 = vadd.f32 %v2004_v26, %v1996_v24 }
0x11d7   : > { %4370 = vtanh.f32 %v2006_v29 }
0x11d8   : > { %4372 = vpow2.f32 %v3722_v31 }
0x11e1   : > { %v4371_v30 = vpop.eup %4370 }
0x11e2   : > { %2009 = vrot.lane.b32.xlu0 %v4371_v30, %s4764_s28  ;;  %v4373_v33 = vpop.eup %4372 }
0x11e3   : > { %v1990_v35 = vadd.f32 1.0, %v4373_v33 }
0x11e5   : > { %4374 = vrcp.f32 %v1990_v35 }
0x11ef   : > { %v4375_v36 = vpop.eup %4374 }
0x1254   : > { %v2010_v37 = vpop.permute.xlu0 %2009 }
0x1255   : > { %v5469_v39 = vmul.f32 %v4375_v36, %v2010_v37 }
0x1257   : > { %3723 = vmatmul.mubr.msk.f32.vlgmr.msra.gmra.mrb[10].mxu0 %vm712_vm3, %v5469_v39 }
0x1258   : > { %4050 = vmatpush1.bf16.msra.mxu0 %v5266_v56  ;;  %2339 = vmatprep.mubr.f32.mxu0 %v4763_v59 }
0x1259   : > { %4052 = vmatprep.subr.bf16.mxu0 %v5278_v60 }
0x125c   : > { %4054 = vmatpush1.bf16.msra.mxu0 %v5287_v0 }
0x125d   : > { %4056 = vmatprep.subr.bf16.mxu0 %v5297_v4 }
0x1260   : > { %4058 = vmatpush1.bf16.msra.mxu0 %v5306_v7 }
0x1261   : > { %4060 = vmatprep.subr.bf16.mxu0 %v5317_v11 }
0x1264   : > { %4062 = vmatpush1.bf16.msra.mxu0 %v5323_v13 }
0x1265   : > { %4080 = vmatprep.subr.bf16.mxu0 %v5258_v55 }
0x132a   : > { %v2099_v45 = vpop.f32.mrb[10].mxu0 }
0x132b   : > { %v2100_v47 = vadd.f32 %v2099_v45, %v2024_v44  ;;  %v2101_v48 = vpop.f32.mrb[11].mxu0 }
0x132c   : > { %v2102_v49 = vadd.f32 %v2101_v48, %v2028_v46  ;;  %v2261_v46 = vld [vmem:[#allocation2 + $0x10] ss:$8 sm:$0x3] }
0x132d   : > { %v3724_v52 = vmul.f32 -1.442695, %v2100_v47  ;;  %v2266_v47 = vrot.slane %v2261_v46, %v5361_v25 }
0x132e   : > { %4376 = vtanh.f32 %v2102_v49  ;;  %v3725_v58 = vmul.f32 -1.442695, %v2102_v49  ;;  %v2270_v49 = vrot.slane %v2261_v46, %v5342_v15 }
0x132f   : > { %4378 = vpow2.f32 %v3724_v52 }
0x1338   : > { %v4377_v50 = vpop.eup %4376 }
0x1339   : > { %2119 = vrot.lane.b32.xlu1 %v4377_v50, %s4764_s28  ;;  %v4379_v53 = vpop.eup %4378 }
0x133a   : > { %v2110_v51 = vadd.f32 1.0, %v4379_v53 }
0x133c   : > { %4380 = vrcp.f32 %v2110_v51 }
0x1346   : > { %v4381_v54 = vpop.eup %4380 }
0x1347   : > { %v2117_v32 = vmul.f32 %v4381_v54, %v2006_v29 }
0x13ab   : > { %v2120_v62 = vpop.permute.xlu1 %2119 }
0x13ac   : > { %v2122_v3 = vmul.f32 %v4381_v54, %v2120_v62 }
0x13ae   : > { %2124 = vrot.lane.b32.xlu0 %v2122_v3, %s4764_s28 }
0x1420   : > { %v2125_v34 = vpop.permute.xlu0 %2124 }
0x1421   : > { %v2127_v57 = vadd.f32 %v2125_v34, %v2117_v32 }
0x1423   : > { %4382 = vtanh.f32 %v2127_v57 }
0x1424   : > { %4384 = vpow2.f32 %v3725_v58 }
0x142d   : > { %v4383_v43 = vpop.eup %4382 }
0x142e   : > { %2130 = vrot.lane.b32.xlu1 %v4383_v43, %s4764_s28  ;;  %v4385_v61 = vpop.eup %4384 }
0x142f   : > { %v2111_v63 = vadd.f32 1.0, %v4385_v61 }
0x1431   : > { %4386 = vrcp.f32 %v2111_v63 }
0x143b   : > { %v4387_v1 = vpop.eup %4386 }
0x14a0   : > { %v2131_v6 = vpop.permute.xlu1 %2130 }
0x14a1   : > { %v5487_v8 = vmul.f32 %v4387_v1, %v2131_v6 }
0x14a3   : > { %3726 = vmatmul.mubr.msk.f32.vlgmr.msra.gmra.mrb[22].mxu1 %vm712_vm3, %v5487_v8 }
0x14a4   : > { %4066 = vmatpush1.bf16.msra.mxu1 %v5266_v56  ;;  %2460 = vmatprep.mubr.f32.mxu1 %v4763_v59 }
0x14a5   : > { %4068 = vmatprep.subr.bf16.mxu1 %v5278_v60 }
0x14a8   : > { %4070 = vmatpush1.bf16.msra.mxu1 %v5287_v0 }
0x14a9   : > { %4072 = vmatprep.subr.bf16.mxu1 %v5297_v4 }
0x14ac   : > { %4074 = vmatpush1.bf16.msra.mxu1 %v5306_v7 }
0x14ad   : > { %4076 = vmatprep.subr.bf16.mxu1 %v5317_v11 }
0x14b0   : > { %4078 = vmatpush1.bf16.msra.mxu1 %v5323_v13 }
0x14b1   : > { %4096 = vmatprep.subr.bf16.mxu1 %v5258_v55 }
0x1576   : > { %v2220_v12 = vpop.f32.mrb[22].mxu1 }
0x1577   : > { %v2221_v17 = vadd.f32 %v2220_v12, %v2145_v10  ;;  %v2222_v18 = vpop.f32.mrb[23].mxu1 }
0x1578   : > { %v2223_v19 = vadd.f32 %v2222_v18, %v2149_v16 }
0x1579   : > { %v3727_v21 = vmul.f32 -1.442695, %v2221_v17  ;;  %v2382_v17 = vld [vmem:[#allocation2 + $0x11] ss:$8 sm:$0x3] }
0x157a   : > { %4388 = vtanh.f32 %v2223_v19  ;;  %v3728_v35 = vmul.f32 -1.442695, %v2223_v19  ;;  %v2387_v18 = vrot.slane %v2382_v17, %v5361_v25 }
0x157b   : > { %4390 = vpow2.f32 %v3727_v21 }
0x1584   : > { %v4389_v20 = vpop.eup %4388 }
0x1585   : > { %2240 = vrot.lane.b32.xlu0 %v4389_v20, %s4764_s28  ;;  %v4391_v22 = vpop.eup %4390  ;;  %v2391_v20 = vrot.slane %v2382_v17, %v5342_v15 }
0x1586   : > { %v2231_v40 = vadd.f32 1.0, %v4391_v22 }
0x1588   : > { %4392 = vrcp.f32 %v2231_v40 }
0x1592   : > { %v4393_v23 = vpop.eup %4392 }
0x1593   : > { %v2238_v29 = vmul.f32 %v4393_v23, %v2127_v57 }
0x15f7   : > { %v2241_v24 = vpop.permute.xlu0 %2240 }
0x15f8   : > { %v2243_v26 = vmul.f32 %v4393_v23, %v2241_v24 }
0x15fa   : > { %2245 = vrot.lane.b32.xlu1 %v2243_v26, %s4764_s28 }
0x166c   : > { %v2246_v30 = vpop.permute.xlu1 %2245 }
0x166d   : > { %v2248_v31 = vadd.f32 %v2246_v30, %v2238_v29 }
0x166f   : > { %4394 = vtanh.f32 %v2248_v31 }
0x1670   : > { %4396 = vpow2.f32 %v3728_v35 }
0x1679   : > { %v4395_v33 = vpop.eup %4394 }
0x167a   : > { %2251 = vrot.lane.b32.xlu0 %v4395_v33, %s4764_s28  ;;  %v4397_v36 = vpop.eup %4396 }
0x167b   : > { %v2232_v37 = vadd.f32 1.0, %v4397_v36 }
0x167d   : > { %4398 = vrcp.f32 %v2232_v37 }
0x1687   : > { %v4399_v42 = vpop.eup %4398 }
0x16ec   : > { %v2252_v44 = vpop.permute.xlu0 %2251 }
0x16ed   : > { %v5505_v45 = vmul.f32 %v4399_v42, %v2252_v44 }
0x16ef   : > { %3729 = vmatmul.mubr.msk.f32.vlgmr.msra.gmra.mrb[12].mxu0 %vm712_vm3, %v5505_v45 }
0x16f0   : > { %4082 = vmatpush1.bf16.msra.mxu0 %v5266_v56  ;;  %2581 = vmatprep.mubr.f32.mxu0 %v4763_v59 }
0x16f1   : > { %4084 = vmatprep.subr.bf16.mxu0 %v5278_v60 }
0x16f4   : > { %4086 = vmatpush1.bf16.msra.mxu0 %v5287_v0 }
0x16f5   : > { %4088 = vmatprep.subr.bf16.mxu0 %v5297_v4 }
0x16f8   : > { %4090 = vmatpush1.bf16.msra.mxu0 %v5306_v7 }
0x16f9   : > { %4092 = vmatprep.subr.bf16.mxu0 %v5317_v11 }
0x16fc   : > { %4094 = vmatpush1.bf16.msra.mxu0 %v5323_v13 }
0x16fd   : > { %4112 = vmatprep.subr.bf16.mxu0 %v5258_v55 }
0x17c2   : > { %v2341_v48 = vpop.f32.mrb[12].mxu0 }
0x17c3   : > { %v2342_v50 = vadd.f32 %v2341_v48, %v2266_v47  ;;  %v2343_v52 = vpop.f32.mrb[13].mxu0 }
0x17c4   : > { %v2344_v53 = vadd.f32 %v2343_v52, %v2270_v49  ;;  %v2503_v52 = vld [vmem:[#allocation2 + $0x12] ss:$8 sm:$0x3] }
0x17c5   : > { %v3730_v54 = vmul.f32 -1.442695, %v2342_v50 }
0x17c6   : > { %4400 = vtanh.f32 %v2344_v53  ;;  %v3731_v1 = vmul.f32 -1.442695, %v2344_v53  ;;  %v2508_v53 = vrot.slane %v2503_v52, %v5361_v25 }
0x17c7   : > { %4402 = vpow2.f32 %v3730_v54  ;;  %v2512_v54 = vrot.slane %v2503_v52, %v5342_v15 }
0x17d0   : > { %v4401_v51 = vpop.eup %4400 }
0x17d1   : > { %2361 = vrot.lane.b32.xlu1 %v4401_v51, %s4764_s28  ;;  %v4403_v62 = vpop.eup %4402 }
0x17d2   : > { %v2352_v3 = vadd.f32 1.0, %v4403_v62 }
0x17d4   : > { %4404 = vrcp.f32 %v2352_v3 }
0x17de   : > { %v4405_v32 = vpop.eup %4404 }
0x17df   : > { %v2359_v43 = vmul.f32 %v4405_v32, %v2248_v31 }
0x1843   : > { %v2362_v34 = vpop.permute.xlu1 %2361 }
0x1844   : > { %v2364_v57 = vmul.f32 %v4405_v32, %v2362_v34 }
0x1846   : > { %2366 = vrot.lane.b32.xlu0 %v2364_v57, %s4764_s28 }
0x18b8   : > { %v2367_v58 = vpop.permute.xlu0 %2366 }
0x18b9   : > { %v2369_v61 = vadd.f32 %v2367_v58, %v2359_v43 }
0x18bb   : > { %4406 = vtanh.f32 %v2369_v61 }
0x18bc   : > { %4408 = vpow2.f32 %v3731_v1 }
0x18c5   : > { %v4407_v63 = vpop.eup %4406 }
0x18c6   : > { %2372 = vrot.lane.b32.xlu1 %v4407_v63, %s4764_s28  ;;  %v4409_v6 = vpop.eup %4408 }
0x18c7   : > { %v2353_v9 = vadd.f32 1.0, %v4409_v6 }
0x18c9   : > { %4410 = vrcp.f32 %v2353_v9 }
0x18d3   : > { %v4411_v10 = vpop.eup %4410 }
0x1938   : > { %v2373_v12 = vpop.permute.xlu1 %2372 }
0x1939   : > { %v5523_v16 = vmul.f32 %v4411_v10, %v2373_v12 }
0x193b   : > { %3732 = vmatmul.mubr.msk.f32.vlgmr.msra.gmra.mrb[24].mxu1 %vm712_vm3, %v5523_v16 }
0x193c   : > { %4098 = vmatpush1.bf16.msra.mxu1 %v5266_v56  ;;  %2702 = vmatprep.mubr.f32.mxu1 %v4763_v59 }
0x193d   : > { %4100 = vmatprep.subr.bf16.mxu1 %v5278_v60 }
0x1940   : > { %4102 = vmatpush1.bf16.msra.mxu1 %v5287_v0 }
0x1941   : > { %4104 = vmatprep.subr.bf16.mxu1 %v5297_v4 }
0x1944   : > { %4106 = vmatpush1.bf16.msra.mxu1 %v5306_v7 }
0x1945   : > { %4108 = vmatprep.subr.bf16.mxu1 %v5317_v11 }
0x1948   : > { %4110 = vmatpush1.bf16.msra.mxu1 %v5323_v13 }
0x1949   : > { %4128 = vmatprep.subr.bf16.mxu1 %v5258_v55 }
0x1a0e   : > { %v2462_v19 = vpop.f32.mrb[24].mxu1 }
0x1a0f   : > { %v2463_v21 = vadd.f32 %v2462_v19, %v2387_v18  ;;  %v2464_v22 = vpop.f32.mrb[25].mxu1 }
0x1a10   : > { %v2465_v40 = vadd.f32 %v2464_v22, %v2391_v20 }
0x1a11   : > { %v3733_v24 = vmul.f32 -1.442695, %v2463_v21 }
0x1a12   : > { %4412 = vtanh.f32 %v2465_v40  ;;  %v3734_v44 = vmul.f32 -1.442695, %v2465_v40  ;;  %v2624_v40 = vld [vmem:[#allocation2 + $0x13] ss:$8 sm:$0x3] }
0x1a13   : > { %4414 = vpow2.f32 %v3733_v24 }
0x1a1c   : > { %v4413_v23 = vpop.eup %4412 }
0x1a1d   : > { %2482 = vrot.lane.b32.xlu0 %v4413_v23, %s4764_s28  ;;  %v4415_v26 = vpop.eup %4414  ;;  %v2629_v23 = vrot.slane %v2624_v40, %v5361_v25 }
0x1a1e   : > { %v2473_v29 = vadd.f32 1.0, %v4415_v26  ;;  %v2633_v26 = vrot.slane %v2624_v40, %v5342_v15 }
0x1a20   : > { %4416 = vrcp.f32 %v2473_v29 }
0x1a2a   : > { %v4417_v30 = vpop.eup %4416 }
0x1a2b   : > { %v2480_v35 = vmul.f32 %v4417_v30, %v2369_v61 }
0x1a8f   : > { %v2483_v31 = vpop.permute.xlu0 %2482 }
0x1a90   : > { %v2485_v33 = vmul.f32 %v4417_v30, %v2483_v31 }
0x1a92   : > { %2487 = vrot.lane.b32.xlu1 %v2485_v33, %s4764_s28 }
0x1b04   : > { %v2488_v36 = vpop.permute.xlu1 %2487 }
0x1b05   : > { %v2490_v37 = vadd.f32 %v2488_v36, %v2480_v35 }
0x1b07   : > { %4418 = vtanh.f32 %v2490_v37 }
0x1b08   : > { %4420 = vpow2.f32 %v3734_v44 }
0x1b11   : > { %v4419_v42 = vpop.eup %4418 }
0x1b12   : > { %2493 = vrot.lane.b32.xlu0 %v4419_v42, %s4764_s28  ;;  %v4421_v46 = vpop.eup %4420 }
0x1b13   : > { %v2474_v47 = vadd.f32 1.0, %v4421_v46 }
0x1b15   : > { %4422 = vrcp.f32 %v2474_v47 }
0x1b1f   : > { %v4423_v48 = vpop.eup %4422 }
0x1b84   : > { %v2494_v49 = vpop.permute.xlu0 %2493 }
0x1b85   : > { %v5541_v50 = vmul.f32 %v4423_v48, %v2494_v49 }
0x1b87   : > { %3735 = vmatmul.mubr.msk.f32.vlgmr.msra.gmra.mrb[14].mxu0 %vm712_vm3, %v5541_v50 }
0x1b88   : > { %4114 = vmatpush1.bf16.msra.mxu0 %v5266_v56  ;;  %2823 = vmatprep.mubr.f32.mxu0 %v4763_v59 }
0x1b89   : > { %4116 = vmatprep.subr.bf16.mxu0 %v5278_v60 }
0x1b8c   : > { %4118 = vmatpush1.bf16.msra.mxu0 %v5287_v0 }
0x1b8d   : > { %4120 = vmatprep.subr.bf16.mxu0 %v5297_v4 }
0x1b90   : > { %4122 = vmatpush1.bf16.msra.mxu0 %v5306_v7 }
0x1b91   : > { %4124 = vmatprep.subr.bf16.mxu0 %v5317_v11 }
0x1b94   : > { %4126 = vmatpush1.bf16.msra.mxu0 %v5323_v13 }
0x1b95   : > { %4144 = vmatprep.subr.bf16.mxu0 %v5258_v55 }
0x1c5a   : > { %v2583_v51 = vpop.f32.mrb[14].mxu0 }
0x1c5b   : > { %v2584_v62 = vadd.f32 %v2583_v51, %v2508_v53  ;;  %v2585_v3 = vpop.f32.mrb[15].mxu0 }
0x1c5c   : > { %v2586_v32 = vadd.f32 %v2585_v3, %v2512_v54 }
0x1c5d   : > { %v3736_v57 = vmul.f32 -1.442695, %v2584_v62 }
0x1c5e   : > { %4424 = vtanh.f32 %v2586_v32  ;;  %v3737_v17 = vmul.f32 -1.442695, %v2586_v32 }
0x1c5f   : > { %4426 = vpow2.f32 %v3736_v57 }
0x1c68   : > { %v4425_v34 = vpop.eup %4424 }
0x1c69   : > { %2603 = vrot.lane.b32.xlu1 %v4425_v34, %s4764_s28  ;;  %v4427_v43 = vpop.eup %4426  ;;  %v2745_v34 = vld [vmem:[#allocation2 + $0x14] ss:$8 sm:$0x3] }
0x1c6a   : > { %v2594_v58 = vadd.f32 1.0, %v4427_v43  ;;  %v2750_v57 = vrot.slane %v2745_v34, %v5361_v25 }
0x1c6c   : > { %4428 = vrcp.f32 %v2594_v58  ;;  %v2754_v58 = vrot.slane %v2745_v34, %v5342_v15 }
0x1c76   : > { %v4429_v61 = vpop.eup %4428 }
0x1c77   : > { %v2601_v6 = vmul.f32 %v4429_v61, %v2490_v37 }
0x1cdb   : > { %v2604_v63 = vpop.permute.xlu1 %2603 }
0x1cdc   : > { %v2606_v1 = vmul.f32 %v4429_v61, %v2604_v63 }
0x1cde   : > { %2608 = vrot.lane.b32.xlu0 %v2606_v1, %s4764_s28 }
0x1d50   : > { %v2609_v9 = vpop.permute.xlu0 %2608 }
0x1d51   : > { %v2611_v10 = vadd.f32 %v2609_v9, %v2601_v6 }
0x1d53   : > { %4430 = vtanh.f32 %v2611_v10 }
0x1d54   : > { %4432 = vpow2.f32 %v3737_v17 }
0x1d5d   : > { %v4431_v12 = vpop.eup %4430 }
0x1d5e   : > { %2614 = vrot.lane.b32.xlu1 %v4431_v12, %s4764_s28  ;;  %v4433_v18 = vpop.eup %4432 }
0x1d5f   : > { %v2595_v19 = vadd.f32 1.0, %v4433_v18 }
0x1d61   : > { %4434 = vrcp.f32 %v2595_v19 }
0x1d6b   : > { %v4435_v20 = vpop.eup %4434 }
0x1dd0   : > { %v2615_v21 = vpop.permute.xlu1 %2614 }
0x1dd1   : > { %v5559_v22 = vmul.f32 %v4435_v20, %v2615_v21 }
0x1dd3   : > { %3738 = vmatmul.mubr.msk.f32.vlgmr.msra.gmra.mrb[26].mxu1 %vm712_vm3, %v5559_v22 }
0x1dd4   : > { %4130 = vmatpush1.bf16.msra.mxu1 %v5266_v56  ;;  %2944 = vmatprep.mubr.f32.mxu1 %v4763_v59 }
0x1dd5   : > { %4132 = vmatprep.subr.bf16.mxu1 %v5278_v60 }
0x1dd8   : > { %4134 = vmatpush1.bf16.msra.mxu1 %v5287_v0 }
0x1dd9   : > { %4136 = vmatprep.subr.bf16.mxu1 %v5297_v4 }
0x1ddc   : > { %4138 = vmatpush1.bf16.msra.mxu1 %v5306_v7 }
0x1ddd   : > { %4140 = vmatprep.subr.bf16.mxu1 %v5317_v11 }
0x1de0   : > { %4142 = vmatpush1.bf16.msra.mxu1 %v5323_v13 }
0x1de1   : > { %4160 = vmatprep.subr.bf16.mxu1 %v5258_v55 }
0x1ea6   : > { %v2704_v24 = vpop.f32.mrb[26].mxu1 }
0x1ea7   : > { %v2705_v29 = vadd.f32 %v2704_v24, %v2629_v23  ;;  %v2706_v30 = vpop.f32.mrb[27].mxu1 }
0x1ea8   : > { %v2707_v31 = vadd.f32 %v2706_v30, %v2633_v26 }
0x1ea9   : > { %v3739_v35 = vmul.f32 -1.442695, %v2705_v29 }
0x1eaa   : > { %4436 = vtanh.f32 %v2707_v31  ;;  %v3740_v53 = vmul.f32 -1.442695, %v2707_v31 }
0x1eab   : > { %4438 = vpow2.f32 %v3739_v35 }
0x1eb4   : > { %v4437_v33 = vpop.eup %4436 }
0x1eb5   : > { %2724 = vrot.lane.b32.xlu0 %v4437_v33, %s4764_s28  ;;  %v4439_v36 = vpop.eup %4438  ;;  %v2866_v33 = vld [vmem:[#allocation2 + $0x15] ss:$8 sm:$0x3] }
0x1eb6   : > { %v2715_v37 = vadd.f32 1.0, %v4439_v36  ;;  %v2871_v35 = vrot.slane %v2866_v33, %v5361_v25 }
0x1eb8   : > { %4440 = vrcp.f32 %v2715_v37  ;;  %v2875_v37 = vrot.slane %v2866_v33, %v5342_v15 }
0x1ec2   : > { %v4441_v42 = vpop.eup %4440 }
0x1ec3   : > { %v2722_v47 = vmul.f32 %v4441_v42, %v2611_v10 }
0x1f27   : > { %v2725_v44 = vpop.permute.xlu0 %2724 }
0x1f28   : > { %v2727_v46 = vmul.f32 %v4441_v42, %v2725_v44 }
0x1f2a   : > { %2729 = vrot.lane.b32.xlu1 %v2727_v46, %s4764_s28 }
0x1f9c   : > { %v2730_v48 = vpop.permute.xlu1 %2729 }
0x1f9d   : > { %v2732_v49 = vadd.f32 %v2730_v48, %v2722_v47 }
0x1f9f   : > { %4442 = vtanh.f32 %v2732_v49 }
0x1fa0   : > { %4444 = vpow2.f32 %v3740_v53 }
0x1fa9   : > { %v4443_v52 = vpop.eup %4442 }
0x1faa   : > { %2735 = vrot.lane.b32.xlu0 %v4443_v52, %s4764_s28  ;;  %v4445_v51 = vpop.eup %4444 }
0x1fab   : > { %v2716_v54 = vadd.f32 1.0, %v4445_v51 }
0x1fad   : > { %4446 = vrcp.f32 %v2716_v54 }
0x1fb7   : > { %v4447_v62 = vpop.eup %4446 }
0x201c   : > { %v2736_v3 = vpop.permute.xlu0 %2735 }
0x201d   : > { %v5577_v32 = vmul.f32 %v4447_v62, %v2736_v3 }
0x201f   : > { %3741 = vmatmul.mubr.msk.f32.vlgmr.msra.gmra.mrb[16].mxu0 %vm712_vm3, %v5577_v32 }
0x2020   : > { %4146 = vmatpush1.bf16.msra.mxu0 %v5266_v56  ;;  %3065 = vmatprep.mubr.f32.mxu0 %v4763_v59 }
0x2021   : > { %4148 = vmatprep.subr.bf16.mxu0 %v5278_v60 }
0x2024   : > { %4150 = vmatpush1.bf16.msra.mxu0 %v5287_v0 }
0x2025   : > { %4152 = vmatprep.subr.bf16.mxu0 %v5297_v4 }
0x2028   : > { %4154 = vmatpush1.bf16.msra.mxu0 %v5306_v7 }
0x2029   : > { %4156 = vmatprep.subr.bf16.mxu0 %v5317_v11 }
0x202c   : > { %4158 = vmatpush1.bf16.msra.mxu0 %v5323_v13 }
0x202d   : > { %4176 = vmatprep.subr.bf16.mxu0 %v5258_v55 }
0x20f2   : > { %v2825_v43 = vpop.f32.mrb[16].mxu0 }
0x20f3   : > { %v2826_v61 = vadd.f32 %v2825_v43, %v2750_v57  ;;  %v2827_v63 = vpop.f32.mrb[17].mxu0 }
0x20f4   : > { %v2828_v1 = vadd.f32 %v2827_v63, %v2754_v58 }
0x20f5   : > { %v3742_v9 = vmul.f32 -1.442695, %v2826_v61 }
0x20f6   : > { %4448 = vtanh.f32 %v2828_v1  ;;  %v3743_v23 = vmul.f32 -1.442695, %v2828_v1 }
0x20f7   : > { %4450 = vpow2.f32 %v3742_v9  ;;  %v2987_v9 = vld [vmem:[#allocation2 + $0x16] ss:$8 sm:$0x3] }
0x2100   : > { %v4449_v6 = vpop.eup %4448 }
0x2101   : > { %2845 = vrot.lane.b32.xlu1 %v4449_v6, %s4764_s28  ;;  %v4451_v10 = vpop.eup %4450 }
0x2102   : > { %v2836_v12 = vadd.f32 1.0, %v4451_v10  ;;  %v2992_v10 = vrot.slane %v2987_v9, %v5361_v25 }
0x2104   : > { %4452 = vrcp.f32 %v2836_v12 }
0x210e   : > { %v4453_v17 = vpop.eup %4452 }
0x210f   : > { %v2843_v19 = vmul.f32 %v4453_v17, %v2732_v49 }
0x2173   : > { %v2846_v55 = vpop.permute.xlu1 %2845 }
0x2174   : > { %v2848_v18 = vmul.f32 %v4453_v17, %v2846_v55 }
0x2176   : > { %2850 = vrot.lane.b32.xlu0 %v2848_v18, %s4764_s28 }
0x21e8   : > { %v2851_v20 = vpop.permute.xlu0 %2850 }
0x21e9   : > { %v2853_v21 = vadd.f32 %v2851_v20, %v2843_v19 }
0x21eb   : > { %4454 = vtanh.f32 %v2853_v21 }
0x21ec   : > { %4456 = vpow2.f32 %v3743_v23 }
0x21f5   : > { %v4455_v40 = vpop.eup %4454 }
0x21f6   : > { %2856 = vrot.lane.b32.xlu1 %v4455_v40, %s4764_s28  ;;  %v4457_v24 = vpop.eup %4456 }
0x21f7   : > { %v2837_v26 = vadd.f32 1.0, %v4457_v24 }
0x21f9   : > { %4458 = vrcp.f32 %v2837_v26 }
0x2203   : > { %v4459_v29 = vpop.eup %4458 }
0x2268   : > { %v2857_v30 = vpop.permute.xlu1 %2856 }
0x2269   : > { %v5595_v31 = vmul.f32 %v4459_v29, %v2857_v30 }
0x226b   : > { %3744 = vmatmul.mubr.msk.f32.vlgmr.msra.gmra.mrb[28].mxu1 %vm712_vm3, %v5595_v31 }
0x226c   : > { %4162 = vmatpush1.bf16.msra.mxu1 %v5266_v56  ;;  %3186 = vmatprep.mubr.f32.mxu1 %v4763_v59 }
0x226d   : > { %4164 = vmatprep.subr.bf16.mxu1 %v5278_v60 }
0x2270   : > { %4166 = vmatpush1.bf16.msra.mxu1 %v5287_v0 }
0x2271   : > { %4168 = vmatprep.subr.bf16.mxu1 %v5297_v4 }
0x2274   : > { %4170 = vmatpush1.bf16.msra.mxu1 %v5306_v7 }
0x2275   : > { %4172 = vmatprep.subr.bf16.mxu1 %v5317_v11 }
0x2278   : > { %4174 = vmatpush1.bf16.msra.mxu1 %v5323_v13 }
0x233e   : > { %v2946_v36 = vpop.f32.mrb[28].mxu1 }
0x233f   : > { %v2947_v42 = vadd.f32 %v2946_v36, %v2871_v35  ;;  %v2948_v44 = vpop.f32.mrb[29].mxu1  ;;  %v3108_v36 = vld [vmem:[#allocation2 + $0x17] ss:$8 sm:$0x3] }
0x2340   : > { %v2949_v46 = vadd.f32 %v2948_v44, %v2875_v37  ;;  %v3113_v37 = vrot.slane %v3108_v36, %v5361_v25  ;;  %v3117_v44 = vrot.slane %v3108_v36, %v5342_v15 }
0x2341   : > { %v3745_v48 = vmul.f32 -1.442695, %v2947_v42 }
0x2342   : > { %4460 = vtanh.f32 %v2949_v46  ;;  %v3746_v43 = vmul.f32 -1.442695, %v2949_v46 }
0x2343   : > { %4462 = vpow2.f32 %v3745_v48 }
0x234c   : > { %v4461_v47 = vpop.eup %4460 }
0x234d   : > { %2966 = vrot.lane.b32.xlu0 %v4461_v47, %s4764_s28  ;;  %v4463_v49 = vpop.eup %4462 }
0x234e   : > { %v2957_v52 = vadd.f32 1.0, %v4463_v49 }
0x2350   : > { %4464 = vrcp.f32 %v2957_v52 }
0x235a   : > { %v4465_v53 = vpop.eup %4464 }
0x235b   : > { %v2964_v62 = vmul.f32 %v4465_v53, %v2853_v21 }
0x23bf   : > { %v2967_v51 = vpop.permute.xlu0 %2966 }
0x23c0   : > { %v2969_v54 = vmul.f32 %v4465_v53, %v2967_v51 }
0x23c2   : > { %2971 = vrot.lane.b32.xlu1 %v2969_v54, %s4764_s28 }
0x2434   : > { %v2972_v3 = vpop.permute.xlu1 %2971 }
0x2435   : > { %v2974_v34 = vadd.f32 %v2972_v3, %v2964_v62 }
0x2437   : > { %4466 = vtanh.f32 %v2974_v34 }
0x2438   : > { %4468 = vpow2.f32 %v3746_v43 }
0x2441   : > { %v4467_v57 = vpop.eup %4466 }
0x2442   : > { %2977 = vrot.lane.b32.xlu0 %v4467_v57, %s4764_s28  ;;  %v4469_v58 = vpop.eup %4468 }
0x2443   : > { %v2958_v61 = vadd.f32 1.0, %v4469_v58 }
0x2445   : > { %4470 = vrcp.f32 %v2958_v61 }
0x244f   : > { %v4471_v63 = vpop.eup %4470 }
0x24b4   : > { %v2978_v1 = vpop.permute.xlu0 %2977 }
0x24b5   : > { %v5612_v6 = vmul.f32 %v4471_v63, %v2978_v1 }
0x24b7   : > { %3747 = vmatmul.mubr.msk.f32.vlgmr.msra.gmra.mrb[18].mxu0 %vm712_vm3, %v5612_v6 }
0x24b8   : > { %4178 = vmatpush1.bf16.msra.mxu0 %v5266_v56  ;;  %3300 = vmatprep.mubr.f32.mxu0 %v4763_v59  ;;  %v2996_v56 = vrot.slane %v2987_v9, %v5342_v15 }
0x24b9   : > { %4180 = vmatprep.subr.bf16.mxu0 %v5278_v60 }
0x24bc   : > { %4182 = vmatpush1.bf16.msra.mxu0 %v5287_v0 }
0x24bd   : > { %4184 = vmatprep.subr.bf16.mxu0 %v5297_v4 }
0x24c0   : > { %4186 = vmatpush1.bf16.msra.mxu0 %v5306_v7 }
0x24c1   : > { %4188 = vmatprep.subr.bf16.mxu0 %v5317_v11 }
0x24c4   : > { %4190 = vmatpush1.bf16.msra.mxu0 %v5323_v13 }
0x258a   : > { %v3067_v12 = vpop.f32.mrb[18].mxu0 }
0x258b   : > { %v3068_v17 = vadd.f32 %v3067_v12, %v2992_v10  ;;  %v3069_v55 = vpop.f32.mrb[19].mxu0 }
0x258c   : > { %v3070_v18 = vadd.f32 %v3069_v55, %v2996_v56 }
0x258d   : > { %v3748_v0 = vmul.f32 -1.442695, %v3068_v17 }
0x258e   : > { %4472 = vtanh.f32 %v3070_v18  ;;  %v3749_v24 = vmul.f32 -1.442695, %v3070_v18 }
0x258f   : > { %4474 = vpow2.f32 %v3748_v0 }
0x2598   : > { %v4473_v60 = vpop.eup %4472 }
0x2599   : > { %3087 = vrot.lane.b32.xlu1 %v4473_v60, %s4764_s28  ;;  %v4475_v4 = vpop.eup %4474 }
0x259a   : > { %v3078_v7 = vadd.f32 1.0, %v4475_v4 }
0x259c   : > { %4476 = vrcp.f32 %v3078_v7 }
0x25a6   : > { %v4477_v11 = vpop.eup %4476 }
0x25a7   : > { %v3085_v20 = vmul.f32 %v4477_v11, %v2974_v34 }
0x260b   : > { %v3088_v13 = vpop.permute.xlu1 %3087 }
0x260c   : > { %v3090_v19 = vmul.f32 %v4477_v11, %v3088_v13 }
0x260e   : > { %3092 = vrot.lane.b32.xlu0 %v3090_v19, %s4764_s28 }
0x2680   : > { %v3093_v21 = vpop.permute.xlu0 %3092 }
0x2681   : > { %v3095_v40 = vadd.f32 %v3093_v21, %v3085_v20  ;;  %v4766_v21 = vmov 0.0|0.0  }
0x2682   : > { %4191 = vmatprep.subr.bf16.mxu1 %v4766_v21 }
0x2683   : > { %4478 = vtanh.f32 %v3095_v40 }
0x2684   : > { %4480 = vpow2.f32 %v3749_v24  ;;  %v4768_v24 = vmov 0  }
0x2685   : > { %4295 = vset.pattern.permute.xlu0 %v4768_v24 }
0x268d   : > { %v4479_v23 = vpop.eup %4478 }
0x268e   : > { %3098 = vrot.lane.b32.xlu1 %v4479_v23, %s4764_s28  ;;  %v4481_v26 = vpop.eup %4480 }
0x268f   : > { %v3079_v29 = vadd.f32 1.0, %v4481_v26  ;;  %v4508_v26 = vld [vmem:[%s5837_s10] sm:$0xff] }
0x2691   : > { %4482 = vrcp.f32 %v3079_v29 }
0x269b   : > { %v4483_v30 = vpop.eup %4482 }
0x2700   : > { %v3099_v33 = vpop.permute.xlu1 %3098 }
0x2701   : > { %v5629_v35 = vmul.f32 %v4483_v30, %v3099_v33 }
0x2703   : > { %3750 = vmatmul.mubr.msk.f32.vlgmr.msra.gmra.mrb[30].mxu1 %vm712_vm3, %v5629_v35 }
0x27d6   : > { %v3188_v42 = vpop.f32.mrb[30].mxu1 }
0x27d7   : > { %v3189_v46 = vadd.f32 %v3188_v42, %v3113_v37  ;;  %v3190_v47 = vpop.f32.mrb[31].mxu1 }
0x27d8   : > { %v3191_v48 = vadd.f32 %v3190_v47, %v3117_v44 }
0x27d9   : > { %v3751_v52 = vmul.f32 -1.442695, %v3189_v46 }
0x27da   : > { %4484 = vtanh.f32 %v3191_v48  ;;  %v3752_v43 = vmul.f32 -1.442695, %v3191_v48  ;;  %v3363_v48 = vsub.s32 2, %v5339_v14 }
0x27db   : > { %4486 = vpow2.f32 %v3751_v52 }
0x27e4   : > { %v4485_v49 = vpop.eup %4484 }
0x27e5   : > { %3208 = vrot.lane.b32.xlu0 %v4485_v49, %s4764_s28  ;;  %v4487_v53 = vpop.eup %4486  ;;  %v3364_v49 = vrot.slane %v4508_v26, %v3363_v48 }
0x27e6   : > { %v3199_v51 = vadd.f32 1.0, %v4487_v53 }
0x27e8   : > { %4488 = vrcp.f32 %v3199_v51 }
0x27f2   : > { %v4489_v54 = vpop.eup %4488 }
0x27f3   : > { %v3206_v25 = vmul.f32 %v4489_v54, %v3095_v40 }
0x2857   : > { %v3209_v62 = vpop.permute.xlu0 %3208 }
0x2858   : > { %v3211_v3 = vmul.f32 %v4489_v54, %v3209_v62 }
0x285a   : > { %3213 = vrot.lane.b32.xlu1 %v3211_v3, %s4764_s28 }
0x28cc   : > { %v3214_v15 = vpop.permute.xlu1 %3213 }
0x28cd   : > { %v5637_v34 = vadd.f32 %v3214_v15, %v3206_v25 }
0x28cf   : > { %4490 = vtanh.f32 %v5637_v34 }
0x28d0   : > { %4492 = vpow2.f32 %v3752_v43 }
0x28d9   : > { %v4491_v57 = vpop.eup %4490 }
0x28da   : > { %3219 = vrot.lane.b32.xlu0 %v4491_v57, %s4764_s28  ;;  %v4493_v58 = vpop.eup %4492 }
0x28db   : > { %v3200_v61 = vadd.f32 1.0, %v4493_v58 }
0x28dd   : > { %4494 = vrcp.f32 %v3200_v61 }
0x28e7   : > { %v4495_v63 = vpop.eup %4494 }
0x294c   : > { %v3220_v1 = vpop.permute.xlu0 %3219 }
0x294d   : > { %v3222_v9 = vmul.f32 %v4495_v63, %v3220_v1 }
0x294f   : > { %3753 = vmatmul.mubr.msk.f32.vlgmr.msra.gmra.mrb[20].mxu0 %vm712_vm3, %v3222_v9  ;;  %3223 = vst.msk [vmem:[%s5648_s20] sm:$0x1] %vm1532_vm4, %v3222_v9  ;;  %vm4767_vm3 = vmmov 0  }
0x2950   : > { %3872 = vmatprep.mubr.msk.f32.mxu1 %vm4767_vm3, %v4763_v59 }
0x2a22   : > { %v3302_v10 = vpop.f32.mrb[20].mxu0 }
0x2a23   : > { %v3304_v12 = vpop.f32.mrb[21].mxu0  ;;  %v3303_v55 = vadd.f32 %v3302_v10, %v5365_v27 }
0x2a24   : > { %v3305_v56 = vadd.f32 %v3304_v12, %v5367_v28 }
0x2a25   : > { %v3754_v18 = vmul.f32 -1.442695, %v3303_v55 }
0x2a26   : > { %4496 = vtanh.f32 %v3305_v56 }
0x2a27   : > { %4498 = vpow2.f32 %v3754_v18 }
0x2a30   : > { %v4497_v17 = vpop.eup %4496 }
0x2a31   : > { %3322 = vrot.lane.b32.xlu1 %v4497_v17, %s4764_s28  ;;  %v4499_v60 = vpop.eup %4498 }
0x2a32   : > { %v3313_v0 = vadd.f32 1.0, %v4499_v60 }
0x2a34   : > { %4500 = vrcp.f32 %v3313_v0 }
0x2a3e   : > { %v4501_v4 = vpop.eup %4500 }
0x2a3f   : > { %v3320_v27 = vmul.f32 %v4501_v4, %v5637_v34 }
0x2aa3   : > { %v3323_v7 = vpop.permute.xlu1 %3322 }
0x2aa4   : > { %v3325_v11 = vmul.f32 %v4501_v4, %v3323_v7 }
0x2aa6   : > { %3327 = vrot.lane.b32.xlu0 %v3325_v11, %s4764_s28 }
0x2aaa   : > { %1529 = vrot.lane.b32.xlu0 %v5397_v41, %s4765_s21 }
0x2aae   : > { %1772 = vrot.lane.b32.xlu0 %v5433_v38, %s4765_s21 }
0x2ab2   : > { %2014 = vrot.lane.b32.xlu0 %v5469_v39, %s4765_s21 }
0x2ab6   : > { %2256 = vrot.lane.b32.xlu0 %v5505_v45, %s4765_s21 }
0x2aba   : > { %2498 = vrot.lane.b32.xlu0 %v5541_v50, %s4765_s21 }
0x2abe   : > { %2740 = vrot.lane.b32.xlu0 %v5577_v32, %s4765_s21 }
0x2ac2   : > { %2982 = vrot.lane.b32.xlu0 %v5612_v6, %s4765_s21 }
0x2ac6   : > { %3230 = vrot.lane.b32.xlu0 %v3222_v9, %s4765_s21 }
0x2aca   : > { %3351 = vperm.xlu0 %4295, %v4508_v26  }
0x2b18   : > { %v3328_v28 = vpop.permute.xlu0 %3327 }
0x2b19   : > { %v3330_v41 = vadd.f32 %v3328_v28, %v3320_v27 }
0x2b1b   : > { %4502 = vtanh.f32 %v3330_v41 }
0x2b1c   : > { %v1530_v38 = vpop.permute.xlu0 %1529 }
0x2b1d   : > { %1533 = vst.msk [vmem:[#allocation3] sm:$0x1] %vm1532_vm4, %v1530_v38 }
0x2b20   : > { %v1773_v39 = vpop.permute.xlu0 %1772 }
0x2b21   : > { %1775 = vst.msk [vmem:[#allocation3 + $0x2] sm:$0x1] %vm1532_vm4, %v1773_v39 }
0x2b24   : > { %v2015_v45 = vpop.permute.xlu0 %2014 }
0x2b25   : > { %v4503_v50 = vpop.eup %4502  ;;  %2017 = vst.msk [vmem:[#allocation3 + $0x4] sm:$0x1] %vm1532_vm4, %v2015_v45 }
0x2b26   : > { %3333 = vrot.lane.b32.xlu1 %v4503_v50, %s4764_s28 }
0x2b28   : > { %v2257_v32 = vpop.permute.xlu0 %2256 }
0x2b29   : > { %2259 = vst.msk [vmem:[#allocation3 + $0x6] sm:$0x1] %vm1532_vm4, %v2257_v32 }
0x2b2a   : > { %1651 = vrot.lane.b32.xlu1 %v5415_v5, %s4765_s21  ;;  %v3755_v5 = vmul.f32 -1.442695, %v3305_v56 }
0x2b2c   : > { %v2499_v6 = vpop.permute.xlu0 %2498  ;;  %4504 = vpow2.f32 %v3755_v5 }
0x2b2d   : > { %2501 = vst.msk [vmem:[#allocation3 + $0x8] sm:$0x1] %vm1532_vm4, %v2499_v6 }
0x2b2e   : > { %1893 = vrot.lane.b32.xlu1 %v5451_v2, %s4765_s21 }
0x2b30   : > { %v2741_v13 = vpop.permute.xlu0 %2740 }
0x2b31   : > { %2743 = vst.msk [vmem:[#allocation3 + $0xa] sm:$0x1] %vm1532_vm4, %v2741_v13 }
0x2b32   : > { %2135 = vrot.lane.b32.xlu1 %v5487_v8, %s4765_s21 }
0x2b34   : > { %v2983_v19 = vpop.permute.xlu0 %2982 }
0x2b35   : > { %2985 = vst.msk [vmem:[#allocation3 + $0xc] sm:$0x1] %vm1532_vm4, %v2983_v19 }
0x2b36   : > { %2377 = vrot.lane.b32.xlu1 %v5523_v16, %s4765_s21  ;;  %v4505_v2 = vpop.eup %4504 }
0x2b37   : > { %v3314_v8 = vadd.f32 1.0, %v4505_v2 }
0x2b38   : > { %v3231_v20 = vpop.permute.xlu0 %3230 }
0x2b39   : > { %3233 = vst.msk [vmem:[#allocation3 + $0xe] sm:$0x1] %vm1532_vm4, %v3231_v20  ;;  %4506 = vrcp.f32 %v3314_v8 }
0x2b3a   : > { %2619 = vrot.lane.b32.xlu1 %v5559_v22, %s4765_s21 }
0x2b3e   : > { %2861 = vrot.lane.b32.xlu1 %v5595_v31, %s4765_s21 }
0x2b42   : > { %3103 = vrot.lane.b32.xlu1 %v5629_v35, %s4765_s21 }
0x2b43   : > { %v4507_v16 = vpop.eup %4506 }
0x2b98   : > { %v3334_v40 = vpop.permute.xlu1 %3333 }
0x2b99   : > { %v3336_v23 = vmul.f32 %v4507_v16, %v3334_v40 }
0x2b9b   : > { %3338 = vrot.lane.b32.xlu1 %v3336_v23, %s4765_s21  ;;  %s4770_s21 = smov [#allocation13]  }
0x2b9c   : > { %v1652_v22 = vpop.permute.xlu1 %1651  ;;  %s4625_s24 = sshll.u32 %s4770_s21, 4  ;;  %s4626_s24 = int_to_ptr.vmem [resolvable:$false] %s4625_s24 }
0x2b9d   : > { %1654 = vst.msk [vmem:[#allocation3 + $0x1] sm:$0x1] %vm1532_vm4, %v1652_v22  ;;  %s4627_s16 = scalar_lea.vmem %s4626_s24, 64  ;;  %p4628_p6 = scmp.lt.s32.totalorder %s3488_s13, %s4626_s24 }
0x2b9e   : > { %p4629_p9 = scmp.lt.s32.totalorder %s4627_s16, %s4621_s25 }
0x2b9f   : > { %3225 = vrot.lane.b32.xlu1 %v5637_v34, %s4764_s28  ;;  %s5735_s28 = scalar_lea.sflag [#allocation14], %s3455_s30 }
0x2ba0   : > { %v1894_v31 = vpop.permute.xlu1 %1893  ;;  %p4630_p5 = por %p4629_p9, %p4628_p6 }
0x2ba1   : > { %1896 = vst.msk [vmem:[#allocation3 + $0x3] sm:$0x1] %vm1532_vm4, %v1894_v31 }
0x2ba2   : > { %p4631_p0 = pnand %p4630_p5, %p4624_p1 }
0x2ba3   : > { %3344 = vrot.lane.b32.xlu1 %v3330_v41, %s4769_s27 }
0x2ba4   : > { %v2136_v59 = vpop.permute.xlu1 %2135 }
0x2ba5   : > { %2138 = vst.msk [vmem:[#allocation3 + $0x5] sm:$0x1] %vm1532_vm4, %v2136_v59 }
0x2ba8   : > { %v2378_v29 = vpop.permute.xlu1 %2377 }
0x2ba9   : > { %2380 = vst.msk [vmem:[#allocation3 + $0x7] sm:$0x1] %vm1532_vm4, %v2378_v29 }
0x2bac   : > { %v2620_v30 = vpop.permute.xlu1 %2619 }
0x2bad   : > { %2622 = vst.msk [vmem:[#allocation3 + $0x9] sm:$0x1] %vm1532_vm4, %v2620_v30 }
0x2bb0   : > { %v2862_v33 = vpop.permute.xlu1 %2861  ;;  %v3348_v44 = vld [vmem:[#allocation3] sm:$0xff] }
0x2bb1   : > { %2864 = vst.msk [vmem:[#allocation3 + $0xb] sm:$0x1] %vm1532_vm4, %v2862_v33 }
0x2bb4   : > { %v3104_v35 = vpop.permute.xlu1 %3103 }
0x2bb5   : > { %3106 = vst.msk [vmem:[#allocation3 + $0xd] sm:$0x1] %vm1532_vm4, %v3104_v35 }
0x2c0d   : > { %v3339_v36 = vpop.permute.xlu1 %3338 }
0x2c0e   : > { %3341 = vst.msk [vmem:[#allocation3 + $0xf] sm:$0x1] %vm1532_vm4, %v3339_v36  ;;  %3342 = vst.msk [vmem:[%s5648_s20 + $0x1] sm:$0x1] %vm1532_vm4, %v3339_v36 }
0x2c11   : > { %v3226_v37 = vpop.permute.xlu1 %3225 }
0x2c12   : > { %3228 = vst.msk [vmem:[%s5714_s22] sm:$0x1] %vm1532_vm4, %v3226_v37 }
0x2c15   : > { %v3345_v42 = vpop.permute.xlu1 %3344  ;;  %v3349_v46 = vld [vmem:[#allocation3 + $0x8] sm:$0xff] }
0x2c16   : > { %3347 = vst.msk [vmem:[%s5714_s22 + $0x1] sm:$0x1] %vm1532_vm4, %v3345_v42  ;;  %v4192_v47 = vpack.c.bf16 %v3349_v46, %v3348_v44 }
0x2c18   : > { %4194 = vmatpush3.bf16.xpose.msk.msra.mxu1 %vm4193_vm5, %v4192_v47 }
0x2c1f   : > { %3873 = vmatmul.mubr.msk.f32.vlgmr.msra.gmra.mrb[32].mxu1 %vm626_vm1, %v3364_v49 }
0x2c20   : > { %4634 = shalt.err (!%p4631_p0)
}
0x2c21   : > { %s4635_s20 = scalar_lea.hbm %s5731_s17, 32  ;;  %s4639_s11 = scalar_lea.hbm %s5882_s14, 256 }
0x2c22   : > { %p4636_p10 = scmp.ne.s32.totalorder %s5731_s17, %s4635_s20  ;;  %p4640_p4 = scmp.lt.u32.totalorder %s5731_s17, %s5882_s14 }
0x2c23   : > { %p4641_p12 = scmp.lt.u32.totalorder %s4639_s11, %s4635_s20  ;;  %p4643_p8 = scmp.lt.u32.totalorder %s4635_s20, %s5731_s17 }
0x2c24   : > { %p4637_p2 = pnand %p4636_p10, %p5883_p11 }
0x2c25   : > { %p4642_p7 = por %p4641_p12, %p4640_p4 }
0x2c26   : > { %p4638_p3 = pneg %p4637_p2 }
0x2c27   : > { %p4644_p13 = por %p4643_p8, %p4642_p7 }
0x2c29   : > { %p4645_p1 = pnand %p4644_p13, %p4638_p3 }
0x2c2b   : > { %4648 = shalt.err (!%p4645_p1)
}
0x2c2c   : > { %4212 = dma.vmem_to_hbm [thread:$0]  (%p5883_p11), %s3488_s13, 32, %s5731_s17, %s5735_s28  }
0x2c2d   : > { %s5884_s16 = sld [smem:[#allocation29_spill]]  ;;  %s4649_s30 = scalar_lea.vmem %s3501_s12, 32 }
0x2c2e   : > { %p4650_p6 = scmp.ne.s32.totalorder %s3501_s12, %s4649_s30  ;;  %s4771_s20 = smov [#allocation15]  }
0x2c2f   : > { %s4653_s11 = sshll.u32 %s4771_s20, 4  ;;  %s4654_s11 = int_to_ptr.vmem [resolvable:$false] %s4653_s11 }
0x2c30   : > { %p4651_p9 = pnand %p4650_p6, %p5883_p11  ;;  %s4655_s23 = scalar_lea.vmem %s4654_s11, 64 }
0x2c31   : > { %p4656_p0 = scmp.lt.s32.totalorder %s3501_s12, %s4654_s11  ;;  %p4657_p10 = scmp.lt.s32.totalorder %s4655_s23, %s4649_s30 }
0x2c32   : > { %p4652_p5 = pneg %p4651_p9 }
0x2c33   : > { %s3498_s27 = scalar_lea.hbm %s5884_s16, %s3762_s15  ;;  %p4658_p2 = por %p4657_p10, %p4656_p0 }
0x2c35   : > { %p4659_p3 = pnand %p4658_p2, %p4652_p5 }
0x2c37   : > { %4662 = shalt.err (!%p4659_p3)
}
0x2c38   : > { %s4663_s22 = scalar_lea.hbm %s3498_s27, 32  ;;  %s4667_s13 = scalar_lea.hbm %s5884_s16, 256 }
0x2c39   : > { %p4664_p4 = scmp.ne.s32.totalorder %s3498_s27, %s4663_s22  ;;  %p4668_p8 = scmp.lt.u32.totalorder %s3498_s27, %s5884_s16 }
0x2c3a   : > { %p4669_p13 = scmp.lt.u32.totalorder %s4667_s13, %s4663_s22  ;;  %p4671_p6 = scmp.lt.u32.totalorder %s4663_s22, %s3498_s27 }
0x2c3b   : > { %p4665_p12 = pnand %p4664_p4, %p5883_p11 }
0x2c3c   : > { %p4670_p1 = por %p4669_p13, %p4668_p8 }
0x2c3d   : > { %p4666_p7 = pneg %p4665_p12 }
0x2c3e   : > { %p4672_p9 = por %p4671_p6, %p4670_p1 }
0x2c40   : > { %p4673_p5 = pnand %p4672_p9, %p4666_p7 }
0x2c42   : > { %4676 = shalt.err (!%p4673_p5)
}
0x2c43   : > { %4213 = dma.vmem_to_hbm [thread:$0]  (%p5883_p11), %s3501_s12, 32, %s3498_s27, %s5735_s28   ;;  %v4772_v52 = vmov 839922192   ;;  %v3352_v62 = vpop.permute.xlu0 %3351  ;;  %v3368_v25 = vsub.s32 3, %v5339_v14  ;;  %vm3449_vm1 = vcmask 122880  }
0x2c44   : > { %v3355_v53 = vunpack.c.l.s4 %v4772_v52  ;;  %s3761_s24 = sshll.u32 %s4865_s29, 4  ;;  %s508_s30 = scalar_lea.vmem [#allocation12], %s5642_s19 }
0x2c45   : > { %s3474_s20 = sshll.u32 %s508_s30, 4  ;;  %s5885_s27 = sld [smem:[#allocation27_spill]]  ;;  %s5784_s20 = int_to_ptr.vmem [resolvable:$true] %s3474_s20 }
0x2c46   : > { %v3356_v51 = vunpack.c.0.s8 %v3355_v53  ;;  %s3452_s22 = scalar_lea.sflag [#allocation6], %s5642_s19  ;;  %s4677_s15 = scalar_lea.vmem %s5784_s20, 16 }
0x2c47   : > { %p4678_p0 = scmp.ne.s32.totalorder %s5784_s20, %s4677_s15  ;;  %s4773_s29 = smov [#allocation12]  }
0x2c48   : > { %v3359_v54 = vsub.s32 %v3356_v51, %v5339_v14  ;;  %s4681_s17 = sshll.u32 %s4773_s29, 4  ;;  %s4682_s17 = int_to_ptr.vmem [resolvable:$false] %s4681_s17 }
0x2c49   : > { %p4679_p10 = pnand %p4678_p0, %p5883_p11  ;;  %s4683_s13 = scalar_lea.vmem %s4682_s17, 32 }
0x2c4a   : > { %v3360_v3 = vrot.slane %v3352_v62, %v3359_v54  ;;  %p4684_p3 = scmp.lt.s32.totalorder %s5784_s20, %s4682_s17  ;;  %p4685_p4 = scmp.lt.s32.totalorder %s4683_s13, %s4677_s15 }
0x2c4b   : > { %s5886_s11 = smov %s5885_s27  ;;  %s5782_s23 = scalar_lea.hbm %s5885_s27, %s3761_s24 }
0x2c4c   : > { %v3369_v15 = vrot.slane %v3360_v3, %v3368_v25  ;;  %p4680_p2 = pneg %p4679_p10  ;;  %p4686_p12 = por %p4685_p4, %p4684_p3 }
0x2c4e   : > { %p4687_p7 = pnand %p4686_p12, %p4680_p2 }
0x2cf2   : > { %v3445_v34 = vpop.f32.mrb[32].mxu1 }
0x2cf3   : > { %v3446_v57 = vadd.f32 %v3445_v34, %v3369_v15  ;;  %v3874_v43 = vpop.f32.mrb[33].mxu1 }
0x2cf5   : > { %3450 = vst.msk [vmem:[%s508_s30] sm:$0x1] %vm3449_vm1, %v3446_v57 }
0x2cf6   : > { %4690 = shalt.err (!%p4687_p7)
}
0x2cf7   : > { %s4691_s19 = scalar_lea.hbm %s5782_s23, 16  ;;  %s4695_s24 = scalar_lea.hbm %s5886_s11, 128 }
0x2cf8   : > { %p4692_p8 = scmp.ne.s32.totalorder %s5782_s23, %s4691_s19  ;;  %p4696_p6 = scmp.lt.u32.totalorder %s5782_s23, %s5886_s11 }
0x2cf9   : > { %p4697_p9 = scmp.lt.u32.totalorder %s4695_s24, %s4691_s19  ;;  %p4699_p0 = scmp.lt.u32.totalorder %s4691_s19, %s5782_s23 }
0x2cfa   : > { %p4693_p13 = pnand %p4692_p8, %p5883_p11 }
0x2cfb   : > { %p4698_p5 = por %p4697_p9, %p4696_p6 }
0x2cfc   : > { %p4694_p1 = pneg %p4693_p13 }
0x2cfd   : > { %p4700_p10 = por %p4699_p0, %p4698_p5 }
0x2cff   : > { %p4701_p2 = pnand %p4700_p10, %p4694_p1 }
0x2d01   : > { %4704 = shalt.err (!%p4701_p2)
}
0x2d02   : > { %4211 = dma.vmem_to_hbm [thread:$0]  (%p5883_p11), %s5784_s20, 16, %s5782_s23, %s3452_s22  }
0x2d03 PF: > { %s5887_s28 = sld [smem:[#allocation23_spill]]  ;;  %s5888_s27 = sld [smem:[#allocation21_spill]] }
0x2d04   : > { %s5889_s15 = sld [smem:[#allocation26_spill]] }
0x2d09   : > { %p4248_p3 = scmp.ge.s32.totalorder %s5887_s28, 2  ;;  %s3512_s29 = sand.u32 1, %s5888_s27  }
0x2d0a   : > { %p5890_p4 = scmp.ne.s32.totalorder %s5889_s15, 0  ;;  %s3513_s17 = scalar_lea.sflag [#allocation6], %s3512_s29 }
0x2d0c   : > { %p4231_p12 = pnand %p4248_p3, %p5890_p4 }
0x2d0e   : > { %4734 = dma.done.wait (!%p4231_p12), %s3513_s17, 16  }
0x2d0f   : > { %4736 = vsyncadd (!%p4231_p12), %s3513_s17, 4294967280  ;;  %s5891_s13 = sadd.s32 4294967294, %s5887_s28  }
0x2d10   : > { %s3520_s19 = sand.u32 1, %s5891_s13  }
0x2d11   : > { %s3521_s21 = scalar_lea.sflag [#allocation14], %s3520_s19 }
0x2d12   : > { %4738 = dma.done.wait (!%p4231_p12), %s3521_s21, 64  }
0x2d13   : > { %4740 = vsyncadd (!%p4231_p12), %s3521_s21, 4294967232  ;;  %s5892_s28 = sld [smem:[#allocation24_spill]]  ;;  %s5893_s18 = sld [smem:[#allocation22_spill]] }
0x2d14   : > { %s5894_s27 = sld [smem:[#allocation25_spill]]  ;;  %s5895_s25 = smov %s4747_s26 }
0x2d19   : > { %p30_p11 = scmp.ge.s32.totalorder %s5892_s28, 10   ;;  %s5896_s26 = smov %s5893_s18 }
0x2d1b   :  { %32 = sbr.rel (!%p30_p11) target bundleno = 12 (0xc), region = 166 }
0x2d22   :  { %3535 = vsyncpa [#allocation5], 1 }
0x2d23   :  { %3537 = vsyncpa [#allocation5 + $0x1], 1 }
0x2d24   :  { %3538 = vsyncpa [#allocation8], 1 }
0x2d25   :  { %3539 = vsyncpa [#allocation11], 1 }
0x2d26   :  { %3540 = vsyncpa [#allocation6], 1 }
0x2d27   :  { %3542 = vsyncpa [#allocation6 + $0x1], 1 }
0x2d28   :  { %3543 = vsyncpa [#allocation14], 1 }
0x2d29   :  { %3545 = vsyncpa [#allocation14 + $0x1], 1 }

</bundles_post_ra>
